<compile_context>
chip_gen: v6e
topology: v6e:2x2x1
jax: 0.10.0
libtpu: 0.0.40
codegen_flags: <defaults>
</compile_context>

<pallas_src>
import math

import jax
import jax.numpy as jnp
from jax import lax
from jax.experimental import pallas as pl
from jax.experimental.pallas import tpu as pltpu

# ----------------------------- config (small, synthetic) --------------------
B = 2            # batch
S = 16           # sequence length (== max position embeddings)
H = 32           # hidden size
NH = 2           # attention heads
DH = H // NH     # head dim
I = 64           # FFN intermediate size
L = 2            # number of encoder layers
V = 128          # vocab size (must be > 103 so CLS/SEP/MASK ids fit)
N_TOK = B * S    # flattened token count

CLS_ID, SEP_ID, PAD_ID, MASK_ID = 101, 102, 0, 103
ATTN_SCALE = 1.0 / math.sqrt(DH)
LN_EPS = 1e-12

# ---- "vec" slab row layout (each row is one (<=128,) vector, lane-padded) ---
_R_EMB_LN_G = 0
_R_EMB_LN_B = 1
_R_LAYER0 = 2
_ROWS_PER_LAYER = 10
(_O_BQ, _O_BK, _O_BV, _O_BO, _O_LN1G, _O_LN1B,
 _O_B1, _O_B2, _O_LN2G, _O_LN2B) = range(_ROWS_PER_LAYER)
_R_HEAD_B = _R_LAYER0 + L * _ROWS_PER_LAYER      # 22
_R_HEAD_LN_G = _R_HEAD_B + 1                     # 23
_R_HEAD_LN_B = _R_HEAD_B + 2                     # 24
_R_DEC_B = _R_HEAD_B + 3                         # 25
_VEC_ROWS = 32                                   # padded to multiple of 8
_VEC_LANES = 128

# ---- "w_hh" slab index layout: per layer [wq, wk, wv, wo], then head_w ------
_N_HH = 4 * L + 1


# ----------------------------- fused Pallas kernel ---------------------------
def _ln(x, g, b):
    mu = jnp.mean(x, axis=-1, keepdims=True)
    var = jnp.mean((x - mu) ** 2, axis=-1, keepdims=True)
    return (x - mu) * lax.rsqrt(var + LN_EPS) * g + b


def _fused_mlm_kernel(
    tok_ref,        # (2, N, 1) int32 : [masked ids, labels(-100=ignore)]
    attn_bias_ref,  # (B*NH*S, S) f32 : pre-broadcast additive attention bias
    emb_ref,        # (V+N, H) f32    : rows [0,V)=word_emb, [V,V+N)=pos+type
    w_hh_ref,       # (4L+1, H, H) f32: [wq,wk,wv,wo]*L + head_w (wq pre-scaled)
    w_hi_ref,       # (2L, H, I) f32  : [w1_l, w2_l^T] per layer
    vec_ref,        # (32, 128) f32   : packed biases / LN params / decoder_b
    out_ref,        # (2,) f32 SMEM   : [loss_sum, valid_count]
    ctx_ref,        # (N, H) f32 VMEM scratch (attention context)
):
    def vrow(r, width=H):
        return vec_ref[r:r + 1, 0:width]             # (1, width), static slice

    ids = tok_ref[0]                                  # (N, 1) i32
    labels = tok_ref[1]                               # (N, 1) i32
    word_emb = emb_ref[0:V, :]                        # (V, H)
    pos_type = emb_ref[V:V + N_TOK, :]                # (N, H)

    # ---- embedding lookup as a one-hot matmul (MXU), then embedding-LN ------
    iota_v = lax.broadcasted_iota(jnp.int32, (N_TOK, V), 1)
    onehot = (iota_v == ids).astype(jnp.float32)      # (N, V)
    x = jnp.dot(onehot, word_emb, preferred_element_type=jnp.float32)
    x = x + pos_type
    x = _ln(x, vrow(_R_EMB_LN_G), vrow(_R_EMB_LN_B))  # (N, H)

    # constant 0/1 per-head column masks, pre-broadcast once (no CSE of bcasts)
    lane = lax.broadcasted_iota(jnp.int32, (S, H), 1)
    head_masks = [((lane >= h * DH) & (lane < (h + 1) * DH)).astype(jnp.float32)
                  for h in range(NH)]

    attn_bias = attn_bias_ref[...]                    # (B*NH*S, S)

    # ---- encoder layers (unrolled; all weights VMEM-resident) ---------------
    for l in range(L):
        base = _R_LAYER0 + l * _ROWS_PER_LAYER
        wq = w_hh_ref[4 * l + 0]                      # ATTN_SCALE pre-folded
        wk = w_hh_ref[4 * l + 1]
        wv = w_hh_ref[4 * l + 2]
        wo = w_hh_ref[4 * l + 3]

        q = jnp.dot(x, wq, preferred_element_type=jnp.float32) + vrow(base + _O_BQ)
        k = jnp.dot(x, wk, preferred_element_type=jnp.float32) + vrow(base + _O_BK)
        v = jnp.dot(x, wv, preferred_element_type=jnp.float32) + vrow(base + _O_BV)

        # scores for every (batch, head) pair, sublane-stacked (tile-aligned)
        blocks = []
        for b in range(B):
            r0 = b * S
            qb = q[r0:r0 + S, :]                      # (S, H)
            kb = k[r0:r0 + S, :]
            for h in range(NH):
                blocks.append(
                    lax.dot_general(qb * head_masks[h], kb,
                                    (((1,), (1,)), ((), ())),
                                    preferred_element_type=jnp.float32))
        scores = jnp.concatenate(blocks, axis=0) + attn_bias   # (B*NH*S, S)

        # one batched softmax for all B*NH score matrices
        m = jnp.max(scores, axis=-1, keepdims=True)
        p = jnp.exp(scores - m)
        p = p * pl.reciprocal(jnp.sum(p, axis=-1, keepdims=True), approx=True)

        # context: head outputs land in their own columns via the V-mask;
        # write each batch block straight into the VMEM scratch (no concat).
        for b in range(B):
            r0 = b * S
            vb = v[r0:r0 + S, :]
            acc = None
            for h in range(NH):
                pr0 = (b * NH + h) * S
                part = jnp.dot(p[pr0:pr0 + S, :], vb * head_masks[h],
                               preferred_element_type=jnp.float32)
                acc = part if acc is None else acc + part
            ctx_ref[r0:r0 + S, :] = acc

        attn_out = (jnp.dot(ctx_ref[...], wo, preferred_element_type=jnp.float32)
                    + vrow(base + _O_BO))
        # fused residual + LayerNorm
        x = _ln(x + attn_out, vrow(base + _O_LN1G), vrow(base + _O_LN1B))

        w1 = w_hi_ref[2 * l + 0]                      # (H, I)
        w2t = w_hi_ref[2 * l + 1]                     # (H, I) == w2^T
        ff = (jnp.dot(x, w1, preferred_element_type=jnp.float32)
              + vrow(base + _O_B1, I))
        ff = jax.nn.gelu(ff, approximate=True)
        ff = (lax.dot_general(ff, w2t, (((1,), (1,)), ((), ())),
                              preferred_element_type=jnp.float32)
              + vrow(base + _O_B2))
        x = _ln(x + ff, vrow(base + _O_LN2G), vrow(base + _O_LN2B))

    # ---- MLM head (transform + LN + tied decoder) ---------------------------
    head_w = w_hh_ref[4 * L]
    hh = jnp.dot(x, head_w, preferred_element_type=jnp.float32) + vrow(_R_HEAD_B)
    hh = jax.nn.gelu(hh, approximate=True)
    hh = _ln(hh, vrow(_R_HEAD_LN_G), vrow(_R_HEAD_LN_B))

    # decoder tied to word embeddings: contract over H, lane-dense V=128 output
    logits = lax.dot_general(hh, word_emb, (((1,), (1,)), ((), ())),
                             preferred_element_type=jnp.float32)
    logits = logits + vrow(_R_DEC_B, V)               # (N, V)

    # ---- masked cross-entropy sums (divide happens in the wrapper) ----------
    m2 = jnp.max(logits, axis=-1, keepdims=True)
    lse = m2 + jnp.log(jnp.sum(jnp.exp(logits - m2), axis=-1, keepdims=True))
    label_onehot = (iota_v == labels).astype(jnp.float32)   # -100 -> all zeros
    picked = jnp.sum(logits * label_onehot, axis=-1, keepdims=True)
    valid = (labels != -100).astype(jnp.float32)

    out_ref[0] = jnp.sum(lse * valid - picked)        # summed NLL over masked
    out_ref[1] = jnp.sum(valid)                       # number of masked tokens


_VMEM_SPEC = pl.BlockSpec(memory_space=pltpu.MemorySpace.VMEM)
_SMEM_SPEC = pl.BlockSpec(memory_space=pltpu.MemorySpace.SMEM)


def fused_mlm_loss(packed, tok_io, attn_bias):
    sums = pl.pallas_call(
        _fused_mlm_kernel,
        out_shape=jax.ShapeDtypeStruct((2,), jnp.float32),
        in_specs=[_VMEM_SPEC] * 6,
        out_specs=_SMEM_SPEC,
        scratch_shapes=[pltpu.VMEM((N_TOK, H), jnp.float32)],
    )(tok_io, attn_bias, packed["emb"], packed["w_hh"], packed["w_hi"],
      packed["vec"])
    # mean over masked tokens; NaN if none were masked (matches F.cross_entropy
    # with all targets == ignore_index).
    return sums[0] / sums[1]


# ----------------------------- params (synthetic) ----------------------------
def init_params(key):
    keys = iter(jax.random.split(key, 4 + 6 * L))

    def w(shape):
        return jax.random.normal(next(keys), shape, jnp.float32) * 0.02

    return dict(
        word_emb=w((V, H)),
        pos_emb=w((S, H)),
        type_emb=w((2, H)),
        head_w=w((H, H)),
        wq=jnp.stack([w((H, H)) for _ in range(L)]),
        wk=jnp.stack([w((H, H)) for _ in range(L)]),
        wv=jnp.stack([w((H, H)) for _ in range(L)]),
        wo=jnp.stack([w((H, H)) for _ in range(L)]),
        w1=jnp.stack([w((H, I)) for _ in range(L)]),
        w2=jnp.stack([w((I, H)) for _ in range(L)]),
        bq=jnp.zeros((L, H)), bk=jnp.zeros((L, H)), bv=jnp.zeros((L, H)),
        bo=jnp.zeros((L, H)), b1=jnp.zeros((L, I)), b2=jnp.zeros((L, H)),
        ln1_g=jnp.ones((L, H)), ln1_b=jnp.zeros((L, H)),
        ln2_g=jnp.ones((L, H)), ln2_b=jnp.zeros((L, H)),
        emb_ln_g=jnp.ones((H,)), emb_ln_b=jnp.zeros((H,)),
        head_b=jnp.zeros((H,)),
        head_ln_g=jnp.ones((H,)), head_ln_b=jnp.zeros((H,)),
        decoder_b=jnp.zeros((V,)),
    )


def pack_params(p):
    """Pack all weights into 4 VMEM slabs (few DMAs, static in-kernel slices)."""
    # (4L+1, H, H): per layer [wq*scale, wk, wv, wo], then head_w.
    hh = []
    for l in range(L):
        hh += [p["wq"][l] * ATTN_SCALE, p["wk"][l], p["wv"][l], p["wo"][l]]
    hh.append(p["head_w"])
    w_hh = jnp.stack(hh)

    # (2L, H, I): per layer [w1, w2^T] (decoder-style contraction over axis 1).
    hi = []
    for l in range(L):
        hi += [p["w1"][l], p["w2"][l].T]
    w_hi = jnp.stack(hi)

    # (V+N, H): word embeddings followed by (position + token-type-0) rows.
    pos_type = jnp.tile(p["pos_emb"] + p["type_emb"][0][None, :], (B, 1))
    emb = jnp.concatenate([p["word_emb"], pos_type], axis=0)

    # (32, 128): every small vector as one lane-padded row.
    def row(v):
        v = jnp.asarray(v, jnp.float32).reshape(-1)
        return jnp.pad(v, (0, _VEC_LANES - v.shape[0]))

    rows = [row(p["emb_ln_g"]), row(p["emb_ln_b"])]
    for l in range(L):
        rows += [row(p["bq"][l] * ATTN_SCALE), row(p["bk"][l]), row(p["bv"][l]),
                 row(p["bo"][l]), row(p["ln1_g"][l]), row(p["ln1_b"][l]),
                 row(p["b1"][l]), row(p["b2"][l]),
                 row(p["ln2_g"][l]), row(p["ln2_b"][l])]
    rows += [row(p["head_b"]), row(p["head_ln_g"]), row(p["head_ln_b"]),
             row(p["decoder_b"])]
    while len(rows) < _VEC_ROWS:
        rows.append(jnp.zeros((_VEC_LANES,), jnp.float32))
    vec = jnp.stack(rows)

    return dict(emb=emb, w_hh=w_hh, w_hi=w_hi, vec=vec)


# ----------------------------- forward (glue) ---------------------------------
def mlm_bert_forward(packed, input_id, attention_mask, rng):
    """Semantics of MLMBert.forward(mode='random'): random 15% masking of
    non-special / non-pad tokens, labels=-100 elsewhere, mean masked-LM loss."""
    rand = jax.random.uniform(rng, input_id.shape)
    mask_sel = ((rand < 0.15)
                & (input_id != CLS_ID)
                & (input_id != SEP_ID)
                & (input_id != PAD_ID))
    masked_ids = jnp.where(mask_sel, MASK_ID, input_id)
    labels = jnp.where(masked_ids == MASK_ID, input_id, -100)

    tok_io = jnp.stack([masked_ids.reshape(N_TOK, 1),
                        labels.reshape(N_TOK, 1)]).astype(jnp.int32)  # (2,N,1)

    # additive attention bias, pre-broadcast to the stacked (B*NH*S, S) layout
    bias_b = (1.0 - attention_mask.astype(jnp.float32)) * -10000.0    # (B, S)
    attn_bias = jnp.broadcast_to(bias_b[:, None, None, :],
                                 (B, NH, S, S)).reshape(B * NH * S, S)

    return fused_mlm_loss(packed, tok_io, attn_bias)


# ----------------------------- main -------------------------------------------
if __name__ == "__main__":
    key = jax.random.PRNGKey(0)
    k_param, k_ids, k_maskrng = jax.random.split(key, 3)

    params = init_params(k_param)
    packed = pack_params(params)

    # Deterministic synthetic batch: [CLS] tok ... tok [SEP] [PAD]...
    ids = jax.random.randint(k_ids, (B, S), 3, 100, dtype=jnp.int32)
    ids = ids.at[:, 0].set(CLS_ID)
    ids = ids.at[0, S - 1].set(SEP_ID)
    ids = ids.at[1, 11].set(SEP_ID)
    ids = ids.at[1, 12:].set(PAD_ID)
    attn_mask = (ids != PAD_ID).astype(jnp.float32)

    loss = jax.jit(mlm_bert_forward)(packed, ids, attn_mask, k_maskrng)
    jax.block_until_ready(loss)
    print("KERNEL_OK")
</pallas_src>

<mosaic_0001>
module attributes {stable_mosaic.version = 11 : i64} {
  func.func @_fused_mlm_kernel(%arg0: memref<2x32x1xi32, #tpu.memory_space<vmem>>, %arg1: memref<64x16xf32, #tpu.memory_space<vmem>>, %arg2: memref<160x32xf32, #tpu.memory_space<vmem>>, %arg3: memref<9x32x32xf32, #tpu.memory_space<vmem>>, %arg4: memref<4x32x64xf32, #tpu.memory_space<vmem>>, %arg5: memref<32x128xf32, #tpu.memory_space<vmem>>, %arg6: memref<2xf32, #tpu.memory_space<smem>>, %arg7: memref<32x32xf32, #tpu.memory_space<vmem>>) attributes {dimension_semantics = [], scalar_prefetch = 0 : i64, scratch_operands = 1 : i64, tpu.core_type = #tpu.core_type<tc>} {
    %c0 = arith.constant 0 : index
    %c0_0 = arith.constant 0 : index
    %c0_1 = arith.constant 0 : index
    %0 = vector.load %arg0[%c0, %c0_0, %c0_1] : memref<2x32x1xi32, #tpu.memory_space<vmem>>, vector<1x32x1xi32>
    %1 = vector.shape_cast %0 : vector<1x32x1xi32> to vector<32x1xi32>
    %c1 = arith.constant 1 : index
    %c0_2 = arith.constant 0 : index
    %c0_3 = arith.constant 0 : index
    %2 = vector.load %arg0[%c1, %c0_2, %c0_3] : memref<2x32x1xi32, #tpu.memory_space<vmem>>, vector<1x32x1xi32>
    %3 = vector.shape_cast %2 : vector<1x32x1xi32> to vector<32x1xi32>
    %c0_4 = arith.constant 0 : index
    %c0_5 = arith.constant 0 : index
    %4 = vector.load %arg2[%c0_4, %c0_5] : memref<160x32xf32, #tpu.memory_space<vmem>>, vector<128x32xf32>
    %c128 = arith.constant 128 : index
    %c0_6 = arith.constant 0 : index
    %5 = vector.load %arg2[%c128, %c0_6] : memref<160x32xf32, #tpu.memory_space<vmem>>, vector<32x32xf32>
    %6 = tpu.iota {dimensions = array<i32: 1>} : vector<32x128xi32>
    %7 = vector.broadcast %1 : vector<32x1xi32> to vector<32x128xi32>
    %8 = arith.cmpi eq, %6, %7 : vector<32x128xi32>
    %9 = arith.extui %8 : vector<32x128xi1> to vector<32x128xi32>
    %10 = arith.sitofp %9 : vector<32x128xi32> to vector<32x128xf32>
    %cst = arith.constant dense<0.000000e+00> : vector<32x32xf32>
    %11 = tpu.matmul %10, %4, %cst {dimension_numbers = #tpu.dot_dimension_numbers<[1], [0], [0], [1], [0, 0, 1, 1], [], []>} : vector<32x128xf32>, vector<128x32xf32>, vector<32x32xf32> -> vector<32x32xf32>
    %12 = arith.addf %11, %5 : vector<32x32xf32>
    %c0_7 = arith.constant 0 : index
    %c0_8 = arith.constant 0 : index
    %13 = vector.load %arg5[%c0_7, %c0_8] : memref<32x128xf32, #tpu.memory_space<vmem>>, vector<1x32xf32>
    %c1_9 = arith.constant 1 : index
    %c0_10 = arith.constant 0 : index
    %14 = vector.load %arg5[%c1_9, %c0_10] : memref<32x128xf32, #tpu.memory_space<vmem>>, vector<1x32xf32>
    %cst_11 = arith.constant dense<0.000000e+00> : vector<32xf32>
    %15 = vector.multi_reduction <add>, %12, %cst_11 [1] : vector<32x32xf32> to vector<32xf32>
    %16 = vector.shape_cast %15 : vector<32xf32> to vector<32x1xf32>
    %cst_12 = arith.constant 3.200000e+01 : f32
    %17 = vector.broadcast %cst_12 : f32 to vector<32x1xf32>
    %18 = arith.divf %16, %17 : vector<32x1xf32>
    %19 = vector.broadcast %18 : vector<32x1xf32> to vector<32x32xf32>
    %20 = arith.subf %12, %19 : vector<32x32xf32>
    %21 = arith.mulf %20, %20 : vector<32x32xf32>
    %cst_13 = arith.constant dense<0.000000e+00> : vector<32xf32>
    %22 = vector.multi_reduction <add>, %21, %cst_13 [1] : vector<32x32xf32> to vector<32xf32>
    %23 = vector.shape_cast %22 : vector<32xf32> to vector<32x1xf32>
    %cst_14 = arith.constant 3.200000e+01 : f32
    %24 = vector.broadcast %cst_14 : f32 to vector<32x1xf32>
    %25 = arith.divf %23, %24 : vector<32x1xf32>
    %26 = vector.broadcast %18 : vector<32x1xf32> to vector<32x32xf32>
    %27 = arith.subf %12, %26 : vector<32x32xf32>
    %cst_15 = arith.constant 9.99999996E-13 : f32
    %28 = vector.broadcast %cst_15 : f32 to vector<32x1xf32>
    %29 = arith.addf %25, %28 : vector<32x1xf32>
    %30 = math.rsqrt %29 : vector<32x1xf32>
    %31 = vector.broadcast %30 : vector<32x1xf32> to vector<32x32xf32>
    %32 = arith.mulf %27, %31 : vector<32x32xf32>
    %33 = vector.broadcast %13 : vector<1x32xf32> to vector<32x32xf32>
    %34 = arith.mulf %32, %33 : vector<32x32xf32>
    %35 = vector.broadcast %14 : vector<1x32xf32> to vector<32x32xf32>
    %36 = arith.addf %34, %35 : vector<32x32xf32>
    %37 = tpu.iota {dimensions = array<i32: 1>} : vector<16x32xi32>
    %c0_i32 = arith.constant 0 : i32
    %38 = vector.broadcast %c0_i32 : i32 to vector<16x32xi32>
    %39 = arith.cmpi sge, %37, %38 : vector<16x32xi32>
    %c16_i32 = arith.constant 16 : i32
    %40 = vector.broadcast %c16_i32 : i32 to vector<16x32xi32>
    %41 = arith.cmpi slt, %37, %40 : vector<16x32xi32>
    %42 = arith.andi %39, %41 : vector<16x32xi1>
    %43 = arith.extui %42 : vector<16x32xi1> to vector<16x32xi32>
    %44 = arith.sitofp %43 : vector<16x32xi32> to vector<16x32xf32>
    %c16_i32_16 = arith.constant 16 : i32
    %45 = vector.broadcast %c16_i32_16 : i32 to vector<16x32xi32>
    %46 = arith.cmpi sge, %37, %45 : vector<16x32xi32>
    %c32_i32 = arith.constant 32 : i32
    %47 = vector.broadcast %c32_i32 : i32 to vector<16x32xi32>
    %48 = arith.cmpi slt, %37, %47 : vector<16x32xi32>
    %49 = arith.andi %46, %48 : vector<16x32xi1>
    %50 = arith.extui %49 : vector<16x32xi1> to vector<16x32xi32>
    %51 = arith.sitofp %50 : vector<16x32xi32> to vector<16x32xf32>
    %c0_17 = arith.constant 0 : index
    %c0_18 = arith.constant 0 : index
    %52 = vector.load %arg1[%c0_17, %c0_18] : memref<64x16xf32, #tpu.memory_space<vmem>>, vector<64x16xf32>
    %c0_19 = arith.constant 0 : index
    %c0_20 = arith.constant 0 : index
    %c0_21 = arith.constant 0 : index
    %53 = vector.load %arg3[%c0_19, %c0_20, %c0_21] : memref<9x32x32xf32, #tpu.memory_space<vmem>>, vector<1x32x32xf32>
    %54 = vector.shape_cast %53 : vector<1x32x32xf32> to vector<32x32xf32>
    %c1_22 = arith.constant 1 : index
    %c0_23 = arith.constant 0 : index
    %c0_24 = arith.constant 0 : index
    %55 = vector.load %arg3[%c1_22, %c0_23, %c0_24] : memref<9x32x32xf32, #tpu.memory_space<vmem>>, vector<1x32x32xf32>
    %56 = vector.shape_cast %55 : vector<1x32x32xf32> to vector<32x32xf32>
    %c2 = arith.constant 2 : index
    %c0_25 = arith.constant 0 : index
    %c0_26 = arith.constant 0 : index
    %57 = vector.load %arg3[%c2, %c0_25, %c0_26] : memref<9x32x32xf32, #tpu.memory_space<vmem>>, vector<1x32x32xf32>
    %58 = vector.shape_cast %57 : vector<1x32x32xf32> to vector<32x32xf32>
    %c3 = arith.constant 3 : index
    %c0_27 = arith.constant 0 : index
    %c0_28 = arith.constant 0 : index
    %59 = vector.load %arg3[%c3, %c0_27, %c0_28] : memref<9x32x32xf32, #tpu.memory_space<vmem>>, vector<1x32x32xf32>
    %60 = vector.shape_cast %59 : vector<1x32x32xf32> to vector<32x32xf32>
    %cst_29 = arith.constant dense<0.000000e+00> : vector<32x32xf32>
    %61 = tpu.matmul %36, %54, %cst_29 {dimension_numbers = #tpu.dot_dimension_numbers<[1], [0], [0], [1], [0, 0, 1, 1], [], []>} : vector<32x32xf32>, vector<32x32xf32>, vector<32x32xf32> -> vector<32x32xf32>
    %c2_30 = arith.constant 2 : index
    %c0_31 = arith.constant 0 : index
    %62 = vector.load %arg5[%c2_30, %c0_31] : memref<32x128xf32, #tpu.memory_space<vmem>>, vector<1x32xf32>
    %63 = vector.broadcast %62 : vector<1x32xf32> to vector<32x32xf32>
    %64 = arith.addf %61, %63 : vector<32x32xf32>
    %cst_32 = arith.constant dense<0.000000e+00> : vector<32x32xf32>
    %65 = tpu.matmul %36, %56, %cst_32 {dimension_numbers = #tpu.dot_dimension_numbers<[1], [0], [0], [1], [0, 0, 1, 1], [], []>} : vector<32x32xf32>, vector<32x32xf32>, vector<32x32xf32> -> vector<32x32xf32>
    %c3_33 = arith.constant 3 : index
    %c0_34 = arith.constant 0 : index
    %66 = vector.load %arg5[%c3_33, %c0_34] : memref<32x128xf32, #tpu.memory_space<vmem>>, vector<1x32xf32>
    %67 = vector.broadcast %66 : vector<1x32xf32> to vector<32x32xf32>
    %68 = arith.addf %65, %67 : vector<32x32xf32>
    %cst_35 = arith.constant dense<0.000000e+00> : vector<32x32xf32>
    %69 = tpu.matmul %36, %58, %cst_35 {dimension_numbers = #tpu.dot_dimension_numbers<[1], [0], [0], [1], [0, 0, 1, 1], [], []>} : vector<32x32xf32>, vector<32x32xf32>, vector<32x32xf32> -> vector<32x32xf32>
    %c4 = arith.constant 4 : index
    %c0_36 = arith.constant 0 : index
    %70 = vector.load %arg5[%c4, %c0_36] : memref<32x128xf32, #tpu.memory_space<vmem>>, vector<1x32xf32>
    %71 = vector.broadcast %70 : vector<1x32xf32> to vector<32x32xf32>
    %72 = arith.addf %69, %71 : vector<32x32xf32>
    %73 = vector.extract_strided_slice %64 {offsets = [0, 0], sizes = [16, 32], strides = [1, 1]} : vector<32x32xf32> to vector<16x32xf32>
    %74 = vector.extract_strided_slice %68 {offsets = [0, 0], sizes = [16, 32], strides = [1, 1]} : vector<32x32xf32> to vector<16x32xf32>
    %75 = arith.mulf %73, %44 : vector<16x32xf32>
    %cst_37 = arith.constant dense<0.000000e+00> : vector<16x16xf32>
    %76 = tpu.matmul %75, %74, %cst_37 {dimension_numbers = #tpu.dot_dimension_numbers<[1], [1], [0], [0], [0, 0, 1, 0], [], []>} : vector<16x32xf32>, vector<16x32xf32>, vector<16x16xf32> -> vector<16x16xf32>
    %77 = arith.mulf %73, %51 : vector<16x32xf32>
    %cst_38 = arith.constant dense<0.000000e+00> : vector<16x16xf32>
    %78 = tpu.matmul %77, %74, %cst_38 {dimension_numbers = #tpu.dot_dimension_numbers<[1], [1], [0], [0], [0, 0, 1, 0], [], []>} : vector<16x32xf32>, vector<16x32xf32>, vector<16x16xf32> -> vector<16x16xf32>
    %79 = vector.extract_strided_slice %64 {offsets = [16, 0], sizes = [16, 32], strides = [1, 1]} : vector<32x32xf32> to vector<16x32xf32>
    %80 = vector.extract_strided_slice %68 {offsets = [16, 0], sizes = [16, 32], strides = [1, 1]} : vector<32x32xf32> to vector<16x32xf32>
    %81 = arith.mulf %79, %44 : vector<16x32xf32>
    %cst_39 = arith.constant dense<0.000000e+00> : vector<16x16xf32>
    %82 = tpu.matmul %81, %80, %cst_39 {dimension_numbers = #tpu.dot_dimension_numbers<[1], [1], [0], [0], [0, 0, 1, 0], [], []>} : vector<16x32xf32>, vector<16x32xf32>, vector<16x16xf32> -> vector<16x16xf32>
    %83 = arith.mulf %79, %51 : vector<16x32xf32>
    %cst_40 = arith.constant dense<0.000000e+00> : vector<16x16xf32>
    %84 = tpu.matmul %83, %80, %cst_40 {dimension_numbers = #tpu.dot_dimension_numbers<[1], [1], [0], [0], [0, 0, 1, 0], [], []>} : vector<16x32xf32>, vector<16x32xf32>, vector<16x16xf32> -> vector<16x16xf32>
    %85 = tpu.concatenate %76, %78, %82, %84 in 0 : vector<16x16xf32>, vector<16x16xf32>, vector<16x16xf32>, vector<16x16xf32> -> vector<64x16xf32>
    %86 = arith.addf %85, %52 : vector<64x16xf32>
    %cst_41 = arith.constant dense<0xFF800000> : vector<64xf32>
    %87 = vector.multi_reduction <maximumf>, %86, %cst_41 [1] : vector<64x16xf32> to vector<64xf32>
    %88 = vector.shape_cast %87 : vector<64xf32> to vector<64x1xf32>
    %89 = vector.broadcast %88 : vector<64x1xf32> to vector<64x16xf32>
    %90 = arith.subf %86, %89 : vector<64x16xf32>
    %91 = math.exp %90 : vector<64x16xf32>
    %cst_42 = arith.constant dense<0.000000e+00> : vector<64xf32>
    %92 = vector.multi_reduction <add>, %91, %cst_42 [1] : vector<64x16xf32> to vector<64xf32>
    %93 = vector.shape_cast %92 : vector<64xf32> to vector<64x1xf32>
    %94 = tpu.reciprocal %93 {approx = true} : vector<64x1xf32> -> vector<64x1xf32>
    %95 = vector.broadcast %94 : vector<64x1xf32> to vector<64x16xf32>
    %96 = arith.mulf %91, %95 : vector<64x16xf32>
    %97 = vector.extract_strided_slice %72 {offsets = [0, 0], sizes = [16, 32], strides = [1, 1]} : vector<32x32xf32> to vector<16x32xf32>
    %98 = vector.extract_strided_slice %96 {offsets = [0, 0], sizes = [16, 16], strides = [1, 1]} : vector<64x16xf32> to vector<16x16xf32>
    %99 = arith.mulf %97, %44 : vector<16x32xf32>
    %cst_43 = arith.constant dense<0.000000e+00> : vector<16x32xf32>
    %100 = tpu.matmul %98, %99, %cst_43 {dimension_numbers = #tpu.dot_dimension_numbers<[1], [0], [0], [1], [0, 0, 1, 1], [], []>} : vector<16x16xf32>, vector<16x32xf32>, vector<16x32xf32> -> vector<16x32xf32>
    %101 = vector.extract_strided_slice %96 {offsets = [16, 0], sizes = [16, 16], strides = [1, 1]} : vector<64x16xf32> to vector<16x16xf32>
    %102 = arith.mulf %97, %51 : vector<16x32xf32>
    %cst_44 = arith.constant dense<0.000000e+00> : vector<16x32xf32>
    %103 = tpu.matmul %101, %102, %cst_44 {dimension_numbers = #tpu.dot_dimension_numbers<[1], [0], [0], [1], [0, 0, 1, 1], [], []>} : vector<16x16xf32>, vector<16x32xf32>, vector<16x32xf32> -> vector<16x32xf32>
    %104 = arith.addf %100, %103 : vector<16x32xf32>
    %c0_45 = arith.constant 0 : index
    %c0_46 = arith.constant 0 : index
    %105 = vector.load %arg7[%c0_45, %c0_46] : memref<32x32xf32, #tpu.memory_space<vmem>>, vector<16x32xf32>
    tpu.vector_store %arg7[%c0_45, %c0_46], %104 {strides = array<i32>} : memref<32x32xf32, #tpu.memory_space<vmem>>, vector<16x32xf32>,
    %106 = vector.extract_strided_slice %72 {offsets = [16, 0], sizes = [16, 32], strides = [1, 1]} : vector<32x32xf32> to vector<16x32xf32>
    %107 = vector.extract_strided_slice %96 {offsets = [32, 0], sizes = [16, 16], strides = [1, 1]} : vector<64x16xf32> to vector<16x16xf32>
    %108 = arith.mulf %106, %44 : vector<16x32xf32>
    %cst_47 = arith.constant dense<0.000000e+00> : vector<16x32xf32>
    %109 = tpu.matmul %107, %108, %cst_47 {dimension_numbers = #tpu.dot_dimension_numbers<[1], [0], [0], [1], [0, 0, 1, 1], [], []>} : vector<16x16xf32>, vector<16x32xf32>, vector<16x32xf32> -> vector<16x32xf32>
    %110 = vector.extract_strided_slice %96 {offsets = [48, 0], sizes = [16, 16], strides = [1, 1]} : vector<64x16xf32> to vector<16x16xf32>
    %111 = arith.mulf %106, %51 : vector<16x32xf32>
    %cst_48 = arith.constant dense<0.000000e+00> : vector<16x32xf32>
    %112 = tpu.matmul %110, %111, %cst_48 {dimension_numbers = #tpu.dot_dimension_numbers<[1], [0], [0], [1], [0, 0, 1, 1], [], []>} : vector<16x16xf32>, vector<16x32xf32>, vector<16x32xf32> -> vector<16x32xf32>
    %113 = arith.addf %109, %112 : vector<16x32xf32>
    %c16 = arith.constant 16 : index
    %c0_49 = arith.constant 0 : index
    %114 = vector.load %arg7[%c16, %c0_49] : memref<32x32xf32, #tpu.memory_space<vmem>>, vector<16x32xf32>
    tpu.vector_store %arg7[%c16, %c0_49], %113 {strides = array<i32>} : memref<32x32xf32, #tpu.memory_space<vmem>>, vector<16x32xf32>,
    %c0_50 = arith.constant 0 : index
    %c0_51 = arith.constant 0 : index
    %115 = vector.load %arg7[%c0_50, %c0_51] : memref<32x32xf32, #tpu.memory_space<vmem>>, vector<32x32xf32>
    %cst_52 = arith.constant dense<0.000000e+00> : vector<32x32xf32>
    %116 = tpu.matmul %115, %60, %cst_52 {dimension_numbers = #tpu.dot_dimension_numbers<[1], [0], [0], [1], [0, 0, 1, 1], [], []>} : vector<32x32xf32>, vector<32x32xf32>, vector<32x32xf32> -> vector<32x32xf32>
    %c5 = arith.constant 5 : index
    %c0_53 = arith.constant 0 : index
    %117 = vector.load %arg5[%c5, %c0_53] : memref<32x128xf32, #tpu.memory_space<vmem>>, vector<1x32xf32>
    %118 = vector.broadcast %117 : vector<1x32xf32> to vector<32x32xf32>
    %119 = arith.addf %116, %118 : vector<32x32xf32>
    %120 = arith.addf %36, %119 : vector<32x32xf32>
    %c6 = arith.constant 6 : index
    %c0_54 = arith.constant 0 : index
    %121 = vector.load %arg5[%c6, %c0_54] : memref<32x128xf32, #tpu.memory_space<vmem>>, vector<1x32xf32>
    %c7 = arith.constant 7 : index
    %c0_55 = arith.constant 0 : index
    %122 = vector.load %arg5[%c7, %c0_55] : memref<32x128xf32, #tpu.memory_space<vmem>>, vector<1x32xf32>
    %cst_56 = arith.constant dense<0.000000e+00> : vector<32xf32>
    %123 = vector.multi_reduction <add>, %120, %cst_56 [1] : vector<32x32xf32> to vector<32xf32>
    %124 = vector.shape_cast %123 : vector<32xf32> to vector<32x1xf32>
    %cst_57 = arith.constant 3.200000e+01 : f32
    %125 = vector.broadcast %cst_57 : f32 to vector<32x1xf32>
    %126 = arith.divf %124, %125 : vector<32x1xf32>
    %127 = vector.broadcast %126 : vector<32x1xf32> to vector<32x32xf32>
    %128 = arith.subf %120, %127 : vector<32x32xf32>
    %129 = arith.mulf %128, %128 : vector<32x32xf32>
    %cst_58 = arith.constant dense<0.000000e+00> : vector<32xf32>
    %130 = vector.multi_reduction <add>, %129, %cst_58 [1] : vector<32x32xf32> to vector<32xf32>
    %131 = vector.shape_cast %130 : vector<32xf32> to vector<32x1xf32>
    %cst_59 = arith.constant 3.200000e+01 : f32
    %132 = vector.broadcast %cst_59 : f32 to vector<32x1xf32>
    %133 = arith.divf %131, %132 : vector<32x1xf32>
    %134 = vector.broadcast %126 : vector<32x1xf32> to vector<32x32xf32>
    %135 = arith.subf %120, %134 : vector<32x32xf32>
    %cst_60 = arith.constant 9.99999996E-13 : f32
    %136 = vector.broadcast %cst_60 : f32 to vector<32x1xf32>
    %137 = arith.addf %133, %136 : vector<32x1xf32>
    %138 = math.rsqrt %137 : vector<32x1xf32>
    %139 = vector.broadcast %138 : vector<32x1xf32> to vector<32x32xf32>
    %140 = arith.mulf %135, %139 : vector<32x32xf32>
    %141 = vector.broadcast %121 : vector<1x32xf32> to vector<32x32xf32>
    %142 = arith.mulf %140, %141 : vector<32x32xf32>
    %143 = vector.broadcast %122 : vector<1x32xf32> to vector<32x32xf32>
    %144 = arith.addf %142, %143 : vector<32x32xf32>
    %c0_61 = arith.constant 0 : index
    %c0_62 = arith.constant 0 : index
    %c0_63 = arith.constant 0 : index
    %145 = vector.load %arg4[%c0_61, %c0_62, %c0_63] : memref<4x32x64xf32, #tpu.memory_space<vmem>>, vector<1x32x64xf32>
    %146 = vector.shape_cast %145 : vector<1x32x64xf32> to vector<32x64xf32>
    %c1_64 = arith.constant 1 : index
    %c0_65 = arith.constant 0 : index
    %c0_66 = arith.constant 0 : index
    %147 = vector.load %arg4[%c1_64, %c0_65, %c0_66] : memref<4x32x64xf32, #tpu.memory_space<vmem>>, vector<1x32x64xf32>
    %148 = vector.shape_cast %147 : vector<1x32x64xf32> to vector<32x64xf32>
    %cst_67 = arith.constant dense<0.000000e+00> : vector<32x64xf32>
    %149 = tpu.matmul %144, %146, %cst_67 {dimension_numbers = #tpu.dot_dimension_numbers<[1], [0], [0], [1], [0, 0, 1, 1], [], []>} : vector<32x32xf32>, vector<32x64xf32>, vector<32x64xf32> -> vector<32x64xf32>
    %c8 = arith.constant 8 : index
    %c0_68 = arith.constant 0 : index
    %150 = vector.load %arg5[%c8, %c0_68] : memref<32x128xf32, #tpu.memory_space<vmem>>, vector<1x64xf32>
    %151 = vector.broadcast %150 : vector<1x64xf32> to vector<32x64xf32>
    %152 = arith.addf %149, %151 : vector<32x64xf32>
    %153 = arith.mulf %152, %152 : vector<32x64xf32>
    %154 = arith.mulf %152, %153 : vector<32x64xf32>
    %cst_69 = arith.constant 4.471500e-02 : f32
    %155 = vector.broadcast %cst_69 : f32 to vector<32x64xf32>
    %156 = arith.mulf %155, %154 : vector<32x64xf32>
    %157 = arith.addf %152, %156 : vector<32x64xf32>
    %cst_70 = arith.constant 0.797884583 : f32
    %158 = vector.broadcast %cst_70 : f32 to vector<32x64xf32>
    %159 = arith.mulf %158, %157 : vector<32x64xf32>
    %160 = math.tanh %159 : vector<32x64xf32>
    %cst_71 = arith.constant 1.000000e+00 : f32
    %161 = vector.broadcast %cst_71 : f32 to vector<32x64xf32>
    %162 = arith.addf %161, %160 : vector<32x64xf32>
    %cst_72 = arith.constant 5.000000e-01 : f32
    %163 = vector.broadcast %cst_72 : f32 to vector<32x64xf32>
    %164 = arith.mulf %163, %162 : vector<32x64xf32>
    %165 = arith.mulf %152, %164 : vector<32x64xf32>
    %cst_73 = arith.constant dense<0.000000e+00> : vector<32x32xf32>
    %166 = tpu.matmul %165, %148, %cst_73 {dimension_numbers = #tpu.dot_dimension_numbers<[1], [1], [0], [0], [0, 0, 1, 0], [], []>} : vector<32x64xf32>, vector<32x64xf32>, vector<32x32xf32> -> vector<32x32xf32>
    %c9 = arith.constant 9 : index
    %c0_74 = arith.constant 0 : index
    %167 = vector.load %arg5[%c9, %c0_74] : memref<32x128xf32, #tpu.memory_space<vmem>>, vector<1x32xf32>
    %168 = vector.broadcast %167 : vector<1x32xf32> to vector<32x32xf32>
    %169 = arith.addf %166, %168 : vector<32x32xf32>
    %170 = arith.addf %144, %169 : vector<32x32xf32>
    %c10 = arith.constant 10 : index
    %c0_75 = arith.constant 0 : index
    %171 = vector.load %arg5[%c10, %c0_75] : memref<32x128xf32, #tpu.memory_space<vmem>>, vector<1x32xf32>
    %c11 = arith.constant 11 : index
    %c0_76 = arith.constant 0 : index
    %172 = vector.load %arg5[%c11, %c0_76] : memref<32x128xf32, #tpu.memory_space<vmem>>, vector<1x32xf32>
    %cst_77 = arith.constant dense<0.000000e+00> : vector<32xf32>
    %173 = vector.multi_reduction <add>, %170, %cst_77 [1] : vector<32x32xf32> to vector<32xf32>
    %174 = vector.shape_cast %173 : vector<32xf32> to vector<32x1xf32>
    %cst_78 = arith.constant 3.200000e+01 : f32
    %175 = vector.broadcast %cst_78 : f32 to vector<32x1xf32>
    %176 = arith.divf %174, %175 : vector<32x1xf32>
    %177 = vector.broadcast %176 : vector<32x1xf32> to vector<32x32xf32>
    %178 = arith.subf %170, %177 : vector<32x32xf32>
    %179 = arith.mulf %178, %178 : vector<32x32xf32>
    %cst_79 = arith.constant dense<0.000000e+00> : vector<32xf32>
    %180 = vector.multi_reduction <add>, %179, %cst_79 [1] : vector<32x32xf32> to vector<32xf32>
    %181 = vector.shape_cast %180 : vector<32xf32> to vector<32x1xf32>
    %cst_80 = arith.constant 3.200000e+01 : f32
    %182 = vector.broadcast %cst_80 : f32 to vector<32x1xf32>
    %183 = arith.divf %181, %182 : vector<32x1xf32>
    %184 = vector.broadcast %176 : vector<32x1xf32> to vector<32x32xf32>
    %185 = arith.subf %170, %184 : vector<32x32xf32>
    %cst_81 = arith.constant 9.99999996E-13 : f32
    %186 = vector.broadcast %cst_81 : f32 to vector<32x1xf32>
    %187 = arith.addf %183, %186 : vector<32x1xf32>
    %188 = math.rsqrt %187 : vector<32x1xf32>
    %189 = vector.broadcast %188 : vector<32x1xf32> to vector<32x32xf32>
    %190 = arith.mulf %185, %189 : vector<32x32xf32>
    %191 = vector.broadcast %171 : vector<1x32xf32> to vector<32x32xf32>
    %192 = arith.mulf %190, %191 : vector<32x32xf32>
    %193 = vector.broadcast %172 : vector<1x32xf32> to vector<32x32xf32>
    %194 = arith.addf %192, %193 : vector<32x32xf32>
    %c4_82 = arith.constant 4 : index
    %c0_83 = arith.constant 0 : index
    %c0_84 = arith.constant 0 : index
    %195 = vector.load %arg3[%c4_82, %c0_83, %c0_84] : memref<9x32x32xf32, #tpu.memory_space<vmem>>, vector<1x32x32xf32>
    %196 = vector.shape_cast %195 : vector<1x32x32xf32> to vector<32x32xf32>
    %c5_85 = arith.constant 5 : index
    %c0_86 = arith.constant 0 : index
    %c0_87 = arith.constant 0 : index
    %197 = vector.load %arg3[%c5_85, %c0_86, %c0_87] : memref<9x32x32xf32, #tpu.memory_space<vmem>>, vector<1x32x32xf32>
    %198 = vector.shape_cast %197 : vector<1x32x32xf32> to vector<32x32xf32>
    %c6_88 = arith.constant 6 : index
    %c0_89 = arith.constant 0 : index
    %c0_90 = arith.constant 0 : index
    %199 = vector.load %arg3[%c6_88, %c0_89, %c0_90] : memref<9x32x32xf32, #tpu.memory_space<vmem>>, vector<1x32x32xf32>
    %200 = vector.shape_cast %199 : vector<1x32x32xf32> to vector<32x32xf32>
    %c7_91 = arith.constant 7 : index
    %c0_92 = arith.constant 0 : index
    %c0_93 = arith.constant 0 : index
    %201 = vector.load %arg3[%c7_91, %c0_92, %c0_93] : memref<9x32x32xf32, #tpu.memory_space<vmem>>, vector<1x32x32xf32>
    %202 = vector.shape_cast %201 : vector<1x32x32xf32> to vector<32x32xf32>
    %cst_94 = arith.constant dense<0.000000e+00> : vector<32x32xf32>
    %203 = tpu.matmul %194, %196, %cst_94 {dimension_numbers = #tpu.dot_dimension_numbers<[1], [0], [0], [1], [0, 0, 1, 1], [], []>} : vector<32x32xf32>, vector<32x32xf32>, vector<32x32xf32> -> vector<32x32xf32>
    %c12 = arith.constant 12 : index
    %c0_95 = arith.constant 0 : index
    %204 = vector.load %arg5[%c12, %c0_95] : memref<32x128xf32, #tpu.memory_space<vmem>>, vector<1x32xf32>
    %205 = vector.broadcast %204 : vector<1x32xf32> to vector<32x32xf32>
    %206 = arith.addf %203, %205 : vector<32x32xf32>
    %cst_96 = arith.constant dense<0.000000e+00> : vector<32x32xf32>
    %207 = tpu.matmul %194, %198, %cst_96 {dimension_numbers = #tpu.dot_dimension_numbers<[1], [0], [0], [1], [0, 0, 1, 1], [], []>} : vector<32x32xf32>, vector<32x32xf32>, vector<32x32xf32> -> vector<32x32xf32>
    %c13 = arith.constant 13 : index
    %c0_97 = arith.constant 0 : index
    %208 = vector.load %arg5[%c13, %c0_97] : memref<32x128xf32, #tpu.memory_space<vmem>>, vector<1x32xf32>
    %209 = vector.broadcast %208 : vector<1x32xf32> to vector<32x32xf32>
    %210 = arith.addf %207, %209 : vector<32x32xf32>
    %cst_98 = arith.constant dense<0.000000e+00> : vector<32x32xf32>
    %211 = tpu.matmul %194, %200, %cst_98 {dimension_numbers = #tpu.dot_dimension_numbers<[1], [0], [0], [1], [0, 0, 1, 1], [], []>} : vector<32x32xf32>, vector<32x32xf32>, vector<32x32xf32> -> vector<32x32xf32>
    %c14 = arith.constant 14 : index
    %c0_99 = arith.constant 0 : index
    %212 = vector.load %arg5[%c14, %c0_99] : memref<32x128xf32, #tpu.memory_space<vmem>>, vector<1x32xf32>
    %213 = vector.broadcast %212 : vector<1x32xf32> to vector<32x32xf32>
    %214 = arith.addf %211, %213 : vector<32x32xf32>
    %215 = vector.extract_strided_slice %206 {offsets = [0, 0], sizes = [16, 32], strides = [1, 1]} : vector<32x32xf32> to vector<16x32xf32>
    %216 = vector.extract_strided_slice %210 {offsets = [0, 0], sizes = [16, 32], strides = [1, 1]} : vector<32x32xf32> to vector<16x32xf32>
    %217 = arith.mulf %215, %44 : vector<16x32xf32>
    %cst_100 = arith.constant dense<0.000000e+00> : vector<16x16xf32>
    %218 = tpu.matmul %217, %216, %cst_100 {dimension_numbers = #tpu.dot_dimension_numbers<[1], [1], [0], [0], [0, 0, 1, 0], [], []>} : vector<16x32xf32>, vector<16x32xf32>, vector<16x16xf32> -> vector<16x16xf32>
    %219 = arith.mulf %215, %51 : vector<16x32xf32>
    %cst_101 = arith.constant dense<0.000000e+00> : vector<16x16xf32>
    %220 = tpu.matmul %219, %216, %cst_101 {dimension_numbers = #tpu.dot_dimension_numbers<[1], [1], [0], [0], [0, 0, 1, 0], [], []>} : vector<16x32xf32>, vector<16x32xf32>, vector<16x16xf32> -> vector<16x16xf32>
    %221 = vector.extract_strided_slice %206 {offsets = [16, 0], sizes = [16, 32], strides = [1, 1]} : vector<32x32xf32> to vector<16x32xf32>
    %222 = vector.extract_strided_slice %210 {offsets = [16, 0], sizes = [16, 32], strides = [1, 1]} : vector<32x32xf32> to vector<16x32xf32>
    %223 = arith.mulf %221, %44 : vector<16x32xf32>
    %cst_102 = arith.constant dense<0.000000e+00> : vector<16x16xf32>
    %224 = tpu.matmul %223, %222, %cst_102 {dimension_numbers = #tpu.dot_dimension_numbers<[1], [1], [0], [0], [0, 0, 1, 0], [], []>} : vector<16x32xf32>, vector<16x32xf32>, vector<16x16xf32> -> vector<16x16xf32>
    %225 = arith.mulf %221, %51 : vector<16x32xf32>
    %cst_103 = arith.constant dense<0.000000e+00> : vector<16x16xf32>
    %226 = tpu.matmul %225, %222, %cst_103 {dimension_numbers = #tpu.dot_dimension_numbers<[1], [1], [0], [0], [0, 0, 1, 0], [], []>} : vector<16x32xf32>, vector<16x32xf32>, vector<16x16xf32> -> vector<16x16xf32>
    %227 = tpu.concatenate %218, %220, %224, %226 in 0 : vector<16x16xf32>, vector<16x16xf32>, vector<16x16xf32>, vector<16x16xf32> -> vector<64x16xf32>
    %228 = arith.addf %227, %52 : vector<64x16xf32>
    %cst_104 = arith.constant dense<0xFF800000> : vector<64xf32>
    %229 = vector.multi_reduction <maximumf>, %228, %cst_104 [1] : vector<64x16xf32> to vector<64xf32>
    %230 = vector.shape_cast %229 : vector<64xf32> to vector<64x1xf32>
    %231 = vector.broadcast %230 : vector<64x1xf32> to vector<64x16xf32>
    %232 = arith.subf %228, %231 : vector<64x16xf32>
    %233 = math.exp %232 : vector<64x16xf32>
    %cst_105 = arith.constant dense<0.000000e+00> : vector<64xf32>
    %234 = vector.multi_reduction <add>, %233, %cst_105 [1] : vector<64x16xf32> to vector<64xf32>
    %235 = vector.shape_cast %234 : vector<64xf32> to vector<64x1xf32>
    %236 = tpu.reciprocal %235 {approx = true} : vector<64x1xf32> -> vector<64x1xf32>
    %237 = vector.broadcast %236 : vector<64x1xf32> to vector<64x16xf32>
    %238 = arith.mulf %233, %237 : vector<64x16xf32>
    %239 = vector.extract_strided_slice %214 {offsets = [0, 0], sizes = [16, 32], strides = [1, 1]} : vector<32x32xf32> to vector<16x32xf32>
    %240 = vector.extract_strided_slice %238 {offsets = [0, 0], sizes = [16, 16], strides = [1, 1]} : vector<64x16xf32> to vector<16x16xf32>
    %241 = arith.mulf %239, %44 : vector<16x32xf32>
    %cst_106 = arith.constant dense<0.000000e+00> : vector<16x32xf32>
    %242 = tpu.matmul %240, %241, %cst_106 {dimension_numbers = #tpu.dot_dimension_numbers<[1], [0], [0], [1], [0, 0, 1, 1], [], []>} : vector<16x16xf32>, vector<16x32xf32>, vector<16x32xf32> -> vector<16x32xf32>
    %243 = vector.extract_strided_slice %238 {offsets = [16, 0], sizes = [16, 16], strides = [1, 1]} : vector<64x16xf32> to vector<16x16xf32>
    %244 = arith.mulf %239, %51 : vector<16x32xf32>
    %cst_107 = arith.constant dense<0.000000e+00> : vector<16x32xf32>
    %245 = tpu.matmul %243, %244, %cst_107 {dimension_numbers = #tpu.dot_dimension_numbers<[1], [0], [0], [1], [0, 0, 1, 1], [], []>} : vector<16x16xf32>, vector<16x32xf32>, vector<16x32xf32> -> vector<16x32xf32>
    %246 = arith.addf %242, %245 : vector<16x32xf32>
    %c0_108 = arith.constant 0 : index
    %c0_109 = arith.constant 0 : index
    %247 = vector.load %arg7[%c0_108, %c0_109] : memref<32x32xf32, #tpu.memory_space<vmem>>, vector<16x32xf32>
    tpu.vector_store %arg7[%c0_108, %c0_109], %246 {strides = array<i32>} : memref<32x32xf32, #tpu.memory_space<vmem>>, vector<16x32xf32>,
    %248 = vector.extract_strided_slice %214 {offsets = [16, 0], sizes = [16, 32], strides = [1, 1]} : vector<32x32xf32> to vector<16x32xf32>
    %249 = vector.extract_strided_slice %238 {offsets = [32, 0], sizes = [16, 16], strides = [1, 1]} : vector<64x16xf32> to vector<16x16xf32>
    %250 = arith.mulf %248, %44 : vector<16x32xf32>
    %cst_110 = arith.constant dense<0.000000e+00> : vector<16x32xf32>
    %251 = tpu.matmul %249, %250, %cst_110 {dimension_numbers = #tpu.dot_dimension_numbers<[1], [0], [0], [1], [0, 0, 1, 1], [], []>} : vector<16x16xf32>, vector<16x32xf32>, vector<16x32xf32> -> vector<16x32xf32>
    %252 = vector.extract_strided_slice %238 {offsets = [48, 0], sizes = [16, 16], strides = [1, 1]} : vector<64x16xf32> to vector<16x16xf32>
    %253 = arith.mulf %248, %51 : vector<16x32xf32>
    %cst_111 = arith.constant dense<0.000000e+00> : vector<16x32xf32>
    %254 = tpu.matmul %252, %253, %cst_111 {dimension_numbers = #tpu.dot_dimension_numbers<[1], [0], [0], [1], [0, 0, 1, 1], [], []>} : vector<16x16xf32>, vector<16x32xf32>, vector<16x32xf32> -> vector<16x32xf32>
    %255 = arith.addf %251, %254 : vector<16x32xf32>
    %c16_112 = arith.constant 16 : index
    %c0_113 = arith.constant 0 : index
    %256 = vector.load %arg7[%c16_112, %c0_113] : memref<32x32xf32, #tpu.memory_space<vmem>>, vector<16x32xf32>
    tpu.vector_store %arg7[%c16_112, %c0_113], %255 {strides = array<i32>} : memref<32x32xf32, #tpu.memory_space<vmem>>, vector<16x32xf32>,
    %c0_114 = arith.constant 0 : index
    %c0_115 = arith.constant 0 : index
    %257 = vector.load %arg7[%c0_114, %c0_115] : memref<32x32xf32, #tpu.memory_space<vmem>>, vector<32x32xf32>
    %cst_116 = arith.constant dense<0.000000e+00> : vector<32x32xf32>
    %258 = tpu.matmul %257, %202, %cst_116 {dimension_numbers = #tpu.dot_dimension_numbers<[1], [0], [0], [1], [0, 0, 1, 1], [], []>} : vector<32x32xf32>, vector<32x32xf32>, vector<32x32xf32> -> vector<32x32xf32>
    %c15 = arith.constant 15 : index
    %c0_117 = arith.constant 0 : index
    %259 = vector.load %arg5[%c15, %c0_117] : memref<32x128xf32, #tpu.memory_space<vmem>>, vector<1x32xf32>
    %260 = vector.broadcast %259 : vector<1x32xf32> to vector<32x32xf32>
    %261 = arith.addf %258, %260 : vector<32x32xf32>
    %262 = arith.addf %194, %261 : vector<32x32xf32>
    %c16_118 = arith.constant 16 : index
    %c0_119 = arith.constant 0 : index
    %263 = vector.load %arg5[%c16_118, %c0_119] : memref<32x128xf32, #tpu.memory_space<vmem>>, vector<1x32xf32>
    %c17 = arith.constant 17 : index
    %c0_120 = arith.constant 0 : index
    %264 = vector.load %arg5[%c17, %c0_120] : memref<32x128xf32, #tpu.memory_space<vmem>>, vector<1x32xf32>
    %cst_121 = arith.constant dense<0.000000e+00> : vector<32xf32>
    %265 = vector.multi_reduction <add>, %262, %cst_121 [1] : vector<32x32xf32> to vector<32xf32>
    %266 = vector.shape_cast %265 : vector<32xf32> to vector<32x1xf32>
    %cst_122 = arith.constant 3.200000e+01 : f32
    %267 = vector.broadcast %cst_122 : f32 to vector<32x1xf32>
    %268 = arith.divf %266, %267 : vector<32x1xf32>
    %269 = vector.broadcast %268 : vector<32x1xf32> to vector<32x32xf32>
    %270 = arith.subf %262, %269 : vector<32x32xf32>
    %271 = arith.mulf %270, %270 : vector<32x32xf32>
    %cst_123 = arith.constant dense<0.000000e+00> : vector<32xf32>
    %272 = vector.multi_reduction <add>, %271, %cst_123 [1] : vector<32x32xf32> to vector<32xf32>
    %273 = vector.shape_cast %272 : vector<32xf32> to vector<32x1xf32>
    %cst_124 = arith.constant 3.200000e+01 : f32
    %274 = vector.broadcast %cst_124 : f32 to vector<32x1xf32>
    %275 = arith.divf %273, %274 : vector<32x1xf32>
    %276 = vector.broadcast %268 : vector<32x1xf32> to vector<32x32xf32>
    %277 = arith.subf %262, %276 : vector<32x32xf32>
    %cst_125 = arith.constant 9.99999996E-13 : f32
    %278 = vector.broadcast %cst_125 : f32 to vector<32x1xf32>
    %279 = arith.addf %275, %278 : vector<32x1xf32>
    %280 = math.rsqrt %279 : vector<32x1xf32>
    %281 = vector.broadcast %280 : vector<32x1xf32> to vector<32x32xf32>
    %282 = arith.mulf %277, %281 : vector<32x32xf32>
    %283 = vector.broadcast %263 : vector<1x32xf32> to vector<32x32xf32>
    %284 = arith.mulf %282, %283 : vector<32x32xf32>
    %285 = vector.broadcast %264 : vector<1x32xf32> to vector<32x32xf32>
    %286 = arith.addf %284, %285 : vector<32x32xf32>
    %c2_126 = arith.constant 2 : index
    %c0_127 = arith.constant 0 : index
    %c0_128 = arith.constant 0 : index
    %287 = vector.load %arg4[%c2_126, %c0_127, %c0_128] : memref<4x32x64xf32, #tpu.memory_space<vmem>>, vector<1x32x64xf32>
    %288 = vector.shape_cast %287 : vector<1x32x64xf32> to vector<32x64xf32>
    %c3_129 = arith.constant 3 : index
    %c0_130 = arith.constant 0 : index
    %c0_131 = arith.constant 0 : index
    %289 = vector.load %arg4[%c3_129, %c0_130, %c0_131] : memref<4x32x64xf32, #tpu.memory_space<vmem>>, vector<1x32x64xf32>
    %290 = vector.shape_cast %289 : vector<1x32x64xf32> to vector<32x64xf32>
    %cst_132 = arith.constant dense<0.000000e+00> : vector<32x64xf32>
    %291 = tpu.matmul %286, %288, %cst_132 {dimension_numbers = #tpu.dot_dimension_numbers<[1], [0], [0], [1], [0, 0, 1, 1], [], []>} : vector<32x32xf32>, vector<32x64xf32>, vector<32x64xf32> -> vector<32x64xf32>
    %c18 = arith.constant 18 : index
    %c0_133 = arith.constant 0 : index
    %292 = vector.load %arg5[%c18, %c0_133] : memref<32x128xf32, #tpu.memory_space<vmem>>, vector<1x64xf32>
    %293 = vector.broadcast %292 : vector<1x64xf32> to vector<32x64xf32>
    %294 = arith.addf %291, %293 : vector<32x64xf32>
    %295 = arith.mulf %294, %294 : vector<32x64xf32>
    %296 = arith.mulf %294, %295 : vector<32x64xf32>
    %cst_134 = arith.constant 4.471500e-02 : f32
    %297 = vector.broadcast %cst_134 : f32 to vector<32x64xf32>
    %298 = arith.mulf %297, %296 : vector<32x64xf32>
    %299 = arith.addf %294, %298 : vector<32x64xf32>
    %cst_135 = arith.constant 0.797884583 : f32
    %300 = vector.broadcast %cst_135 : f32 to vector<32x64xf32>
    %301 = arith.mulf %300, %299 : vector<32x64xf32>
    %302 = math.tanh %301 : vector<32x64xf32>
    %cst_136 = arith.constant 1.000000e+00 : f32
    %303 = vector.broadcast %cst_136 : f32 to vector<32x64xf32>
    %304 = arith.addf %303, %302 : vector<32x64xf32>
    %cst_137 = arith.constant 5.000000e-01 : f32
    %305 = vector.broadcast %cst_137 : f32 to vector<32x64xf32>
    %306 = arith.mulf %305, %304 : vector<32x64xf32>
    %307 = arith.mulf %294, %306 : vector<32x64xf32>
    %cst_138 = arith.constant dense<0.000000e+00> : vector<32x32xf32>
    %308 = tpu.matmul %307, %290, %cst_138 {dimension_numbers = #tpu.dot_dimension_numbers<[1], [1], [0], [0], [0, 0, 1, 0], [], []>} : vector<32x64xf32>, vector<32x64xf32>, vector<32x32xf32> -> vector<32x32xf32>
    %c19 = arith.constant 19 : index
    %c0_139 = arith.constant 0 : index
    %309 = vector.load %arg5[%c19, %c0_139] : memref<32x128xf32, #tpu.memory_space<vmem>>, vector<1x32xf32>
    %310 = vector.broadcast %309 : vector<1x32xf32> to vector<32x32xf32>
    %311 = arith.addf %308, %310 : vector<32x32xf32>
    %312 = arith.addf %286, %311 : vector<32x32xf32>
    %c20 = arith.constant 20 : index
    %c0_140 = arith.constant 0 : index
    %313 = vector.load %arg5[%c20, %c0_140] : memref<32x128xf32, #tpu.memory_space<vmem>>, vector<1x32xf32>
    %c21 = arith.constant 21 : index
    %c0_141 = arith.constant 0 : index
    %314 = vector.load %arg5[%c21, %c0_141] : memref<32x128xf32, #tpu.memory_space<vmem>>, vector<1x32xf32>
    %cst_142 = arith.constant dense<0.000000e+00> : vector<32xf32>
    %315 = vector.multi_reduction <add>, %312, %cst_142 [1] : vector<32x32xf32> to vector<32xf32>
    %316 = vector.shape_cast %315 : vector<32xf32> to vector<32x1xf32>
    %cst_143 = arith.constant 3.200000e+01 : f32
    %317 = vector.broadcast %cst_143 : f32 to vector<32x1xf32>
    %318 = arith.divf %316, %317 : vector<32x1xf32>
    %319 = vector.broadcast %318 : vector<32x1xf32> to vector<32x32xf32>
    %320 = arith.subf %312, %319 : vector<32x32xf32>
    %321 = arith.mulf %320, %320 : vector<32x32xf32>
    %cst_144 = arith.constant dense<0.000000e+00> : vector<32xf32>
    %322 = vector.multi_reduction <add>, %321, %cst_144 [1] : vector<32x32xf32> to vector<32xf32>
    %323 = vector.shape_cast %322 : vector<32xf32> to vector<32x1xf32>
    %cst_145 = arith.constant 3.200000e+01 : f32
    %324 = vector.broadcast %cst_145 : f32 to vector<32x1xf32>
    %325 = arith.divf %323, %324 : vector<32x1xf32>
    %326 = vector.broadcast %318 : vector<32x1xf32> to vector<32x32xf32>
    %327 = arith.subf %312, %326 : vector<32x32xf32>
    %cst_146 = arith.constant 9.99999996E-13 : f32
    %328 = vector.broadcast %cst_146 : f32 to vector<32x1xf32>
    %329 = arith.addf %325, %328 : vector<32x1xf32>
    %330 = math.rsqrt %329 : vector<32x1xf32>
    %331 = vector.broadcast %330 : vector<32x1xf32> to vector<32x32xf32>
    %332 = arith.mulf %327, %331 : vector<32x32xf32>
    %333 = vector.broadcast %313 : vector<1x32xf32> to vector<32x32xf32>
    %334 = arith.mulf %332, %333 : vector<32x32xf32>
    %335 = vector.broadcast %314 : vector<1x32xf32> to vector<32x32xf32>
    %336 = arith.addf %334, %335 : vector<32x32xf32>
    %c8_147 = arith.constant 8 : index
    %c0_148 = arith.constant 0 : index
    %c0_149 = arith.constant 0 : index
    %337 = vector.load %arg3[%c8_147, %c0_148, %c0_149] : memref<9x32x32xf32, #tpu.memory_space<vmem>>, vector<1x32x32xf32>
    %338 = vector.shape_cast %337 : vector<1x32x32xf32> to vector<32x32xf32>
    %cst_150 = arith.constant dense<0.000000e+00> : vector<32x32xf32>
    %339 = tpu.matmul %336, %338, %cst_150 {dimension_numbers = #tpu.dot_dimension_numbers<[1], [0], [0], [1], [0, 0, 1, 1], [], []>} : vector<32x32xf32>, vector<32x32xf32>, vector<32x32xf32> -> vector<32x32xf32>
    %c22 = arith.constant 22 : index
    %c0_151 = arith.constant 0 : index
    %340 = vector.load %arg5[%c22, %c0_151] : memref<32x128xf32, #tpu.memory_space<vmem>>, vector<1x32xf32>
    %341 = vector.broadcast %340 : vector<1x32xf32> to vector<32x32xf32>
    %342 = arith.addf %339, %341 : vector<32x32xf32>
    %343 = arith.mulf %342, %342 : vector<32x32xf32>
    %344 = arith.mulf %342, %343 : vector<32x32xf32>
    %cst_152 = arith.constant 4.471500e-02 : f32
    %345 = vector.broadcast %cst_152 : f32 to vector<32x32xf32>
    %346 = arith.mulf %345, %344 : vector<32x32xf32>
    %347 = arith.addf %342, %346 : vector<32x32xf32>
    %cst_153 = arith.constant 0.797884583 : f32
    %348 = vector.broadcast %cst_153 : f32 to vector<32x32xf32>
    %349 = arith.mulf %348, %347 : vector<32x32xf32>
    %350 = math.tanh %349 : vector<32x32xf32>
    %cst_154 = arith.constant 1.000000e+00 : f32
    %351 = vector.broadcast %cst_154 : f32 to vector<32x32xf32>
    %352 = arith.addf %351, %350 : vector<32x32xf32>
    %cst_155 = arith.constant 5.000000e-01 : f32
    %353 = vector.broadcast %cst_155 : f32 to vector<32x32xf32>
    %354 = arith.mulf %353, %352 : vector<32x32xf32>
    %355 = arith.mulf %342, %354 : vector<32x32xf32>
    %c23 = arith.constant 23 : index
    %c0_156 = arith.constant 0 : index
    %356 = vector.load %arg5[%c23, %c0_156] : memref<32x128xf32, #tpu.memory_space<vmem>>, vector<1x32xf32>
    %c24 = arith.constant 24 : index
    %c0_157 = arith.constant 0 : index
    %357 = vector.load %arg5[%c24, %c0_157] : memref<32x128xf32, #tpu.memory_space<vmem>>, vector<1x32xf32>
    %cst_158 = arith.constant dense<0.000000e+00> : vector<32xf32>
    %358 = vector.multi_reduction <add>, %355, %cst_158 [1] : vector<32x32xf32> to vector<32xf32>
    %359 = vector.shape_cast %358 : vector<32xf32> to vector<32x1xf32>
    %cst_159 = arith.constant 3.200000e+01 : f32
    %360 = vector.broadcast %cst_159 : f32 to vector<32x1xf32>
    %361 = arith.divf %359, %360 : vector<32x1xf32>
    %362 = vector.broadcast %361 : vector<32x1xf32> to vector<32x32xf32>
    %363 = arith.subf %355, %362 : vector<32x32xf32>
    %364 = arith.mulf %363, %363 : vector<32x32xf32>
    %cst_160 = arith.constant dense<0.000000e+00> : vector<32xf32>
    %365 = vector.multi_reduction <add>, %364, %cst_160 [1] : vector<32x32xf32> to vector<32xf32>
    %366 = vector.shape_cast %365 : vector<32xf32> to vector<32x1xf32>
    %cst_161 = arith.constant 3.200000e+01 : f32
    %367 = vector.broadcast %cst_161 : f32 to vector<32x1xf32>
    %368 = arith.divf %366, %367 : vector<32x1xf32>
    %369 = vector.broadcast %361 : vector<32x1xf32> to vector<32x32xf32>
    %370 = arith.subf %355, %369 : vector<32x32xf32>
    %cst_162 = arith.constant 9.99999996E-13 : f32
    %371 = vector.broadcast %cst_162 : f32 to vector<32x1xf32>
    %372 = arith.addf %368, %371 : vector<32x1xf32>
    %373 = math.rsqrt %372 : vector<32x1xf32>
    %374 = vector.broadcast %373 : vector<32x1xf32> to vector<32x32xf32>
    %375 = arith.mulf %370, %374 : vector<32x32xf32>
    %376 = vector.broadcast %356 : vector<1x32xf32> to vector<32x32xf32>
    %377 = arith.mulf %375, %376 : vector<32x32xf32>
    %378 = vector.broadcast %357 : vector<1x32xf32> to vector<32x32xf32>
    %379 = arith.addf %377, %378 : vector<32x32xf32>
    %cst_163 = arith.constant dense<0.000000e+00> : vector<32x128xf32>
    %380 = tpu.matmul %379, %4, %cst_163 {dimension_numbers = #tpu.dot_dimension_numbers<[1], [1], [0], [0], [0, 0, 1, 0], [], []>} : vector<32x32xf32>, vector<128x32xf32>, vector<32x128xf32> -> vector<32x128xf32>
    %c25 = arith.constant 25 : index
    %c0_164 = arith.constant 0 : index
    %381 = vector.load %arg5[%c25, %c0_164] : memref<32x128xf32, #tpu.memory_space<vmem>>, vector<1x128xf32>
    %382 = vector.broadcast %381 : vector<1x128xf32> to vector<32x128xf32>
    %383 = arith.addf %380, %382 : vector<32x128xf32>
    %cst_165 = arith.constant dense<0xFF800000> : vector<32xf32>
    %384 = vector.multi_reduction <maximumf>, %383, %cst_165 [1] : vector<32x128xf32> to vector<32xf32>
    %385 = vector.shape_cast %384 : vector<32xf32> to vector<32x1xf32>
    %386 = vector.broadcast %385 : vector<32x1xf32> to vector<32x128xf32>
    %387 = arith.subf %383, %386 : vector<32x128xf32>
    %388 = math.exp %387 : vector<32x128xf32>
    %cst_166 = arith.constant dense<0.000000e+00> : vector<32xf32>
    %389 = vector.multi_reduction <add>, %388, %cst_166 [1] : vector<32x128xf32> to vector<32xf32>
    %390 = vector.shape_cast %389 : vector<32xf32> to vector<32x1xf32>
    %391 = math.log %390 : vector<32x1xf32>
    %392 = arith.addf %385, %391 : vector<32x1xf32>
    %393 = vector.broadcast %3 : vector<32x1xi32> to vector<32x128xi32>
    %394 = arith.cmpi eq, %6, %393 : vector<32x128xi32>
    %395 = arith.extui %394 : vector<32x128xi1> to vector<32x128xi32>
    %396 = arith.sitofp %395 : vector<32x128xi32> to vector<32x128xf32>
    %397 = arith.mulf %383, %396 : vector<32x128xf32>
    %cst_167 = arith.constant dense<0.000000e+00> : vector<32xf32>
    %398 = vector.multi_reduction <add>, %397, %cst_167 [1] : vector<32x128xf32> to vector<32xf32>
    %399 = vector.shape_cast %398 : vector<32xf32> to vector<32x1xf32>
    %c-100_i32 = arith.constant -100 : i32
    %400 = vector.broadcast %c-100_i32 : i32 to vector<32x1xi32>
    %401 = arith.cmpi ne, %3, %400 : vector<32x1xi32>
    %402 = arith.extui %401 : vector<32x1xi1> to vector<32x1xi32>
    %403 = arith.sitofp %402 : vector<32x1xi32> to vector<32x1xf32>
    %404 = arith.mulf %392, %403 : vector<32x1xf32>
    %405 = arith.subf %404, %399 : vector<32x1xf32>
    %406 = vector.shape_cast %405 : vector<32x1xf32> to vector<1x32x1xf32>
    %cst_168 = arith.constant dense<0.000000e+00> : vector<1xf32>
    %407 = vector.multi_reduction <add>, %406, %cst_168 [1, 2] : vector<1x32x1xf32> to vector<1xf32>
    %408 = vector.shape_cast %407 : vector<1xf32> to vector<1x1x1xf32>
    %409 = vector.extract %408[0, 0, 0] : f32 from vector<1x1x1xf32>
    %c0_169 = arith.constant 0 : index
    %410 = memref.load %arg6[%c0_169] : memref<2xf32, #tpu.memory_space<smem>>
    memref.store %409, %arg6[%c0_169] : memref<2xf32, #tpu.memory_space<smem>>
    %411 = vector.shape_cast %403 : vector<32x1xf32> to vector<1x32x1xf32>
    %cst_170 = arith.constant dense<0.000000e+00> : vector<1xf32>
    %412 = vector.multi_reduction <add>, %411, %cst_170 [1, 2] : vector<1x32x1xf32> to vector<1xf32>
    %413 = vector.shape_cast %412 : vector<1xf32> to vector<1x1x1xf32>
    %414 = vector.extract %413[0, 0, 0] : f32 from vector<1x1x1xf32>
    %c1_171 = arith.constant 1 : index
    %415 = memref.load %arg6[%c1_171] : memref<2xf32, #tpu.memory_space<smem>>
    memref.store %414, %arg6[%c1_171] : memref<2xf32, #tpu.memory_space<smem>>
    return
  }
}

</mosaic_0001>

<bundles_post_ra>
// kernel: mlm_bert_forward.1
= control target key start
LH: loop header
LB: loop body
LE: loop exit
PB: predicated region body
PF: predicated region fallthrough
CT: control target
= control target key end

     0   :  { %v4951_v2 = vmov 0   ;;  %s5879_s0 = inlined_call_operand.vmem [shape: s32[2,32,1], index: 0, kind: input, shape index: {}]   ;;  %s5880_s1 = inlined_call_operand.vmem [shape: f32[64,16], index: 1, kind: input, shape index: {}]   ;;  %s5881_s2 = inlined_call_operand.vmem [shape: f32[160,32], index: 2, kind: input, shape index: {}]   ;;  %s5882_s3 = inlined_call_operand.vmem [shape: f32[9,32,32], index: 3, kind: input, shape index: {}]   ;;  %s5883_s4 = inlined_call_operand.vmem [shape: f32[4,32,64], index: 4, kind: input, shape index: {}]   ;;  %s5884_s5 = inlined_call_operand.vmem [shape: f32[32,128], index: 5, kind: input, shape index: {}]   ;;  %s5885_s6 = inlined_call_operand.vmem [shape: f32[2], index: 6, kind: output, shape index: {}]  }
   0x1   :  { %v26_v0 = vld [vmem:[%s5879_s0 + $0x10] sm:$0xff]  ;;  %v24_v1 = vld [vmem:[%s5879_s0] sm:$0xff]  ;;  %4760 = vset.pattern.permute.xlu1 %v4951_v2  ;;  %4759 = vset.pattern.permute.xlu0 %v4951_v2  ;;  %v48_v3 = vld [vmem:[%s5881_s2 + $0x78] sm:$0xff] }
   0x2   :  { %62 = vperm.xlu1 %4760, %v26_v0   ;;  %56 = vperm.xlu0 %4759, %v24_v1   ;;  %v47_v4 = vld [vmem:[%s5881_s2 + $0x70] sm:$0xff]  ;;  %v27_v5 = vld [vmem:[%s5879_s0 + $0x18] sm:$0xff]  ;;  %v25_v6 = vld [vmem:[%s5879_s0 + $0x8] sm:$0xff] }
   0x3   :  { %4381 = vmatprep.subr.mxu0 %v48_v3  ;;  %v46_v7 = vld [vmem:[%s5881_s2 + $0x68] sm:$0xff] }
   0x4   :  { %4382 = vmatpush3.msra.mxu0 %v48_v3 }
   0x5   :  { %4383 = vmatprep.subr.mxu0 %v47_v4 }
   0x6   :  { %65 = vperm.xlu1 %4760, %v27_v5   ;;  %59 = vperm.xlu0 %4759, %v25_v6  }
   0x7   :  { %11 = vsyncpa [#allocation4], 0  ;;  %4384 = vmatpush3.msra.mxu0 %v47_v4  ;;  %v45_v8 = vld [vmem:[%s5881_s2 + $0x60] sm:$0xff]  ;;  %v44_v9 = vld [vmem:[%s5881_s2 + $0x58] sm:$0xff]  ;;  %v53_v21 = vlaneseq  ;;  %v4952_v25 = vmov 1.0   ;;  %vm166_vm4 = vcmask 261120  }
   0x8   :  { %4385 = vmatprep.subr.mxu0 %v46_v7  ;;  %v43_v10 = vld [vmem:[%s5881_s2 + $0x50] sm:$0xff]  ;;  %v42_v11 = vld [vmem:[%s5881_s2 + $0x48] sm:$0xff]  ;;  %v41_v12 = vld [vmem:[%s5881_s2 + $0x40] sm:$0xff]  ;;  %vm907_vm9 = vcmask 130048   ;;  %vm1664_vm10 = vcmask 523264   ;;  %s3944_s23 = sshll.u32 %s5885_s6, 4  ;;  %s3945_s23 = int_to_ptr.vmem [resolvable:$true] %s3944_s23 }
   0x9   :  { %4386 = vmatpush3.msra.mxu0 %v46_v7  ;;  %v40_v13 = vld [vmem:[%s5881_s2 + $0x38] sm:$0xff]  ;;  %v39_v14 = vld [vmem:[%s5881_s2 + $0x30] sm:$0xff]  ;;  %v38_v15 = vld [vmem:[%s5881_s2 + $0x28] sm:$0xff]  ;;  %v5050_v22 = vand.u32 127, %v53_v21  ;;  %s4937_s26 = scalar_lea.vmem %s3945_s23, 16  ;;  %p4942_p1 = scmp.lt.s32.totalorder %s3945_s23, %s3945_s23 }
   0xa   :  { %4387 = vmatprep.subr.mxu0 %v45_v8  ;;  %v37_v16 = vld [vmem:[%s5881_s2 + $0x20] sm:$0xff]  ;;  %v36_v17 = vld [vmem:[%s5881_s2 + $0x18] sm:$0xff]  ;;  %v35_v18 = vld [vmem:[%s5881_s2 + $0x10] sm:$0xff]  ;;  %p4938_p0 = scmp.ne.s32.totalorder %s3945_s23, %s4937_s26  ;;  %p4943_p2 = scmp.lt.s32.totalorder %s4937_s26, %s4937_s26 }
   0xb   :  { %4388 = vmatpush3.msra.mxu0 %v45_v8  ;;  %v34_v19 = vld [vmem:[%s5881_s2 + $0x8] sm:$0xff]  ;;  %v33_v20 = vld [vmem:[%s5881_s2] sm:$0xff]  ;;  %v51_v36 = vld [vmem:[%s5881_s2 + $0x90] sm:$0xff]  ;;  %vm241_vm5 = vcmp.ge.s32.totalorder %v5050_v22, 16  ;;  %vm242_vm6 = vcmp.lt.s32.totalorder %v5050_v22, 32  ;;  %vm237_vm7 = vcmp.lt.s32.totalorder %v5050_v22, 16 }
   0xc   :  { %4389 = vmatprep.subr.mxu0 %v44_v9  ;;  %v50_v28 = vld [vmem:[%s5881_s2 + $0x88] sm:$0xff]  ;;  %v49_v30 = vld [vmem:[%s5881_s2 + $0x80] sm:$0xff]  ;;  %v52_v38 = vld [vmem:[%s5881_s2 + $0x98] sm:$0xff]  ;;  %p4944_p3 = por %p4943_p2, %p4942_p1 }
   0xd   :  { %4390 = vmatpush3.msra.mxu0 %v44_v9  ;;  %v257_v0 = vld [vmem:[%s5882_s3 + $0x18] sm:$0xff]  ;;  %v256_v1 = vld [vmem:[%s5882_s3 + $0x10] sm:$0xff]  ;;  %v255_v2 = vld [vmem:[%s5882_s3 + $0x8] sm:$0xff] }
   0xe   :  { %4391 = vmatprep.subr.mxu0 %v43_v10  ;;  %v254_v3 = vld [vmem:[%s5882_s3] sm:$0xff]  ;;  %v3972_v4 = vld [vmem:[%s5882_s3 + $0x38] sm:$0xff]  ;;  %vm243_vm8 = vmand %vm241_vm5, %vm242_vm6  ;;  %p4945_p4 = pnand %p4944_p3, %p4938_p0 }
   0xf   :  { %4392 = vmatpush3.msra.mxu0 %v43_v10 }
  0x10   :  { %4393 = vmatprep.subr.mxu0 %v42_v11 }
  0x11   :  { %4394 = vmatpush3.msra.mxu0 %v42_v11 }
  0x12   :  { %4395 = vmatprep.subr.mxu0 %v41_v12 }
  0x13   :  { %4396 = vmatpush3.msra.mxu0 %v41_v12 }
  0x14   :  { %4397 = vmatprep.subr.mxu0 %v40_v13 }
  0x15   :  { %4398 = vmatpush3.msra.mxu0 %v40_v13 }
  0x16   :  { %4399 = vmatprep.subr.mxu0 %v39_v14 }
  0x17   :  { %4400 = vmatpush3.msra.mxu0 %v39_v14 }
  0x18   :  { %4401 = vmatprep.subr.mxu0 %v38_v15 }
  0x19   :  { %4402 = vmatpush3.msra.mxu0 %v38_v15 }
  0x1a   :  { %4403 = vmatprep.subr.mxu0 %v37_v16 }
  0x1b   :  { %4404 = vmatpush3.msra.mxu0 %v37_v16 }
  0x1c   :  { %4405 = vmatprep.subr.mxu0 %v36_v17 }
  0x1d   :  { %4406 = vmatpush3.msra.mxu0 %v36_v17 }
  0x1e   :  { %4407 = vmatprep.subr.mxu0 %v35_v18 }
  0x1f   :  { %4408 = vmatpush3.msra.mxu0 %v35_v18 }
  0x20   :  { %4409 = vmatprep.subr.mxu0 %v34_v19 }
  0x21   :  { %4410 = vmatpush3.msra.mxu0 %v34_v19  ;;  %v3965_v19 = vld [vmem:[%s5884_s5] ss:$0 sm:$0xff] }
  0x22   :  { %4411 = vmatprep.subr.mxu0 %v33_v20 }
  0x23   :  { %4412 = vmatpush3.msra.mxu0 %v33_v20 }
  0x24   :  { %4419 = vmatprep.subr.mxu0 %v257_v0 }
  0x7d   :  { %v63_v23 = vpop.permute.xlu1 %62  ;;  %v57_v24 = vpop.permute.xlu0 %56 }
  0x7e   :  { %vm67_vm0 = vcmp.eq.s32.totalorder %v5050_v22, %v57_v24  ;;  %vm69_vm1 = vcmp.eq.s32.totalorder %v5050_v22, %v63_v23  ;;  %v3966_v24 = vld [vmem:[%s5884_s5 + $0x1] ss:$0 sm:$0xff] }
  0x7f   :  { %4413 = vmatprep.mubr.msk.f32.mxu0 %vm67_vm0, %v4952_v25 }
  0x81   :  { %v60_v26 = vpop.permute.xlu0 %59  ;;  %v66_v27 = vpop.permute.xlu1 %65 }
  0x82   :  { %vm68_vm2 = vcmp.eq.s32.totalorder %v5050_v22, %v60_v26  ;;  %vm70_vm3 = vcmp.eq.s32.totalorder %v5050_v22, %v66_v27 }
  0x83   :  { %4414 = vmatmul.mubr.msk.f32.vlgmr.msra.gmra.mxu0 %vm68_vm2, %v4952_v25  ;;  %vm3901_vm2 = vcmask 7168  }
  0x84   :  { %4416 = vmatprep.mubr.msk.f32.mxu0 %vm69_vm1, %v4952_v25  ;;  %4420 = vmatpush3.msra.mxu0 %v257_v0 }
  0x85   :  { %4421 = vmatprep.subr.mxu0 %v256_v1 }
  0x86   :  { %4422 = vmatpush3.msra.mxu0 %v256_v1  ;;  %v5178_v1 = vld [vmem:[%s5884_s5 + $0x4] ss:$0 sm:$0xff] }
  0x87   :  { %4417 = vmatmul.mubr.msk.f32.gmra.mxu0 %vm70_vm3, %v4952_v25  ;;  %4423 = vmatprep.subr.mxu0 %v255_v2 }
  0x88   :  { %4424 = vmatpush3.msra.mxu0 %v255_v2 }
  0x89   :  { %4425 = vmatprep.subr.mxu0 %v254_v3 }
  0x8a   :  { %4426 = vmatpush3.msra.mxu0 %v254_v3 }
  0x8b   :  { %4433 = vmatprep.subr.mxu0 %v3972_v4 }
 0x143   :  { %v4415_v29 = vpop.f32.mrf.mxu0 }
 0x144   :  { %v151_v31 = vadd.f32 %v4415_v29, %v50_v28 }
 0x145   :  { %v145_v32 = vpop.f32.mrf.mxu0 }
 0x146   :  { %v146_v33 = vadd.f32 %v145_v32, %v49_v30  ;;  %v170_v34 = vsel %vm166_vm4, %v151_v31, 0.0 }
 0x147   :  { %171 = vadd.xlane.f32.xlu1 %v170_v34  ;;  %v4418_v35 = vpop.f32.mrf.mxu0 }
 0x148   :  { %v167_v37 = vsel %vm166_vm4, %v146_v33, 0.0  ;;  %v161_v41 = vadd.f32 %v4418_v35, %v52_v38  ;;  %v3970_v35 = vld [vmem:[%s5882_s3 + $0x28] sm:$0xff] }
 0x149   :  { %v155_v39 = vpop.f32.mrf.mxu0  ;;  %168 = vadd.xlane.f32.xlu0 %v167_v37  ;;  %v3969_v37 = vld [vmem:[%s5882_s3 + $0x20] sm:$0xff] }
 0x14a   :  { %v156_v40 = vadd.f32 %v155_v39, %v51_v36  ;;  %v176_v43 = vsel %vm166_vm4, %v161_v41, 0.0  ;;  %v3976_v39 = vld [vmem:[%s5882_s3 + $0x58] sm:$0xff] }
 0x14c   :  { %v173_v42 = vsel %vm166_vm4, %v156_v40, 0.0 }
 0x14d   :  { %174 = vadd.xlane.f32.xlu0 %v173_v42  ;;  %v3973_v42 = vld [vmem:[%s5882_s3 + $0x40] sm:$0xff] }
 0x151   :  { %177 = vadd.xlane.f32.xlu0 %v176_v43 }
 0x1d0   :  { %v172_v44 = vpop.xlane.xlu1 %171 }
 0x1d1   :  { %v181_v45 = vmul.f32 0.03125, %v172_v44  ;;  %v3981_v44 = vld [vmem:[%s5884_s5 + $0x2] ss:$0 sm:$0xff] }
 0x1d2   :  { %v169_v46 = vpop.xlane.xlu0 %168 }
 0x1d3   :  { %v185_v47 = vsub.f32 %v151_v31, %v181_v45  ;;  %v180_v48 = vmul.f32 0.03125, %v169_v46  ;;  %v3971_v31 = vld [vmem:[%s5882_s3 + $0x30] sm:$0xff] }
 0x1d5   :  { %v184_v49 = vsub.f32 %v146_v33, %v180_v48  ;;  %v189_v50 = vmul.f32 %v185_v47, %v185_v47 }
 0x1d6   :  { %v175_v51 = vpop.xlane.xlu0 %174 }
 0x1d7   :  { %v182_v52 = vmul.f32 0.03125, %v175_v51  ;;  %v195_v53 = vsel %vm166_vm4, %v189_v50, 0.0  ;;  %v188_v54 = vmul.f32 %v184_v49, %v184_v49 }
 0x1d8   :  { %196 = vadd.xlane.f32.xlu0 %v195_v53 }
 0x1d9   :  { %v186_v55 = vsub.f32 %v156_v40, %v182_v52  ;;  %v192_v56 = vsel %vm166_vm4, %v188_v54, 0.0  ;;  %v3975_v40 = vld [vmem:[%s5882_s3 + $0x50] sm:$0xff]  ;;  %v3986_v54 = vld [vmem:[%s5884_s5 + $0x3] ss:$0 sm:$0xff] }
 0x1da   :  { %193 = vadd.xlane.f32.xlu1 %v192_v56  ;;  %v178_v57 = vpop.xlane.xlu0 %177 }
 0x1db   :  { %v183_v58 = vmul.f32 0.03125, %v178_v57  ;;  %v190_v59 = vmul.f32 %v186_v55, %v186_v55 }
 0x1dd   :  { %v187_v60 = vsub.f32 %v161_v41, %v183_v58  ;;  %v198_v61 = vsel %vm166_vm4, %v190_v59, 0.0  ;;  %v3974_v41 = vld [vmem:[%s5882_s3 + $0x48] sm:$0xff] }
 0x1de   :  { %199 = vadd.xlane.f32.xlu1 %v198_v61 }
 0x1df   :  { %v191_v62 = vmul.f32 %v187_v60, %v187_v60 }
 0x1e1   :  { %v201_v63 = vsel %vm166_vm4, %v191_v62, 0.0 }
 0x1e2   :  { %202 = vadd.xlane.f32.xlu0 %v201_v63 }
 0x261   :  { %v197_v5 = vpop.xlane.xlu0 %196 }
 0x262   :  { %v205_v6 = vmul.f32 0.03125, %v197_v5 }
 0x263   :  { %v194_v7 = vpop.xlane.xlu1 %193 }
 0x264   :  { %v209_v8 = vadd.f32 1e-12, %v205_v6  ;;  %v204_v9 = vmul.f32 0.03125, %v194_v7 }
 0x266   :  { %4761 = vrsqrt.f32 %v209_v8  ;;  %v208_v10 = vadd.f32 1e-12, %v204_v9 }
 0x267   :  { %v200_v11 = vpop.xlane.xlu1 %199 }
 0x268   :  { %4763 = vrsqrt.f32 %v208_v10  ;;  %v206_v12 = vmul.f32 0.03125, %v200_v11 }
 0x26a   :  { %v210_v13 = vadd.f32 1e-12, %v206_v12 }
 0x26b   :  { %v203_v14 = vpop.xlane.xlu0 %202 }
 0x26c   :  { %4765 = vrsqrt.f32 %v210_v13  ;;  %v207_v15 = vmul.f32 0.03125, %v203_v14 }
 0x26e   :  { %v211_v16 = vadd.f32 1e-12, %v207_v15 }
 0x270   :  { %4767 = vrsqrt.f32 %v211_v16 }
 0x273   :  { %v4762_v17 = vpop.eup %4761 }
 0x274   :  { %v217_v18 = vmul.f32 %v4762_v17, %v185_v47  ;;  %v4953_v47 = vmov 0.0  }
 0x275   :  { %v4764_v20 = vpop.eup %4763  ;;  %v5157_v48 = vsel %vm237_vm7, 1.0, %v4953_v47 }
 0x276   :  { %v216_v21 = vmul.f32 %v4764_v20, %v184_v49  ;;  %v225_v23 = vmul.f32 %v3965_v19, %v217_v18  ;;  %v5160_v49 = vsel %vm243_vm8, 1.0, %v4953_v47 }
 0x278   :  { %v224_v25 = vmul.f32 %v3965_v19, %v216_v21  ;;  %v5099_v29 = vadd.f32 %v3966_v24, %v225_v23  ;;  %v247_v23 = vld [vmem:[%s5880_s1 + $0x8] sm:$0xff] }
 0x279   :  { %v4766_v26 = vpop.eup %4765 }
 0x27a   :  { %v5097_v27 = vadd.f32 %v3966_v24, %v224_v25  ;;  %v218_v28 = vmul.f32 %v4766_v26, %v186_v55 }
 0x27c   :  { %4427 = vmatprep.mubr.msk.f32.mxu0 %vm166_vm4, %v5097_v27  ;;  %v226_v30 = vmul.f32 %v3965_v19, %v218_v28  ;;  %v246_v28 = vld [vmem:[%s5880_s1] sm:$0xff] }
 0x27d   :  { %v4768_v32 = vpop.eup %4767  ;;  %4428 = vmatmul.mubr.msk.f32.vlgmr.msra.gmra.mxu0 %vm166_vm4, %v5099_v29 }
 0x27e   :  { %v5108_v33 = vadd.f32 %v3966_v24, %v226_v30  ;;  %4434 = vmatpush3.msra.mxu0 %v3972_v4  ;;  %v219_v34 = vmul.f32 %v4768_v32, %v187_v60  ;;  %v248_v30 = vld [vmem:[%s5880_s1 + $0x10] sm:$0xff] }
 0x27f   :  { %4435 = vmatprep.subr.mxu0 %v3971_v31 }
 0x280   :  { %4430 = vmatprep.mubr.msk.f32.mxu0 %vm166_vm4, %v5108_v33  ;;  %4436 = vmatpush3.msra.mxu0 %v3971_v31  ;;  %v227_v36 = vmul.f32 %v3965_v19, %v219_v34 }
 0x281   :  { %4437 = vmatprep.subr.mxu0 %v3970_v35 }
 0x282   :  { %v5118_v38 = vadd.f32 %v3966_v24, %v227_v36  ;;  %4438 = vmatpush3.msra.mxu0 %v3970_v35  ;;  %v249_v24 = vld [vmem:[%s5880_s1 + $0x18] sm:$0xff] }
 0x283   :  { %4439 = vmatprep.subr.mxu0 %v3969_v37 }
 0x284   :  { %4431 = vmatmul.mubr.msk.f32.gmra.mxu0 %vm166_vm4, %v5118_v38 }
 0x285   :  { %4441 = vmatprep.mubr.msk.f32.mxu0 %vm166_vm4, %v5097_v27  ;;  %4440 = vmatpush3.msra.mxu0 %v3969_v37 }
 0x286   :  { %4447 = vmatprep.subr.mxu0 %v3976_v39 }
 0x288   :  { %4442 = vmatmul.mubr.msk.f32.vlgmr.msra.gmra.mxu0 %vm166_vm4, %v5099_v29 }
 0x289   :  { %4444 = vmatprep.mubr.msk.f32.mxu0 %vm166_vm4, %v5108_v33  ;;  %4448 = vmatpush3.msra.mxu0 %v3976_v39 }
 0x28a   :  { %4449 = vmatprep.subr.mxu0 %v3975_v40 }
 0x28b   :  { %4450 = vmatpush3.msra.mxu0 %v3975_v40 }
 0x28c   :  { %4445 = vmatmul.mubr.msk.f32.gmra.mxu0 %vm166_vm4, %v5118_v38  ;;  %4451 = vmatprep.subr.mxu0 %v3974_v41 }
 0x28d   :  { %4452 = vmatpush3.msra.mxu0 %v3974_v41  ;;  %4455 = vmatprep.mubr.msk.f32.mxu0 %vm166_vm4, %v5097_v27 }
 0x28e   :  { %4453 = vmatprep.subr.mxu0 %v3973_v42 }
 0x28f   :  { %4454 = vmatpush3.msra.mxu0 %v3973_v42 }
 0x290   :  { %4456 = vmatmul.mubr.msk.f32.vlgmr.msra.gmra.mxu0 %vm166_vm4, %v5099_v29 }
 0x291   :  { %4458 = vmatprep.mubr.msk.f32.mxu0 %vm166_vm4, %v5108_v33 }
 0x294   :  { %4459 = vmatmul.mubr.msk.f32.gmra.mxu0 %vm166_vm4, %v5118_v38 }
 0x33d   :  { %v4429_v43 = vpop.f32.mrf.mxu0 }
 0x33e   :  { %v362_v60 = vadd.f32 %v4429_v43, %v3981_v44 }
 0x33f   :  { %v356_v45 = vpop.f32.mrf.mxu0 }
 0x340   :  { %v357_v46 = vadd.f32 %v3981_v44, %v356_v45  ;;  %v556_v2 = vmul.f32 %v5157_v48, %v362_v60  ;;  %v645_v3 = vmul.f32 %v5160_v49, %v362_v60 }
 0x342   :  { %v644_v50 = vmul.f32 %v5160_v49, %v357_v46  ;;  %v555_v51 = vmul.f32 %v5157_v48, %v357_v46  ;;  %v252_v46 = vld [vmem:[%s5880_s1 + $0x30] sm:$0xff] }
 0x344   :  { %v4432_v52 = vpop.f32.mrf.mxu0  ;;  %4465 = vmatprep.mubr.msk.f32.mxu1 %vm166_vm4, %v555_v51  ;;  %4472 = vmatprep.mubr.msk.f32.mxu0 %vm166_vm4, %v644_v50  ;;  %v251_v50 = vld [vmem:[%s5880_s1 + $0x28] sm:$0xff] }
 0x345   :  { %v372_v9 = vadd.f32 %v4432_v52, %v3981_v44  ;;  %v253_v52 = vld [vmem:[%s5880_s1 + $0x38] sm:$0xff] }
 0x346   :  { %v366_v53 = vpop.f32.mrf.mxu0 }
 0x347   :  { %v367_v61 = vadd.f32 %v3981_v44, %v366_v53  ;;  %v728_v14 = vmul.f32 %v5157_v48, %v372_v9  ;;  %v817_v16 = vmul.f32 %v5160_v49, %v372_v9  ;;  %v250_v44 = vld [vmem:[%s5880_s1 + $0x20] sm:$0xff] }
 0x348   :  { %v4443_v55 = vpop.f32.mrf.mxu0 }
 0x349   :  { %v452_v56 = vadd.f32 %v4443_v55, %v3986_v54  ;;  %v727_v4 = vmul.f32 %v5157_v48, %v367_v61  ;;  %v816_v6 = vmul.f32 %v5160_v49, %v367_v61 }
 0x34a   :  { %v446_v57 = vpop.f32.mrf.mxu0 }
 0x34b   :  { %v447_v58 = vadd.f32 %v3986_v54, %v446_v57  ;;  %4461 = vmatprep.subr.msk.mxu1 %vm166_vm4, %v452_v56  ;;  %4468 = vmatprep.subr.msk.mxu0 %vm166_vm4, %v452_v56 }
 0x34c   :  { %v4446_v59 = vpop.f32.mrf.mxu0  ;;  %4462 = vmatpush3.xpose.msk.msra.mxu1 %vm166_vm4, %v452_v56  ;;  %4469 = vmatpush3.xpose.msk.msra.mxu0 %vm166_vm4, %v452_v56 }
 0x34d   :  { %4463 = vmatprep.subr.msk.mxu1 %vm166_vm4, %v447_v58  ;;  %4470 = vmatprep.subr.msk.mxu0 %vm166_vm4, %v447_v58  ;;  %v462_v63 = vadd.f32 %v4446_v59, %v3986_v54 }
 0x34e   :  { %v456_v62 = vpop.f32.mrf.mxu0 }
 0x34f   :  { %v457_v8 = vadd.f32 %v3986_v54, %v456_v62 }
 0x350   :  { %v4457_v0 = vpop.f32.mrf.mxu0  ;;  %4464 = vmatpush3.xpose.msk.msra.mxu1 %vm166_vm4, %v447_v58  ;;  %4471 = vmatpush3.xpose.msk.msra.mxu0 %vm166_vm4, %v447_v58 }
 0x351   :  { %4475 = vmatprep.subr.msk.mxu1 %vm166_vm4, %v462_v63  ;;  %4482 = vmatprep.subr.msk.mxu0 %vm166_vm4, %v462_v63  ;;  %v542_v7 = vadd.f32 %v4457_v0, %v5178_v1 }
 0x352   :  { %v536_v5 = vpop.f32.mrf.mxu0 }
 0x353   :  { %4466 = vmatmul.mubr.msk.f32.vlgmr.msra.gmra.mxu1 %vm166_vm4, %v556_v2  ;;  %4473 = vmatmul.mubr.msk.f32.vlgmr.msra.gmra.mxu0 %vm166_vm4, %v645_v3  ;;  %v997_v11 = vmul.f32 %v5157_v48, %v542_v7  ;;  %v537_v12 = vadd.f32 %v5178_v1, %v536_v5  ;;  %v999_v13 = vmul.f32 %v5160_v49, %v542_v7 }
 0x354   :  { %4476 = vmatpush3.xpose.msk.msra.mxu1 %vm166_vm4, %v462_v63  ;;  %4479 = vmatprep.mubr.msk.f32.mxu1 %vm166_vm4, %v727_v4  ;;  %v4460_v10 = vpop.f32.mrf.mxu0 }
 0x355   :  { %4483 = vmatpush3.xpose.msk.msra.mxu0 %vm166_vm4, %v462_v63  ;;  %4486 = vmatprep.mubr.msk.f32.mxu0 %vm166_vm4, %v816_v6  ;;  %v552_v15 = vadd.f32 %v4460_v10, %v5178_v1  ;;  %v996_v17 = vmul.f32 %v5157_v48, %v537_v12  ;;  %v998_v18 = vmul.f32 %v5160_v49, %v537_v12 }
 0x356   :  { %4477 = vmatprep.subr.msk.mxu1 %vm166_vm4, %v457_v8  ;;  %4484 = vmatprep.subr.msk.mxu0 %vm166_vm4, %v457_v8  ;;  %v5217_v21 = vpop.f32.mrf.mxu0 }
 0x357   :  { %v5210_v19 = vmul.f32 %v5157_v48, %v552_v15  ;;  %v5213_v20 = vmul.f32 %v5160_v49, %v552_v15 }
 0x358   :  { %4478 = vmatpush3.xpose.msk.msra.mxu1 %vm166_vm4, %v457_v8 }
 0x359   :  { %4485 = vmatpush3.xpose.msk.msra.mxu0 %vm166_vm4, %v457_v8  ;;  %4496 = vmatprep.subr.mxu1 %v997_v11 }
 0x35a   :  { %4489 = vmatprep.subr.mxu0 %v999_v13 }
 0x35b   :  { %4480 = vmatmul.mubr.msk.f32.vlgmr.msra.gmra.mxu1 %vm166_vm4, %v728_v14 }
 0x35c   :  { %4487 = vmatmul.mubr.msk.f32.vlgmr.msra.gmra.mxu0 %vm166_vm4, %v817_v16  ;;  %4497 = vmatpush3.msra.mxu1 %v997_v11 }
 0x35d   :  { %4490 = vmatpush3.msra.mxu0 %v999_v13  ;;  %4498 = vmatprep.subr.mxu1 %v996_v17 }
 0x35e   :  { %4491 = vmatprep.subr.mxu0 %v998_v18  ;;  %4499 = vmatpush3.msra.mxu1 %v996_v17 }
 0x35f   :  { %4492 = vmatpush3.msra.mxu0 %v998_v18  ;;  %4510 = vmatprep.subr.mxu1 %v5210_v19 }
 0x360   :  { %4503 = vmatprep.subr.mxu0 %v5213_v20 }
 0x413   :  { %v4467_v25 = vpop.f32.mrf.mxu1  ;;  %v4474_v26 = vpop.f32.mrf.mxu0 }
 0x414   :  { %v900_v31 = vadd.f32 %v4467_v25, %v247_v23  ;;  %v902_v32 = vadd.f32 %v4474_v26, %v249_v24 }
 0x415   :  { %v635_v34 = vpop.f32.mrf.mxu1  ;;  %v718_v35 = vpop.f32.mrf.mxu0 }
 0x416   :  { %v899_v36 = vadd.f32 %v635_v34, %v246_v28  ;;  %v901_v37 = vadd.f32 %v718_v35, %v248_v30  ;;  %v917_v39 = vsel %vm907_vm9, %v902_v32, -inf  ;;  %v911_v40 = vsel %vm907_vm9, %v900_v31, -inf }
 0x417   :  { %918 = vmax.xlane.f32.xlu0 %v917_v39  ;;  %912 = vmax.xlane.f32.xlu1 %v911_v40 }
 0x418   :  { %v914_v41 = vsel %vm907_vm9, %v901_v37, -inf  ;;  %v908_v42 = vsel %vm907_vm9, %v899_v36, -inf }
 0x41b   :  { %915 = vmax.xlane.f32.xlu0 %v914_v41  ;;  %909 = vmax.xlane.f32.xlu1 %v908_v42  ;;  %v4481_v43 = vpop.f32.mrf.mxu1 }
 0x41c   :  { %v4488_v45 = vpop.f32.mrf.mxu0  ;;  %v904_v56 = vadd.f32 %v4481_v43, %v251_v50 }
 0x41d   :  { %v807_v51 = vpop.f32.mrf.mxu1  ;;  %v906_v58 = vadd.f32 %v4488_v45, %v253_v52 }
 0x41e   :  { %v903_v53 = vadd.f32 %v807_v51, %v250_v44  ;;  %v890_v54 = vpop.f32.mrf.mxu0  ;;  %v923_v60 = vsel %vm907_vm9, %v904_v56, -inf }
 0x41f   :  { %v905_v55 = vadd.f32 %v890_v54, %v252_v46  ;;  %v929_v61 = vsel %vm907_vm9, %v906_v58, -inf }
 0x420   :  { %v920_v57 = vsel %vm907_vm9, %v903_v53, -inf }
 0x421   :  { %v926_v59 = vsel %vm907_vm9, %v905_v55, -inf  ;;  %921 = vmax.xlane.f32.xlu1 %v920_v57 }
 0x422   :  { %927 = vmax.xlane.f32.xlu0 %v926_v59 }
 0x425   :  { %924 = vmax.xlane.f32.xlu1 %v923_v60 }
 0x426   :  { %930 = vmax.xlane.f32.xlu0 %v929_v61  ;;  %v547_v61 = vadd.f32 %v5178_v1, %v5217_v21 }
 0x4a0   :  { %v919_v62 = vpop.xlane.xlu0 %918  ;;  %v913_v63 = vpop.xlane.xlu1 %912 }
 0x4a1   :  { %v935_v0 = vsub.f32 %v902_v32, %v919_v62  ;;  %v933_v2 = vsub.f32 %v900_v31, %v913_v63 }
 0x4a3   :  { %v946_v3 = vmul.f32 1.442695, %v935_v0  ;;  %v942_v4 = vmul.f32 1.442695, %v933_v2 }
 0x4a4   :  { %v916_v5 = vpop.xlane.xlu0 %915  ;;  %v910_v6 = vpop.xlane.xlu1 %909 }
 0x4a5   :  { %4769 = vpow2.f32 %v946_v3  ;;  %v934_v7 = vsub.f32 %v901_v37, %v916_v5  ;;  %v932_v8 = vsub.f32 %v899_v36, %v910_v6  ;;  %v1164_v5 = vmul.f32 %v5157_v48, %v547_v61 }
 0x4a6   :  { %4771 = vpow2.f32 %v942_v4  ;;  %v1166_v4 = vmul.f32 %v5160_v49, %v547_v61 }
 0x4a7   :  { %v944_v9 = vmul.f32 1.442695, %v934_v7  ;;  %v940_v10 = vmul.f32 1.442695, %v932_v8 }
 0x4a9   :  { %4773 = vpow2.f32 %v944_v9 }
 0x4aa   :  { %4775 = vpow2.f32 %v940_v10  ;;  %v922_v11 = vpop.xlane.xlu1 %921 }
 0x4ab   :  { %v928_v12 = vpop.xlane.xlu0 %927  ;;  %v936_v13 = vsub.f32 %v903_v53, %v922_v11 }
 0x4ac   :  { %v938_v14 = vsub.f32 %v905_v55, %v928_v12  ;;  %v3978_v12 = vld [vmem:[%s5882_s3 + $0x68] sm:$0xff] }
 0x4ad   :  { %v948_v15 = vmul.f32 1.442695, %v936_v13  ;;  %v3977_v13 = vld [vmem:[%s5882_s3 + $0x60] sm:$0xff] }
 0x4ae   :  { %v952_v16 = vmul.f32 1.442695, %v938_v14  ;;  %v925_v17 = vpop.xlane.xlu1 %924 }
 0x4af   :  { %4777 = vpow2.f32 %v948_v15  ;;  %v931_v18 = vpop.xlane.xlu0 %930  ;;  %v937_v23 = vsub.f32 %v904_v56, %v925_v17 }
 0x4b0   :  { %4779 = vpow2.f32 %v952_v16  ;;  %v939_v24 = vsub.f32 %v906_v58, %v931_v18 }
 0x4b1   :  { %v950_v25 = vmul.f32 1.442695, %v937_v23 }
 0x4b2   :  { %v4770_v26 = vpop.eup %4769  ;;  %v954_v28 = vmul.f32 1.442695, %v939_v24 }
 0x4b3   :  { %v4772_v30 = vpop.eup %4771  ;;  %4781 = vpow2.f32 %v950_v25  ;;  %v965_v31 = vsel %vm907_vm9, %v4770_v26, 0.0 }
 0x4b4   :  { %4783 = vpow2.f32 %v954_v28  ;;  %966 = vadd.xlane.f32.xlu0 %v965_v31  ;;  %v959_v32 = vsel %vm907_vm9, %v4772_v30, 0.0 }
 0x4b5   :  { %960 = vadd.xlane.f32.xlu1 %v959_v32 }
 0x4b6   :  { %v4774_v34 = vpop.eup %4773 }
 0x4b7   :  { %v4776_v35 = vpop.eup %4775  ;;  %v962_v36 = vsel %vm907_vm9, %v4774_v34, 0.0 }
 0x4b8   :  { %963 = vadd.xlane.f32.xlu0 %v962_v36  ;;  %v956_v37 = vsel %vm907_vm9, %v4776_v35, 0.0 }
 0x4b9   :  { %957 = vadd.xlane.f32.xlu1 %v956_v37  ;;  %v4020_v37 = vld [vmem:[%s5884_s5 + $0x5] ss:$0 sm:$0xff] }
 0x4bc   :  { %v4778_v39 = vpop.eup %4777 }
 0x4bd   :  { %v4780_v40 = vpop.eup %4779  ;;  %v968_v41 = vsel %vm907_vm9, %v4778_v39, 0.0 }
 0x4be   :  { %v974_v42 = vsel %vm907_vm9, %v4780_v40, 0.0  ;;  %969 = vadd.xlane.f32.xlu1 %v968_v41 }
 0x4bf   :  { %975 = vadd.xlane.f32.xlu0 %v974_v42 }
 0x4c0   :  { %v4782_v43 = vpop.eup %4781 }
 0x4c1   :  { %v4784_v44 = vpop.eup %4783  ;;  %v971_v45 = vsel %vm907_vm9, %v4782_v43, 0.0 }
 0x4c2   :  { %v977_v46 = vsel %vm907_vm9, %v4784_v44, 0.0  ;;  %972 = vadd.xlane.f32.xlu1 %v971_v45 }
 0x4c3   :  { %978 = vadd.xlane.f32.xlu0 %v977_v46 }
 0x53d   :  { %v967_v50 = vpop.xlane.xlu0 %966 }
 0x53e   :  { %v961_v51 = vpop.xlane.xlu1 %960  ;;  %4785 = vrcp.f32 %v967_v50 }
 0x53f   :  { %4787 = vrcp.f32 %v961_v51 }
 0x541   :  { %v964_v52 = vpop.xlane.xlu0 %963 }
 0x542   :  { %4789 = vrcp.f32 %v964_v52  ;;  %v958_v53 = vpop.xlane.xlu1 %957 }
 0x543   :  { %4791 = vrcp.f32 %v958_v53 }
 0x547   :  { %v970_v54 = vpop.xlane.xlu1 %969 }
 0x548   :  { %v976_v55 = vpop.xlane.xlu0 %975  ;;  %4793 = vrcp.f32 %v970_v54 }
 0x549   :  { %4795 = vrcp.f32 %v976_v55 }
 0x54b   :  { %v973_v56 = vpop.xlane.xlu1 %972  ;;  %v4786_v58 = vpop.eup %4785 }
 0x54c   :  { %v979_v57 = vpop.xlane.xlu0 %978  ;;  %4797 = vrcp.f32 %v973_v56  ;;  %v4788_v59 = vpop.eup %4787  ;;  %v991_v2 = vmul.f32 %v4786_v58, %v4770_v26 }
 0x54d   :  { %4799 = vrcp.f32 %v979_v57  ;;  %v989_v3 = vmul.f32 %v4788_v59, %v4772_v30 }
 0x54f   :  { %v4790_v60 = vpop.eup %4789 }
 0x550   :  { %v4792_v62 = vpop.eup %4791  ;;  %v990_v63 = vmul.f32 %v4790_v60, %v4774_v34 }
 0x551   :  { %v988_v0 = vmul.f32 %v4792_v62, %v4776_v35 }
 0x552   :  { %4493 = vmatprep.mubr.msk.f32.mxu0 %vm907_vm9, %v990_v63 }
 0x553   :  { %4500 = vmatprep.mubr.msk.f32.mxu1 %vm907_vm9, %v988_v0  ;;  %4494 = vmatmul.mubr.msk.f32.vlgmr.msra.gmra.mxu0 %vm907_vm9, %v991_v2 }
 0x554   :  { %4501 = vmatmul.mubr.msk.f32.vlgmr.msra.gmra.mxu1 %vm907_vm9, %v989_v3  ;;  %4504 = vmatpush3.msra.mxu0 %v5213_v20  ;;  %v3979_v20 = vld [vmem:[%s5882_s3 + $0x70] sm:$0xff] }
 0x555   :  { %v4794_v1 = vpop.eup %4793  ;;  %4511 = vmatpush3.msra.mxu1 %v5210_v19  ;;  %4505 = vmatprep.subr.mxu0 %v1166_v4  ;;  %v3980_v19 = vld [vmem:[%s5882_s3 + $0x78] sm:$0xff] }
 0x556   :  { %v4796_v21 = vpop.eup %4795  ;;  %4512 = vmatprep.subr.mxu1 %v1164_v5  ;;  %4506 = vmatpush3.msra.mxu0 %v1166_v4  ;;  %v992_v6 = vmul.f32 %v4794_v1, %v4778_v39 }
 0x557   :  { %4513 = vmatpush3.msra.mxu1 %v1164_v5  ;;  %v994_v7 = vmul.f32 %v4796_v21, %v4780_v40  ;;  %4517 = vmatprep.subr.mxu0 %v3980_v19 }
 0x558   :  { %4514 = vmatprep.mubr.msk.f32.mxu1 %vm907_vm9, %v992_v6 }
 0x559   :  { %v4798_v8 = vpop.eup %4797  ;;  %4507 = vmatprep.mubr.msk.f32.mxu0 %vm907_vm9, %v994_v7 }
 0x55a   :  { %v4800_v9 = vpop.eup %4799  ;;  %v993_v10 = vmul.f32 %v4798_v8, %v4782_v43 }
 0x55b   :  { %v995_v11 = vmul.f32 %v4800_v9, %v4784_v44  ;;  %v1515_v9 = vld [vmem:[%s5883_s4 + $0x18] sm:$0xff] }
 0x55c   :  { %4515 = vmatmul.mubr.msk.f32.vlgmr.msra.gmra.mxu1 %vm907_vm9, %v993_v10  ;;  %v1514_v10 = vld [vmem:[%s5883_s4 + $0x10] sm:$0xff]  ;;  %4531 = vmatprep.subr.mxu1 %v1515_v9 }
 0x55d   :  { %4508 = vmatmul.mubr.msk.f32.vlgmr.msra.gmra.mxu0 %vm907_vm9, %v995_v11  ;;  %4532 = vmatpush3.msra.mxu1 %v1515_v9  ;;  %v1513_v11 = vld [vmem:[%s5883_s4 + $0x8] sm:$0xff] }
 0x55e   :  { %4518 = vmatpush3.msra.mxu0 %v3980_v19  ;;  %4533 = vmatprep.subr.mxu1 %v1514_v10  ;;  %v1512_v19 = vld [vmem:[%s5883_s4] sm:$0xff] }
 0x55f   :  { %4519 = vmatprep.subr.mxu0 %v3979_v20  ;;  %4534 = vmatpush3.msra.mxu1 %v1514_v10 }
 0x560   :  { %4520 = vmatpush3.msra.mxu0 %v3979_v20  ;;  %4535 = vmatprep.subr.mxu1 %v1513_v11 }
 0x561   :  { %4521 = vmatprep.subr.mxu0 %v3978_v12  ;;  %4536 = vmatpush3.msra.mxu1 %v1513_v11 }
 0x562   :  { %4522 = vmatpush3.msra.mxu0 %v3978_v12  ;;  %4537 = vmatprep.subr.mxu1 %v1512_v19 }
 0x563   :  { %4523 = vmatprep.subr.mxu0 %v3977_v13  ;;  %4538 = vmatpush3.msra.mxu1 %v1512_v19 }
 0x564   :  { %4524 = vmatpush3.msra.mxu0 %v3977_v13 }
 0x613   :  { %v4495_v14 = vpop.f32.mrf.mxu0 }
 0x614   :  { %v4502_v15 = vpop.f32.mrf.mxu1 }
 0x615   :  { %v1159_v16 = vadd.f32 %v4502_v15, %v4495_v14  ;;  %v1072_v17 = vpop.f32.mrf.mxu0 }
 0x616   :  { %v1153_v18 = vpop.f32.mrf.mxu1 }
 0x617   :  { %1163 = vst.msk [vmem:[#allocation2 + $0x8] sm:$0xff] %vm166_vm4, %v1159_v16  ;;  %v1154_v23 = vadd.f32 %v1153_v18, %v1072_v17 }
 0x619   :  { %1162 = vst.msk [vmem:[#allocation2] sm:$0xff] %vm166_vm4, %v1154_v23 }
 0x61c   :  { %v4516_v24 = vpop.f32.mrf.mxu1 }
 0x61d   :  { %v4509_v25 = vpop.f32.mrf.mxu0 }
 0x61e   :  { %v1327_v26 = vadd.f32 %v4516_v24, %v4509_v25  ;;  %v1321_v28 = vpop.f32.mrf.mxu1  ;;  %v1333_v34 = vld [vmem:[#allocation2 + $0x8] sm:$0xff] }
 0x61f   :  { %v1240_v30 = vpop.f32.mrf.mxu0 }
 0x620   :  { %1331 = vst.msk [vmem:[#allocation2 + $0x18] sm:$0xff] %vm166_vm4, %v1327_v26  ;;  %v1322_v31 = vadd.f32 %v1321_v28, %v1240_v30  ;;  %v1332_v32 = vld [vmem:[#allocation2] sm:$0xff] }
 0x621   :  { %4525 = vmatprep.mubr.msk.f32.mxu0 %vm166_vm4, %v1332_v32 }
 0x622   :  { %1330 = vst.msk [vmem:[#allocation2 + $0x10] sm:$0xff] %vm166_vm4, %v1322_v31  ;;  %4526 = vmatmul.mubr.msk.f32.vlgmr.msra.gmra.mxu0 %vm166_vm4, %v1333_v34  ;;  %v4025_v31 = vld [vmem:[%s5884_s5 + $0x6] ss:$0 sm:$0xff] }
 0x627   :  { %v1335_v36 = vld [vmem:[#allocation2 + $0x18] sm:$0xff] }
 0x629   :  { %v1334_v35 = vld [vmem:[#allocation2 + $0x10] sm:$0xff] }
 0x62a   :  { %4528 = vmatprep.mubr.msk.f32.mxu0 %vm166_vm4, %v1334_v35 }
 0x62b   :  { %4529 = vmatmul.mubr.msk.f32.gmra.mxu0 %vm166_vm4, %v1335_v36  ;;  %v4026_v36 = vld [vmem:[%s5884_s5 + $0x7] ss:$0 sm:$0xff] }
 0x6e2   :  { %v4527_v39 = vpop.f32.mrf.mxu0 }
 0x6e3   :  { %v1425_v40 = vadd.f32 %v4527_v39, %v4020_v37 }
 0x6e4   :  { %v1419_v41 = vpop.f32.mrf.mxu0 }
 0x6e5   :  { %v1420_v42 = vadd.f32 %v4020_v37, %v1419_v41  ;;  %v1439_v43 = vadd.f32 %v1425_v40, %v5099_v29 }
 0x6e7   :  { %v1447_v44 = vsel %vm166_vm4, %v1439_v43, 0.0  ;;  %v1438_v45 = vadd.f32 %v1420_v42, %v5097_v27 }
 0x6e8   :  { %1448 = vadd.xlane.f32.xlu0 %v1447_v44 }
 0x6e9   :  { %v1444_v46 = vsel %vm166_vm4, %v1438_v45, 0.0 }
 0x6ea   :  { %1445 = vadd.xlane.f32.xlu1 %v1444_v46 }
 0x6eb   :  { %v4530_v50 = vpop.f32.mrf.mxu0 }
 0x6ec   :  { %v1435_v51 = vadd.f32 %v4530_v50, %v4020_v37 }
 0x6ed   :  { %v1429_v52 = vpop.f32.mrf.mxu0 }
 0x6ee   :  { %v1430_v53 = vadd.f32 %v4020_v37, %v1429_v52  ;;  %v1441_v54 = vadd.f32 %v1435_v51, %v5118_v38  ;;  %v4030_v52 = vld [vmem:[%s5883_s4 + $0x38] sm:$0xff] }
 0x6ef   :  { %4545 = vmatprep.subr.msk.mxu0 %vm1664_vm10, %v4030_v52 }
 0x6f0   :  { %v1453_v55 = vsel %vm166_vm4, %v1441_v54, 0.0  ;;  %v1440_v56 = vadd.f32 %v1430_v53, %v5108_v33  ;;  %4546 = vmatpush3.xpose.msk.msra.mxu0 %vm1664_vm10, %v4030_v52  ;;  %v4029_v53 = vld [vmem:[%s5883_s4 + $0x30] sm:$0xff] }
 0x6f1   :  { %1454 = vadd.xlane.f32.xlu0 %v1453_v55  ;;  %4547 = vmatprep.subr.msk.mxu0 %vm1664_vm10, %v4029_v53  ;;  %v4027_v55 = vld [vmem:[%s5883_s4 + $0x20] sm:$0xff] }
 0x6f2   :  { %v1450_v29 = vsel %vm166_vm4, %v1440_v56, 0.0 }
 0x6f3   :  { %1451 = vadd.xlane.f32.xlu1 %v1450_v29 }
 0x6f4   :  { %4548 = vmatpush3.xpose.msk.msra.mxu0 %vm1664_vm10, %v4029_v53 }
 0x771   :  { %v1449_v57 = vpop.xlane.xlu0 %1448 }
 0x772   :  { %v1457_v27 = vmul.f32 0.03125, %v1449_v57 }
 0x773   :  { %v1446_v58 = vpop.xlane.xlu1 %1445 }
 0x774   :  { %v1461_v59 = vsub.f32 %v1439_v43, %v1457_v27  ;;  %v1456_v60 = vmul.f32 0.03125, %v1446_v58 }
 0x776   :  { %v1460_v61 = vsub.f32 %v1438_v45, %v1456_v60  ;;  %v1465_v62 = vmul.f32 %v1461_v59, %v1461_v59 }
 0x778   :  { %v1471_v63 = vsel %vm166_vm4, %v1465_v62, 0.0  ;;  %v1464_v0 = vmul.f32 %v1460_v61, %v1460_v61 }
 0x779   :  { %1472 = vadd.xlane.f32.xlu0 %v1471_v63 }
 0x77a   :  { %v1455_v38 = vpop.xlane.xlu0 %1454  ;;  %v1468_v2 = vsel %vm166_vm4, %v1464_v0, 0.0 }
 0x77b   :  { %v1459_v3 = vmul.f32 0.03125, %v1455_v38  ;;  %1469 = vadd.xlane.f32.xlu1 %v1468_v2 }
 0x77c   :  { %v1452_v33 = vpop.xlane.xlu1 %1451 }
 0x77d   :  { %v1463_v4 = vsub.f32 %v1441_v54, %v1459_v3  ;;  %v1458_v5 = vmul.f32 0.03125, %v1452_v33  ;;  %v4028_v54 = vld [vmem:[%s5883_s4 + $0x28] sm:$0xff] }
 0x77e   :  { %4549 = vmatprep.subr.msk.mxu0 %vm1664_vm10, %v4028_v54 }
 0x77f   :  { %v1462_v1 = vsub.f32 %v1440_v56, %v1458_v5  ;;  %v1467_v21 = vmul.f32 %v1463_v4, %v1463_v4  ;;  %4550 = vmatpush3.xpose.msk.msra.mxu0 %vm1664_vm10, %v4028_v54  ;;  %v4031_v56 = vld [vmem:[%s5884_s5 + $0x8] ss:$0 sm:$0xff] }
 0x780   :  { %4551 = vmatprep.subr.msk.mxu0 %vm1664_vm10, %v4027_v55 }
 0x781   :  { %v1477_v6 = vsel %vm166_vm4, %v1467_v21, 0.0  ;;  %v1466_v7 = vmul.f32 %v1462_v1, %v1462_v1 }
 0x782   :  { %1478 = vadd.xlane.f32.xlu0 %v1477_v6 }
 0x783   :  { %v1474_v8 = vsel %vm166_vm4, %v1466_v7, 0.0  ;;  %4552 = vmatpush3.xpose.msk.msra.mxu0 %vm1664_vm10, %v4027_v55 }
 0x784   :  { %1475 = vadd.xlane.f32.xlu1 %v1474_v8 }
 0x802   :  { %v1473_v20 = vpop.xlane.xlu0 %1472 }
 0x803   :  { %v1481_v12 = vmul.f32 0.03125, %v1473_v20 }
 0x804   :  { %v1470_v13 = vpop.xlane.xlu1 %1469 }
 0x805   :  { %v1485_v14 = vadd.f32 1e-12, %v1481_v12  ;;  %v1480_v15 = vmul.f32 0.03125, %v1470_v13 }
 0x807   :  { %4801 = vrsqrt.f32 %v1485_v14  ;;  %v1484_v16 = vadd.f32 1e-12, %v1480_v15 }
 0x809   :  { %4803 = vrsqrt.f32 %v1484_v16 }
 0x80b   :  { %v1479_v17 = vpop.xlane.xlu0 %1478 }
 0x80c   :  { %v1483_v18 = vmul.f32 0.03125, %v1479_v17 }
 0x80d   :  { %v1476_v23 = vpop.xlane.xlu1 %1475 }
 0x80e   :  { %v1487_v24 = vadd.f32 1e-12, %v1483_v18  ;;  %v1482_v25 = vmul.f32 0.03125, %v1476_v23 }
 0x810   :  { %4805 = vrsqrt.f32 %v1487_v24  ;;  %v1486_v26 = vadd.f32 1e-12, %v1482_v25 }
 0x812   :  { %4807 = vrsqrt.f32 %v1486_v26 }
 0x814   :  { %v4802_v28 = vpop.eup %4801 }
 0x815   :  { %v1493_v30 = vmul.f32 %v4802_v28, %v1461_v59 }
 0x816   :  { %v4804_v32 = vpop.eup %4803 }
 0x817   :  { %v1492_v34 = vmul.f32 %v4804_v32, %v1460_v61  ;;  %v1501_v35 = vmul.f32 %v4025_v31, %v1493_v30 }
 0x819   :  { %v1500_v37 = vmul.f32 %v4025_v31, %v1492_v34  ;;  %v5328_v40 = vadd.f32 %v4026_v36, %v1501_v35 }
 0x81b   :  { %v5326_v39 = vadd.f32 %v4026_v36, %v1500_v37  ;;  %v4036_v37 = vld [vmem:[%s5884_s5 + $0x9] ss:$0 sm:$0xff] }
 0x81d   :  { %v4806_v41 = vpop.eup %4805  ;;  %4539 = vmatprep.mubr.msk.f32.mxu1 %vm166_vm4, %v5326_v39 }
 0x81e   :  { %4540 = vmatmul.mubr.msk.f32.vlgmr.msra.gmra.mxu1 %vm166_vm4, %v5328_v40  ;;  %v1495_v42 = vmul.f32 %v4806_v41, %v1463_v4 }
 0x81f   :  { %v4808_v43 = vpop.eup %4807 }
 0x820   :  { %v1494_v44 = vmul.f32 %v4808_v43, %v1462_v1  ;;  %v1503_v45 = vmul.f32 %v4025_v31, %v1495_v42 }
 0x822   :  { %v1502_v46 = vmul.f32 %v4025_v31, %v1494_v44  ;;  %v5336_v51 = vadd.f32 %v4026_v36, %v1503_v45 }
 0x824   :  { %v5334_v50 = vadd.f32 %v4026_v36, %v1502_v46 }
 0x826   :  { %4542 = vmatprep.mubr.msk.f32.mxu1 %vm166_vm4, %v5334_v50 }
 0x827   :  { %4543 = vmatmul.mubr.msk.f32.gmra.mxu1 %vm166_vm4, %v5336_v51 }
 0x8de   :  { %v4541_v29 = vpop.f32.mrf.mxu1 }
 0x8df   :  { %v1610_v57 = vadd.f32 %v4541_v29, %v4031_v56 }
 0x8e0   :  { %v1604_v27 = vpop.f32.mrf.mxu1 }
 0x8e1   :  { %v1624_v58 = vmul.f32 %v1610_v57, %v1610_v57  ;;  %v1605_v59 = vadd.f32 %v4031_v56, %v1604_v27 }
 0x8e3   :  { %v1628_v60 = vmul.f32 %v1624_v58, %v1610_v57  ;;  %v1623_v61 = vmul.f32 %v1605_v59, %v1605_v59 }
 0x8e5   :  { %v1632_v62 = vmul.f32 0.044715, %v1628_v60  ;;  %v1627_v63 = vmul.f32 %v1623_v61, %v1605_v59 }
 0x8e7   :  { %v1636_v0 = vadd.f32 %v1632_v62, %v1610_v57  ;;  %v1631_v38 = vmul.f32 0.044715, %v1627_v63  ;;  %v4544_v2 = vpop.f32.mrf.mxu1 }
 0x8e8   :  { %v1620_v3 = vadd.f32 %v4544_v2, %v4031_v56 }
 0x8e9   :  { %v1640_v33 = vmul.f32 0.7978846, %v1636_v0  ;;  %v1635_v4 = vadd.f32 %v1631_v38, %v1605_v59  ;;  %v1614_v5 = vpop.f32.mrf.mxu1 }
 0x8ea   :  { %v1626_v1 = vmul.f32 %v1620_v3, %v1620_v3  ;;  %v1615_v21 = vadd.f32 %v4031_v56, %v1614_v5 }
 0x8eb   :  { %4809 = vtanh.f32 %v1640_v33  ;;  %v1639_v6 = vmul.f32 0.7978846, %v1635_v4 }
 0x8ec   :  { %v1630_v7 = vmul.f32 %v1626_v1, %v1620_v3  ;;  %v1625_v8 = vmul.f32 %v1615_v21, %v1615_v21 }
 0x8ed   :  { %4811 = vtanh.f32 %v1639_v6 }
 0x8ee   :  { %v1634_v9 = vmul.f32 0.044715, %v1630_v7  ;;  %v1629_v10 = vmul.f32 %v1625_v8, %v1615_v21 }
 0x8f0   :  { %v1638_v11 = vadd.f32 %v1634_v9, %v1620_v3  ;;  %v1633_v19 = vmul.f32 0.044715, %v1629_v10  ;;  %v4050_v9 = vld [vmem:[%s5882_s3 + $0x98] sm:$0xff] }
 0x8f1   :  { %v4058_v10 = vld [vmem:[%s5882_s3 + $0xd8] sm:$0xff]  ;;  %4559 = vmatprep.subr.mxu1 %v4050_v9 }
 0x8f2   :  { %v1642_v20 = vmul.f32 0.7978846, %v1638_v11  ;;  %v1637_v12 = vadd.f32 %v1633_v19, %v1615_v21  ;;  %v4049_v11 = vld [vmem:[%s5882_s3 + $0x90] sm:$0xff]  ;;  %4587 = vmatprep.subr.mxu0 %v4058_v10  ;;  %4560 = vmatpush3.msra.mxu1 %v4050_v9 }
 0x8f3   :  { %v4057_v19 = vld [vmem:[%s5882_s3 + $0xd0] sm:$0xff]  ;;  %4561 = vmatprep.subr.mxu1 %v4049_v11 }
 0x8f4   :  { %4813 = vtanh.f32 %v1642_v20  ;;  %v1641_v13 = vmul.f32 0.7978846, %v1637_v12  ;;  %v4048_v20 = vld [vmem:[%s5882_s3 + $0x88] sm:$0xff]  ;;  %4562 = vmatpush3.msra.mxu1 %v4049_v11 }
 0x8f5   :  { %v4056_v12 = vld [vmem:[%s5882_s3 + $0xc8] sm:$0xff]  ;;  %4563 = vmatprep.subr.mxu1 %v4048_v20 }
 0x8f6   :  { %4815 = vtanh.f32 %v1641_v13  ;;  %v4047_v13 = vld [vmem:[%s5882_s3 + $0x80] sm:$0xff]  ;;  %4564 = vmatpush3.msra.mxu1 %v4048_v20 }
 0x8f7   :  { %4565 = vmatprep.subr.mxu1 %v4047_v13 }
 0x8f8   :  { %v4810_v14 = vpop.eup %4809  ;;  %4566 = vmatpush3.msra.mxu1 %v4047_v13 }
 0x8f9   :  { %v1648_v15 = vadd.f32 1.0, %v4810_v14  ;;  %v4055_v14 = vld [vmem:[%s5882_s3 + $0xc0] sm:$0xff] }
 0x8fa   :  { %v4812_v16 = vpop.eup %4811 }
 0x8fb   :  { %v1647_v17 = vadd.f32 1.0, %v4812_v16  ;;  %v1652_v18 = vmul.f32 0.5, %v1648_v15  ;;  %v4054_v15 = vld [vmem:[%s5882_s3 + $0xb8] sm:$0xff] }
 0x8fc   :  { %4573 = vmatprep.subr.mxu1 %v4054_v15 }
 0x8fd   :  { %v1651_v23 = vmul.f32 0.5, %v1647_v17  ;;  %v1656_v25 = vmul.f32 %v1652_v18, %v1610_v57 }
 0x8ff   :  { %v1655_v24 = vmul.f32 %v1651_v23, %v1605_v59 }
 0x901   :  { %v4814_v26 = vpop.eup %4813  ;;  %4553 = vmatprep.mubr.msk.f32.mxu0 %vm1664_vm10, %v1655_v24 }
 0x902   :  { %4554 = vmatmul.mubr.msk.f32.vlgmr.msra.gmra.mxu0 %vm1664_vm10, %v1656_v25  ;;  %v1650_v28 = vadd.f32 1.0, %v4814_v26 }
 0x903   :  { %v4816_v30 = vpop.eup %4815  ;;  %4588 = vmatpush3.msra.mxu0 %v4058_v10  ;;  %v4073_v10 = vld [vmem:[%s5884_s5 + $0xe] ss:$0 sm:$0xff] }
 0x904   :  { %v1649_v31 = vadd.f32 1.0, %v4816_v30  ;;  %v1654_v32 = vmul.f32 0.5, %v1650_v28  ;;  %4589 = vmatprep.subr.mxu0 %v4057_v19 }
 0x905   :  { %4590 = vmatpush3.msra.mxu0 %v4057_v19 }
 0x906   :  { %v1653_v34 = vmul.f32 0.5, %v1649_v31  ;;  %v1658_v36 = vmul.f32 %v1654_v32, %v1620_v3  ;;  %4591 = vmatprep.subr.mxu0 %v4056_v12 }
 0x907   :  { %4592 = vmatpush3.msra.mxu0 %v4056_v12 }
 0x908   :  { %v1657_v35 = vmul.f32 %v1653_v34, %v1615_v21  ;;  %4593 = vmatprep.subr.mxu0 %v4055_v14 }
 0x909   :  { %4594 = vmatpush3.msra.mxu0 %v4055_v14 }
 0x90a   :  { %4556 = vmatprep.mubr.msk.f32.mxu0 %vm1664_vm10, %v1657_v35 }
 0x90b   :  { %4557 = vmatmul.mubr.msk.f32.gmra.mxu0 %vm1664_vm10, %v1658_v36 }
 0x9c2   :  { %v4555_v41 = vpop.f32.mrf.mxu0 }
 0x9c3   :  { %v1761_v42 = vadd.f32 %v4555_v41, %v4036_v37 }
 0x9c4   :  { %v1755_v43 = vpop.f32.mrf.mxu0 }
 0x9c5   :  { %v1756_v44 = vadd.f32 %v4036_v37, %v1755_v43  ;;  %v1775_v45 = vadd.f32 %v1761_v42, %v5328_v40 }
 0x9c7   :  { %v1783_v46 = vsel %vm166_vm4, %v1775_v45, 0.0  ;;  %v1774_v52 = vadd.f32 %v1756_v44, %v5326_v39  ;;  %v4046_v44 = vld [vmem:[%s5884_s5 + $0xb] ss:$0 sm:$0xff] }
 0x9c8   :  { %1784 = vadd.xlane.f32.xlu0 %v1783_v46 }
 0x9c9   :  { %v1780_v53 = vsel %vm166_vm4, %v1774_v52, 0.0 }
 0x9ca   :  { %1781 = vadd.xlane.f32.xlu1 %v1780_v53 }
 0x9cb   :  { %v4558_v54 = vpop.f32.mrf.mxu0 }
 0x9cc   :  { %v1771_v55 = vadd.f32 %v4558_v54, %v4036_v37  ;;  %v4053_v54 = vld [vmem:[%s5882_s3 + $0xb0] sm:$0xff] }
 0x9cd   :  { %v1765_v56 = vpop.f32.mrf.mxu0 }
 0x9ce   :  { %v1766_v29 = vadd.f32 %v4036_v37, %v1765_v56  ;;  %v1777_v57 = vadd.f32 %v1771_v55, %v5336_v51  ;;  %v4045_v37 = vld [vmem:[%s5884_s5 + $0xa] ss:$0 sm:$0xff] }
 0x9d0   :  { %v1789_v27 = vsel %vm166_vm4, %v1777_v57, 0.0  ;;  %v1776_v58 = vadd.f32 %v1766_v29, %v5334_v50  ;;  %v4052_v29 = vld [vmem:[%s5882_s3 + $0xa8] sm:$0xff] }
 0x9d1   :  { %1790 = vadd.xlane.f32.xlu0 %v1789_v27 }
 0x9d2   :  { %v1786_v40 = vsel %vm166_vm4, %v1776_v58, 0.0 }
 0x9d3   :  { %1787 = vadd.xlane.f32.xlu1 %v1786_v40 }
 0xa51   :  { %v1785_v59 = vpop.xlane.xlu0 %1784 }
 0xa52   :  { %v1793_v39 = vmul.f32 0.03125, %v1785_v59 }
 0xa53   :  { %v1782_v60 = vpop.xlane.xlu1 %1781 }
 0xa54   :  { %v5380_v61 = vsub.f32 %v1775_v45, %v1793_v39  ;;  %v1792_v62 = vmul.f32 0.03125, %v1782_v60 }
 0xa56   :  { %v5382_v63 = vsub.f32 %v1774_v52, %v1792_v62  ;;  %v1801_v0 = vmul.f32 %v5380_v61, %v5380_v61  ;;  %v4063_v62 = vld [vmem:[%s5884_s5 + $0xc] ss:$0 sm:$0xff] }
 0xa58   :  { %v1807_v51 = vsel %vm166_vm4, %v1801_v0, 0.0  ;;  %v1800_v50 = vmul.f32 %v5382_v63, %v5382_v63 }
 0xa59   :  { %1808 = vadd.xlane.f32.xlu0 %v1807_v51 }
 0xa5a   :  { %v1791_v38 = vpop.xlane.xlu0 %1790  ;;  %v1804_v2 = vsel %vm166_vm4, %v1800_v50, 0.0 }
 0xa5b   :  { %v1795_v3 = vmul.f32 0.03125, %v1791_v38  ;;  %1805 = vadd.xlane.f32.xlu1 %v1804_v2  ;;  %v4068_v2 = vld [vmem:[%s5884_s5 + $0xd] ss:$0 sm:$0xff] }
 0xa5c   :  { %v1788_v33 = vpop.xlane.xlu1 %1787 }
 0xa5d   :  { %v5390_v4 = vsub.f32 %v1777_v57, %v1795_v3  ;;  %v1794_v5 = vmul.f32 0.03125, %v1788_v33 }
 0xa5f   :  { %v5392_v1 = vsub.f32 %v1776_v58, %v1794_v5  ;;  %v1803_v21 = vmul.f32 %v5390_v4, %v5390_v4  ;;  %v4051_v58 = vld [vmem:[%s5882_s3 + $0xa0] sm:$0xff] }
 0xa61   :  { %v1813_v6 = vsel %vm166_vm4, %v1803_v21, 0.0  ;;  %v1802_v7 = vmul.f32 %v5392_v1, %v5392_v1 }
 0xa62   :  { %1814 = vadd.xlane.f32.xlu0 %v1813_v6 }
 0xa63   :  { %v1810_v8 = vsel %vm166_vm4, %v1802_v7, 0.0 }
 0xa64   :  { %1811 = vadd.xlane.f32.xlu1 %v1810_v8 }
 0xae2   :  { %v1809_v16 = vpop.xlane.xlu0 %1808 }
 0xae3   :  { %v1817_v17 = vmul.f32 0.03125, %v1809_v16 }
 0xae4   :  { %v1806_v18 = vpop.xlane.xlu1 %1805 }
 0xae5   :  { %v1821_v23 = vadd.f32 1e-12, %v1817_v17  ;;  %v1816_v24 = vmul.f32 0.03125, %v1806_v18 }
 0xae7   :  { %4817 = vrsqrt.f32 %v1821_v23  ;;  %v1820_v25 = vadd.f32 1e-12, %v1816_v24 }
 0xae9   :  { %4819 = vrsqrt.f32 %v1820_v25 }
 0xaeb   :  { %v1815_v26 = vpop.xlane.xlu0 %1814 }
 0xaec   :  { %v1819_v28 = vmul.f32 0.03125, %v1815_v26 }
 0xaed   :  { %v1812_v30 = vpop.xlane.xlu1 %1811 }
 0xaee   :  { %v1823_v31 = vadd.f32 1e-12, %v1819_v28  ;;  %v1818_v32 = vmul.f32 0.03125, %v1812_v30 }
 0xaf0   :  { %4821 = vrsqrt.f32 %v1823_v31  ;;  %v1822_v34 = vadd.f32 1e-12, %v1818_v32 }
 0xaf2   :  { %4823 = vrsqrt.f32 %v1822_v34 }
 0xaf4   :  { %v4818_v35 = vpop.eup %4817 }
 0xaf5   :  { %v1829_v36 = vmul.f32 %v4818_v35, %v5380_v61 }
 0xaf6   :  { %v4820_v41 = vpop.eup %4819 }
 0xaf7   :  { %v1828_v42 = vmul.f32 %v4820_v41, %v5382_v63  ;;  %v1837_v43 = vmul.f32 %v4045_v37, %v1829_v36  ;;  %v4913_v41 = vld [vmem:[%s5880_s1 + $0x18] sm:$0xff] }
 0xaf9   :  { %v1836_v45 = vmul.f32 %v4045_v37, %v1828_v42  ;;  %v5437_v52 = vadd.f32 %v4046_v44, %v1837_v43 }
 0xafb   :  { %v5435_v46 = vadd.f32 %v4046_v44, %v1836_v45 }
 0xafd   :  { %v4822_v53 = vpop.eup %4821  ;;  %4567 = vmatprep.mubr.msk.f32.mxu1 %vm166_vm4, %v5435_v46  ;;  %4595 = vmatprep.mubr.msk.f32.mxu0 %vm166_vm4, %v5435_v46 }
 0xafe   :  { %4568 = vmatmul.mubr.msk.f32.vlgmr.msra.gmra.mxu1 %vm166_vm4, %v5437_v52  ;;  %4596 = vmatmul.mubr.msk.f32.vlgmr.msra.gmra.mxu0 %vm166_vm4, %v5437_v52  ;;  %v1831_v55 = vmul.f32 %v4822_v53, %v5390_v4  ;;  %v4915_v53 = vld [vmem:[%s5880_s1 + $0x10] sm:$0xff] }
 0xaff   :  { %v4824_v56 = vpop.eup %4823  ;;  %4574 = vmatpush3.msra.mxu1 %v4054_v15 }
 0xb00   :  { %4575 = vmatprep.subr.mxu1 %v4053_v54  ;;  %v1830_v57 = vmul.f32 %v4824_v56, %v5392_v1  ;;  %v1839_v27 = vmul.f32 %v4045_v37, %v1831_v55  ;;  %v4916_v56 = vld [vmem:[%s5880_s1] sm:$0xff] }
 0xb01   :  { %4576 = vmatpush3.msra.mxu1 %v4053_v54 }
 0xb02   :  { %v1838_v40 = vmul.f32 %v4045_v37, %v1830_v57  ;;  %4577 = vmatprep.subr.mxu1 %v4052_v29  ;;  %v5460_v39 = vadd.f32 %v4046_v44, %v1839_v27 }
 0xb03   :  { %4578 = vmatpush3.msra.mxu1 %v4052_v29 }
 0xb04   :  { %v5458_v59 = vadd.f32 %v4046_v44, %v1838_v40  ;;  %4579 = vmatprep.subr.mxu1 %v4051_v58  ;;  %v4914_v44 = vld [vmem:[%s5880_s1 + $0x8] sm:$0xff] }
 0xb05   :  { %4580 = vmatpush3.msra.mxu1 %v4051_v58 }
 0xb06   :  { %4570 = vmatprep.mubr.msk.f32.mxu1 %vm166_vm4, %v5458_v59  ;;  %4598 = vmatprep.mubr.msk.f32.mxu0 %vm166_vm4, %v5458_v59 }
 0xb07   :  { %4571 = vmatmul.mubr.msk.f32.gmra.mxu1 %vm166_vm4, %v5460_v39  ;;  %4599 = vmatmul.mubr.msk.f32.gmra.mxu0 %vm166_vm4, %v5460_v39 }
 0xb08   :  { %4581 = vmatprep.mubr.msk.f32.mxu1 %vm166_vm4, %v5435_v46 }
 0xb0b   :  { %4582 = vmatmul.mubr.msk.f32.vlgmr.msra.gmra.mxu1 %vm166_vm4, %v5437_v52 }
 0xb0c   :  { %4584 = vmatprep.mubr.msk.f32.mxu1 %vm166_vm4, %v5458_v59 }
 0xb0f   :  { %4585 = vmatmul.mubr.msk.f32.gmra.mxu1 %vm166_vm4, %v5460_v39 }
 0xbbe   :  { %v4569_v60 = vpop.f32.mrf.mxu1  ;;  %v4597_v5 = vpop.f32.mrf.mxu0 }
 0xbbf   :  { %v1957_v6 = vadd.f32 %v4569_v60, %v4063_v62  ;;  %v2137_v14 = vadd.f32 %v4597_v5, %v4073_v10 }
 0xbc0   :  { %v1951_v61 = vpop.f32.mrf.mxu1  ;;  %v2131_v8 = vpop.f32.mrf.mxu0 }
 0xbc1   :  { %v1952_v63 = vadd.f32 %v4063_v62, %v1951_v61  ;;  %v2151_v11 = vmul.f32 %v5157_v48, %v1957_v6  ;;  %v2240_v19 = vmul.f32 %v5160_v49, %v1957_v6  ;;  %v2593_v24 = vmul.f32 %v5160_v49, %v2137_v14 }
 0xbc2   :  { %v5516_v25 = vadd.f32 %v4073_v10, %v2131_v8  ;;  %v5533_v35 = vmul.f32 %v5157_v48, %v2137_v14 }
 0xbc3   :  { %v2150_v0 = vmul.f32 %v5157_v48, %v1952_v63  ;;  %v2239_v51 = vmul.f32 %v5160_v49, %v1952_v63 }
 0xbc4   :  { %v2592_v32 = vmul.f32 %v5160_v49, %v5516_v25 }
 0xbc5   :  { %4605 = vmatprep.mubr.msk.f32.mxu1 %vm166_vm4, %v2150_v0  ;;  %4612 = vmatprep.mubr.msk.f32.mxu0 %vm166_vm4, %v2239_v51  ;;  %v4918_v51 = vld [vmem:[%s5880_s1 + $0x30] sm:$0xff] }
 0xbc7   :  { %v4572_v50 = vpop.f32.mrf.mxu1  ;;  %v4600_v20 = vpop.f32.mrf.mxu0 }
 0xbc8   :  { %v5507_v16 = vadd.f32 %v4600_v20, %v4073_v10  ;;  %v1967_v18 = vadd.f32 %v4572_v50, %v4063_v62 }
 0xbc9   :  { %v1961_v38 = vpop.f32.mrf.mxu1  ;;  %v2141_v23 = vpop.f32.mrf.mxu0 }
 0xbca   :  { %v1962_v7 = vadd.f32 %v4063_v62, %v1961_v38  ;;  %v2761_v26 = vmul.f32 %v5160_v49, %v5507_v16  ;;  %v5520_v28 = vadd.f32 %v4073_v10, %v2141_v23  ;;  %v2323_v30 = vmul.f32 %v5157_v48, %v1967_v18  ;;  %v4917_v62 = vld [vmem:[%s5880_s1 + $0x20] sm:$0xff]  ;;  %v4919_v38 = vld [vmem:[%s5880_s1 + $0x28] sm:$0xff] }
 0xbcb   :  { %v4583_v3 = vpop.f32.mrf.mxu1  ;;  %v2412_v31 = vmul.f32 %v5160_v49, %v1967_v18 }
 0xbcc   :  { %v2047_v33 = vadd.f32 %v4583_v3, %v4068_v2  ;;  %v2322_v13 = vmul.f32 %v5157_v48, %v1962_v7  ;;  %v2411_v15 = vmul.f32 %v5160_v49, %v1962_v7  ;;  %v2760_v34 = vmul.f32 %v5160_v49, %v5520_v28 }
 0xbcd   :  { %v2041_v4 = vpop.f32.mrf.mxu1 }
 0xbce   :  { %v2042_v1 = vadd.f32 %v4068_v2, %v2041_v4  ;;  %4601 = vmatprep.subr.msk.mxu1 %vm166_vm4, %v2047_v33  ;;  %4608 = vmatprep.subr.msk.mxu0 %vm166_vm4, %v2047_v33 }
 0xbcf   :  { %v4586_v21 = vpop.f32.mrf.mxu1  ;;  %4602 = vmatpush3.xpose.msk.msra.mxu1 %vm166_vm4, %v2047_v33  ;;  %4609 = vmatpush3.xpose.msk.msra.mxu0 %vm166_vm4, %v2047_v33  ;;  %v4920_v33 = vld [vmem:[%s5880_s1 + $0x38] sm:$0xff] }
 0xbd0   :  { %4603 = vmatprep.subr.msk.mxu1 %vm166_vm4, %v2042_v1  ;;  %4610 = vmatprep.subr.msk.mxu0 %vm166_vm4, %v2042_v1  ;;  %v2057_v9 = vadd.f32 %v4586_v21, %v4068_v2 }
 0xbd1   :  { %v2051_v12 = vpop.f32.mrf.mxu1 }
 0xbd2   :  { %v2052_v17 = vadd.f32 %v4068_v2, %v2051_v12 }
 0xbd3   :  { %4604 = vmatpush3.xpose.msk.msra.mxu1 %vm166_vm4, %v2042_v1  ;;  %4611 = vmatpush3.xpose.msk.msra.mxu0 %vm166_vm4, %v2042_v1 }
 0xbd4   :  { %4615 = vmatprep.subr.msk.mxu1 %vm166_vm4, %v2057_v9  ;;  %4622 = vmatprep.subr.msk.mxu0 %vm166_vm4, %v2057_v9 }
 0xbd6   :  { %4606 = vmatmul.mubr.msk.f32.vlgmr.msra.gmra.mxu1 %vm166_vm4, %v2151_v11  ;;  %4613 = vmatmul.mubr.msk.f32.vlgmr.msra.gmra.mxu0 %vm166_vm4, %v2240_v19 }
 0xbd7   :  { %4616 = vmatpush3.xpose.msk.msra.mxu1 %vm166_vm4, %v2057_v9  ;;  %4619 = vmatprep.mubr.msk.f32.mxu1 %vm166_vm4, %v2322_v13 }
 0xbd8   :  { %4623 = vmatpush3.xpose.msk.msra.mxu0 %vm166_vm4, %v2057_v9  ;;  %4626 = vmatprep.mubr.msk.f32.mxu0 %vm166_vm4, %v2411_v15 }
 0xbd9   :  { %4617 = vmatprep.subr.msk.mxu1 %vm166_vm4, %v2052_v17  ;;  %4624 = vmatprep.subr.msk.mxu0 %vm166_vm4, %v2052_v17 }
 0xbdb   :  { %4618 = vmatpush3.xpose.msk.msra.mxu1 %vm166_vm4, %v2052_v17 }
 0xbdc   :  { %4625 = vmatpush3.xpose.msk.msra.mxu0 %vm166_vm4, %v2052_v17  ;;  %4629 = vmatprep.subr.mxu1 %v2593_v24 }
 0xbdd   :  { %4643 = vmatprep.subr.mxu0 %v2761_v26 }
 0xbde   :  { %4620 = vmatmul.mubr.msk.f32.vlgmr.msra.gmra.mxu1 %vm166_vm4, %v2323_v30 }
 0xbdf   :  { %4627 = vmatmul.mubr.msk.f32.vlgmr.msra.gmra.mxu0 %vm166_vm4, %v2412_v31  ;;  %4630 = vmatpush3.msra.mxu1 %v2593_v24 }
 0xbe0   :  { %4644 = vmatpush3.msra.mxu0 %v2761_v26  ;;  %4631 = vmatprep.subr.mxu1 %v2592_v32 }
 0xbe1   :  { %4645 = vmatprep.subr.mxu0 %v2760_v34  ;;  %4632 = vmatpush3.msra.mxu1 %v2592_v32 }
 0xbe2   :  { %4646 = vmatpush3.msra.mxu0 %v2760_v34  ;;  %4636 = vmatprep.subr.mxu1 %v5533_v35 }
 0xc96   :  { %v4607_v36 = vpop.f32.mrf.mxu1  ;;  %v4614_v37 = vpop.f32.mrf.mxu0 }
 0xc97   :  { %v2497_v49 = vadd.f32 %v4913_v41, %v4614_v37  ;;  %v2495_v45 = vadd.f32 %v4914_v44, %v4607_v36 }
 0xc98   :  { %v2230_v42 = vpop.f32.mrf.mxu1  ;;  %v2313_v43 = vpop.f32.mrf.mxu0 }
 0xc99   :  { %v2496_v54 = vadd.f32 %v4915_v53, %v2313_v43  ;;  %v2511_v55 = vsel %vm907_vm9, %v2497_v49, -inf  ;;  %v2494_v29 = vadd.f32 %v4916_v56, %v2230_v42  ;;  %v2505_v27 = vsel %vm907_vm9, %v2495_v45, -inf }
 0xc9a   :  { %2512 = vmax.xlane.f32.xlu0 %v2511_v55 }
 0xc9b   :  { %v2508_v57 = vsel %vm907_vm9, %v2496_v54, -inf  ;;  %v2502_v60 = vsel %vm907_vm9, %v2494_v29, -inf }
 0xc9c   :  { %2509 = vmax.xlane.f32.xlu1 %v2508_v57 }
 0xc9e   :  { %2506 = vmax.xlane.f32.xlu0 %v2505_v27  ;;  %v4621_v58 = vpop.f32.mrf.mxu1 }
 0xc9f   :  { %v4628_v40 = vpop.f32.mrf.mxu0  ;;  %v2499_v2 = vadd.f32 %v4919_v38, %v4621_v58 }
 0xca0   :  { %2503 = vmax.xlane.f32.xlu1 %v2502_v60  ;;  %v2402_v61 = vpop.f32.mrf.mxu1  ;;  %v2501_v4 = vadd.f32 %v4920_v33, %v4628_v40 }
 0xca1   :  { %v2498_v63 = vadd.f32 %v4917_v62, %v2402_v61  ;;  %v2485_v0 = vpop.f32.mrf.mxu0  ;;  %v2517_v1 = vsel %vm907_vm9, %v2499_v2, -inf }
 0xca2   :  { %v2500_v50 = vadd.f32 %v4918_v51, %v2485_v0  ;;  %v2523_v21 = vsel %vm907_vm9, %v2501_v4, -inf }
 0xca3   :  { %v2514_v3 = vsel %vm907_vm9, %v2498_v63, -inf }
 0xca4   :  { %v2520_v5 = vsel %vm907_vm9, %v2500_v50, -inf  ;;  %2515 = vmax.xlane.f32.xlu1 %v2514_v3 }
 0xca5   :  { %2521 = vmax.xlane.f32.xlu0 %v2520_v5 }
 0xca8   :  { %2518 = vmax.xlane.f32.xlu1 %v2517_v1 }
 0xca9   :  { %2524 = vmax.xlane.f32.xlu0 %v2523_v21 }
 0xd23   :  { %v2513_v6 = vpop.xlane.xlu0 %2512 }
 0xd24   :  { %v2529_v7 = vsub.f32 %v2497_v49, %v2513_v6 }
 0xd25   :  { %v2510_v8 = vpop.xlane.xlu1 %2509 }
 0xd26   :  { %v2540_v9 = vmul.f32 1.442695, %v2529_v7  ;;  %v2528_v10 = vsub.f32 %v2496_v54, %v2510_v8  ;;  %v2590_v7 = vmul.f32 %v5157_v48, %v5516_v25 }
 0xd27   :  { %v2507_v11 = vpop.xlane.xlu0 %2506 }
 0xd28   :  { %4825 = vpow2.f32 %v2540_v9  ;;  %v2538_v19 = vmul.f32 1.442695, %v2528_v10  ;;  %v2527_v20 = vsub.f32 %v2495_v45, %v2507_v11  ;;  %v2759_v9 = vmul.f32 %v5157_v48, %v5507_v16 }
 0xd29   :  { %v2504_v12 = vpop.xlane.xlu1 %2503 }
 0xd2a   :  { %4827 = vpow2.f32 %v2538_v19  ;;  %v2536_v13 = vmul.f32 1.442695, %v2527_v20  ;;  %v2526_v14 = vsub.f32 %v2494_v29, %v2504_v12  ;;  %v2758_v19 = vmul.f32 %v5157_v48, %v5520_v28  ;;  %v4062_v48 = vld [vmem:[%s5882_s3 + $0xf8] sm:$0xff]  ;;  %v4061_v28 = vld [vmem:[%s5882_s3 + $0xf0] sm:$0xff] }
 0xd2b   :  { %4657 = vmatprep.subr.mxu0 %v4062_v48 }
 0xd2c   :  { %4829 = vpow2.f32 %v2536_v13  ;;  %v2534_v15 = vmul.f32 1.442695, %v2526_v14 }
 0xd2d   :  { %v2516_v17 = vpop.xlane.xlu1 %2515 }
 0xd2e   :  { %4831 = vpow2.f32 %v2534_v15  ;;  %v2522_v18 = vpop.xlane.xlu0 %2521  ;;  %v2530_v23 = vsub.f32 %v2498_v63, %v2516_v17  ;;  %v4060_v15 = vld [vmem:[%s5882_s3 + $0xe8] sm:$0xff]  ;;  %v4059_v17 = vld [vmem:[%s5882_s3 + $0xe0] sm:$0xff] }
 0xd2f   :  { %v2532_v24 = vsub.f32 %v2500_v50, %v2522_v18 }
 0xd30   :  { %v2542_v26 = vmul.f32 1.442695, %v2530_v23 }
 0xd31   :  { %v2546_v30 = vmul.f32 1.442695, %v2532_v24  ;;  %v2519_v31 = vpop.xlane.xlu1 %2518 }
 0xd32   :  { %4833 = vpow2.f32 %v2542_v26  ;;  %v2525_v32 = vpop.xlane.xlu0 %2524  ;;  %v2531_v34 = vsub.f32 %v2499_v2, %v2519_v31 }
 0xd33   :  { %4835 = vpow2.f32 %v2546_v30  ;;  %v2533_v36 = vsub.f32 %v2501_v4, %v2525_v32 }
 0xd34   :  { %v2544_v37 = vmul.f32 1.442695, %v2531_v34 }
 0xd35   :  { %v4826_v41 = vpop.eup %4825  ;;  %v2548_v49 = vmul.f32 1.442695, %v2533_v36 }
 0xd36   :  { %4837 = vpow2.f32 %v2544_v37  ;;  %v2559_v42 = vsel %vm907_vm9, %v4826_v41, 0.0 }
 0xd37   :  { %v4828_v43 = vpop.eup %4827  ;;  %4839 = vpow2.f32 %v2548_v49  ;;  %2560 = vadd.xlane.f32.xlu0 %v2559_v42 }
 0xd38   :  { %v2556_v44 = vsel %vm907_vm9, %v4828_v43, 0.0 }
 0xd39   :  { %v4830_v45 = vpop.eup %4829  ;;  %2557 = vadd.xlane.f32.xlu1 %v2556_v44 }
 0xd3a   :  { %v2553_v53 = vsel %vm907_vm9, %v4830_v45, 0.0 }
 0xd3b   :  { %v4832_v54 = vpop.eup %4831  ;;  %2554 = vadd.xlane.f32.xlu0 %v2553_v53  ;;  %v4102_v53 = vld [vmem:[%s5884_s5 + $0xf] ss:$0 sm:$0xff] }
 0xd3c   :  { %v2550_v55 = vsel %vm907_vm9, %v4832_v54, 0.0 }
 0xd3d   :  { %2551 = vadd.xlane.f32.xlu1 %v2550_v55 }
 0xd3f   :  { %v4834_v56 = vpop.eup %4833 }
 0xd40   :  { %v4836_v29 = vpop.eup %4835  ;;  %v2562_v57 = vsel %vm907_vm9, %v4834_v56, 0.0 }
 0xd41   :  { %v2568_v27 = vsel %vm907_vm9, %v4836_v29, 0.0  ;;  %2563 = vadd.xlane.f32.xlu1 %v2562_v57 }
 0xd42   :  { %2569 = vadd.xlane.f32.xlu0 %v2568_v27 }
 0xd43   :  { %v4838_v58 = vpop.eup %4837 }
 0xd44   :  { %v4840_v40 = vpop.eup %4839  ;;  %v2565_v60 = vsel %vm907_vm9, %v4838_v58, 0.0 }
 0xd45   :  { %v2571_v61 = vsel %vm907_vm9, %v4840_v40, 0.0  ;;  %2566 = vadd.xlane.f32.xlu1 %v2565_v60 }
 0xd46   :  { %2572 = vadd.xlane.f32.xlu0 %v2571_v61 }
 0xdc0   :  { %v2561_v62 = vpop.xlane.xlu0 %2560 }
 0xdc1   :  { %4841 = vrcp.f32 %v2561_v62 }
 0xdc2   :  { %v2558_v63 = vpop.xlane.xlu1 %2557 }
 0xdc3   :  { %4843 = vrcp.f32 %v2558_v63 }
 0xdc4   :  { %v2555_v0 = vpop.xlane.xlu0 %2554 }
 0xdc5   :  { %4845 = vrcp.f32 %v2555_v0 }
 0xdc6   :  { %v2552_v51 = vpop.xlane.xlu1 %2551 }
 0xdc7   :  { %4847 = vrcp.f32 %v2552_v51 }
 0xdca   :  { %v2564_v50 = vpop.xlane.xlu1 %2563 }
 0xdcb   :  { %v2570_v38 = vpop.xlane.xlu0 %2569  ;;  %4849 = vrcp.f32 %v2564_v50 }
 0xdcc   :  { %4851 = vrcp.f32 %v2570_v38 }
 0xdce   :  { %v2567_v2 = vpop.xlane.xlu1 %2566  ;;  %v4842_v3 = vpop.eup %4841 }
 0xdcf   :  { %v2573_v33 = vpop.xlane.xlu0 %2572  ;;  %4853 = vrcp.f32 %v2567_v2  ;;  %v2585_v1 = vmul.f32 %v4842_v3, %v4826_v41 }
 0xdd0   :  { %v4844_v4 = vpop.eup %4843  ;;  %4855 = vrcp.f32 %v2573_v33 }
 0xdd1   :  { %v2584_v5 = vmul.f32 %v4844_v4, %v4828_v43 }
 0xdd2   :  { %v4846_v21 = vpop.eup %4845 }
 0xdd3   :  { %4633 = vmatprep.mubr.msk.f32.mxu1 %vm907_vm9, %v2584_v5  ;;  %v2583_v10 = vmul.f32 %v4846_v21, %v4830_v45 }
 0xdd4   :  { %v4848_v6 = vpop.eup %4847  ;;  %4634 = vmatmul.mubr.msk.f32.vlgmr.msra.gmra.mxu1 %vm907_vm9, %v2585_v1 }
 0xdd5   :  { %4637 = vmatpush3.msra.mxu1 %v5533_v35  ;;  %v2582_v8 = vmul.f32 %v4848_v6, %v4832_v54 }
 0xdd6   :  { %4638 = vmatprep.subr.mxu1 %v2590_v7 }
 0xdd7   :  { %4639 = vmatpush3.msra.mxu1 %v2590_v7  ;;  %4640 = vmatprep.mubr.msk.f32.mxu1 %vm907_vm9, %v2582_v8 }
 0xdd8   :  { %v4850_v11 = vpop.eup %4849  ;;  %4650 = vmatprep.subr.mxu1 %v2759_v9  ;;  %4641 = vmatmul.mubr.msk.f32.vlgmr.msra.gmra.mxu1 %vm907_vm9, %v2583_v10 }
 0xdd9   :  { %v4852_v25 = vpop.eup %4851  ;;  %4651 = vmatpush3.msra.mxu1 %v2759_v9  ;;  %v2586_v20 = vmul.f32 %v4850_v11, %v4834_v56 }
 0xdda   :  { %4652 = vmatprep.subr.mxu1 %v2758_v19  ;;  %v2588_v35 = vmul.f32 %v4852_v25, %v4836_v29 }
 0xddb   :  { %4653 = vmatpush3.msra.mxu1 %v2758_v19  ;;  %4654 = vmatprep.mubr.msk.f32.mxu1 %vm907_vm9, %v2586_v20 }
 0xddc   :  { %v4854_v16 = vpop.eup %4853  ;;  %4647 = vmatprep.mubr.msk.f32.mxu0 %vm907_vm9, %v2588_v35  ;;  %v4112_v35 = vld [vmem:[%s5883_s4 + $0x58] sm:$0xff] }
 0xddd   :  { %v4856_v12 = vpop.eup %4855  ;;  %v2587_v13 = vmul.f32 %v4854_v16, %v4838_v58  ;;  %v4111_v16 = vld [vmem:[%s5883_s4 + $0x50] sm:$0xff]  ;;  %4671 = vmatprep.subr.mxu1 %v4112_v35 }
 0xdde   :  { %v2589_v14 = vmul.f32 %v4856_v12, %v4840_v40  ;;  %v4110_v12 = vld [vmem:[%s5883_s4 + $0x48] sm:$0xff] }
 0xddf   :  { %4655 = vmatmul.mubr.msk.f32.vlgmr.msra.gmra.mxu1 %vm907_vm9, %v2587_v13  ;;  %v4109_v13 = vld [vmem:[%s5883_s4 + $0x40] sm:$0xff] }
 0xde0   :  { %4648 = vmatmul.mubr.msk.f32.vlgmr.msra.gmra.mxu0 %vm907_vm9, %v2589_v14  ;;  %4672 = vmatpush3.msra.mxu1 %v4112_v35 }
 0xde1   :  { %4658 = vmatpush3.msra.mxu0 %v4062_v48  ;;  %4673 = vmatprep.subr.mxu1 %v4111_v16 }
 0xde2   :  { %4659 = vmatprep.subr.mxu0 %v4061_v28  ;;  %4674 = vmatpush3.msra.mxu1 %v4111_v16 }
 0xde3   :  { %4660 = vmatpush3.msra.mxu0 %v4061_v28  ;;  %4675 = vmatprep.subr.mxu1 %v4110_v12 }
 0xde4   :  { %4661 = vmatprep.subr.mxu0 %v4060_v15  ;;  %4676 = vmatpush3.msra.mxu1 %v4110_v12 }
 0xde5   :  { %4662 = vmatpush3.msra.mxu0 %v4060_v15  ;;  %4677 = vmatprep.subr.mxu1 %v4109_v13 }
 0xde6   :  { %4663 = vmatprep.subr.mxu0 %v4059_v17  ;;  %4678 = vmatpush3.msra.mxu1 %v4109_v13 }
 0xde7   :  { %4664 = vmatpush3.msra.mxu0 %v4059_v17 }
 0xe94   :  { %v4635_v18 = vpop.f32.mrf.mxu1 }
 0xe96   :  { %v2666_v23 = vpop.f32.mrf.mxu1 }
 0xe98   :  { %v4642_v24 = vpop.f32.mrf.mxu1 }
 0xe99   :  { %v2753_v26 = vadd.f32 %v4642_v24, %v4635_v18 }
 0xe9a   :  { %v2747_v30 = vpop.f32.mrf.mxu1 }
 0xe9b   :  { %2757 = vst.msk [vmem:[#allocation2 + $0x8] sm:$0xff] %vm166_vm4, %v2753_v26  ;;  %v2748_v31 = vadd.f32 %v2747_v30, %v2666_v23 }
 0xe9d   :  { %2756 = vst.msk [vmem:[#allocation2] sm:$0xff] %vm166_vm4, %v2748_v31 }
 0xe9f   :  { %v4656_v32 = vpop.f32.mrf.mxu1 }
 0xea0   :  { %v4649_v34 = vpop.f32.mrf.mxu0 }
 0xea1   :  { %v2921_v36 = vadd.f32 %v4656_v32, %v4649_v34  ;;  %v2915_v37 = vpop.f32.mrf.mxu1 }
 0xea2   :  { %v2834_v41 = vpop.f32.mrf.mxu0  ;;  %v2927_v43 = vld [vmem:[#allocation2 + $0x8] sm:$0xff] }
 0xea3   :  { %2925 = vst.msk [vmem:[#allocation2 + $0x18] sm:$0xff] %vm166_vm4, %v2921_v36  ;;  %v2916_v49 = vadd.f32 %v2915_v37, %v2834_v41  ;;  %v4107_v37 = vld [vmem:[%s5884_s5 + $0x10] ss:$0 sm:$0xff] }
 0xea4   :  { %v2926_v42 = vld [vmem:[#allocation2] sm:$0xff] }
 0xea5   :  { %2924 = vst.msk [vmem:[#allocation2 + $0x10] sm:$0xff] %vm166_vm4, %v2916_v49  ;;  %4665 = vmatprep.mubr.msk.f32.mxu0 %vm166_vm4, %v2926_v42 }
 0xea6   :  { %4666 = vmatmul.mubr.msk.f32.vlgmr.msra.gmra.mxu0 %vm166_vm4, %v2927_v43  ;;  %v4108_v43 = vld [vmem:[%s5884_s5 + $0x11] ss:$0 sm:$0xff] }
 0xeaa   :  { %v2929_v45 = vld [vmem:[#allocation2 + $0x18] sm:$0xff] }
 0xeac   :  { %v2928_v44 = vld [vmem:[#allocation2 + $0x10] sm:$0xff] }
 0xead   :  { %4668 = vmatprep.mubr.msk.f32.mxu0 %vm166_vm4, %v2928_v44 }
 0xeae   :  { %4669 = vmatmul.mubr.msk.f32.gmra.mxu0 %vm166_vm4, %v2929_v45 }
 0xf66   :  { %v4667_v54 = vpop.f32.mrf.mxu0 }
 0xf67   :  { %v3019_v55 = vadd.f32 %v4667_v54, %v4102_v53 }
 0xf68   :  { %v3013_v56 = vpop.f32.mrf.mxu0 }
 0xf69   :  { %v3014_v29 = vadd.f32 %v4102_v53, %v3013_v56  ;;  %v3033_v57 = vadd.f32 %v3019_v55, %v5437_v52 }
 0xf6b   :  { %v3041_v27 = vsel %vm166_vm4, %v3033_v57, 0.0  ;;  %v3032_v58 = vadd.f32 %v3014_v29, %v5435_v46 }
 0xf6c   :  { %3042 = vadd.xlane.f32.xlu0 %v3041_v27 }
 0xf6d   :  { %v3038_v40 = vsel %vm166_vm4, %v3032_v58, 0.0 }
 0xf6e   :  { %v4670_v60 = vpop.f32.mrf.mxu0  ;;  %3039 = vadd.xlane.f32.xlu1 %v3038_v40 }
 0xf6f   :  { %v3029_v61 = vadd.f32 %v4670_v60, %v4102_v53  ;;  %v4116_v60 = vld [vmem:[%s5883_s4 + $0x78] sm:$0xff] }
 0xf70   :  { %v3023_v62 = vpop.f32.mrf.mxu0  ;;  %4685 = vmatprep.subr.msk.mxu0 %vm1664_vm10, %v4116_v60 }
 0xf71   :  { %v3024_v63 = vadd.f32 %v4102_v53, %v3023_v62  ;;  %v3035_v0 = vadd.f32 %v3029_v61, %v5460_v39  ;;  %4686 = vmatpush3.xpose.msk.msra.mxu0 %vm1664_vm10, %v4116_v60  ;;  %v4115_v61 = vld [vmem:[%s5883_s4 + $0x70] sm:$0xff]  ;;  %v4114_v62 = vld [vmem:[%s5883_s4 + $0x68] sm:$0xff] }
 0xf72   :  { %4687 = vmatprep.subr.msk.mxu0 %vm1664_vm10, %v4115_v61 }
 0xf73   :  { %v3047_v51 = vsel %vm166_vm4, %v3035_v0, 0.0  ;;  %v3034_v50 = vadd.f32 %v3024_v63, %v5458_v59  ;;  %v4113_v63 = vld [vmem:[%s5883_s4 + $0x60] sm:$0xff] }
 0xf74   :  { %3048 = vadd.xlane.f32.xlu0 %v3047_v51 }
 0xf75   :  { %v3044_v52 = vsel %vm166_vm4, %v3034_v50, 0.0  ;;  %4688 = vmatpush3.xpose.msk.msra.mxu0 %vm1664_vm10, %v4115_v61 }
 0xf76   :  { %3045 = vadd.xlane.f32.xlu1 %v3044_v52  ;;  %4689 = vmatprep.subr.msk.mxu0 %vm1664_vm10, %v4114_v62 }
 0xf79   :  { %4690 = vmatpush3.xpose.msk.msra.mxu0 %vm1664_vm10, %v4114_v62 }
 0xf7a   :  { %4691 = vmatprep.subr.msk.mxu0 %vm1664_vm10, %v4113_v63 }
 0xf7d   :  { %4692 = vmatpush3.xpose.msk.msra.mxu0 %vm1664_vm10, %v4113_v63 }
 0xff5   :  { %v3043_v38 = vpop.xlane.xlu0 %3042 }
 0xff6   :  { %v3051_v46 = vmul.f32 0.03125, %v3043_v38 }
 0xff7   :  { %v3040_v2 = vpop.xlane.xlu1 %3039 }
 0xff8   :  { %v3055_v3 = vsub.f32 %v3033_v57, %v3051_v46  ;;  %v3050_v33 = vmul.f32 0.03125, %v3040_v2 }
 0xffa   :  { %v3054_v4 = vsub.f32 %v3032_v58, %v3050_v33  ;;  %v3059_v5 = vmul.f32 %v3055_v3, %v3055_v3 }
 0xffc   :  { %v3065_v1 = vsel %vm166_vm4, %v3059_v5, 0.0  ;;  %v3058_v21 = vmul.f32 %v3054_v4, %v3054_v4 }
 0xffd   :  { %v3049_v6 = vpop.xlane.xlu0 %3048  ;;  %3066 = vadd.xlane.f32.xlu0 %v3065_v1 }
 0xffe   :  { %v3053_v39 = vmul.f32 0.03125, %v3049_v6  ;;  %v3062_v7 = vsel %vm166_vm4, %v3058_v21, 0.0 }
 0xfff   :  { %v3046_v59 = vpop.xlane.xlu1 %3045  ;;  %3063 = vadd.xlane.f32.xlu1 %v3062_v7 }
0x1000   :  { %v3057_v8 = vsub.f32 %v3035_v0, %v3053_v39  ;;  %v3052_v9 = vmul.f32 0.03125, %v3046_v59  ;;  %v4117_v0 = vld [vmem:[%s5884_s5 + $0x12] ss:$0 sm:$0xff] }
0x1002   :  { %v3056_v10 = vsub.f32 %v3034_v50, %v3052_v9  ;;  %v3061_v11 = vmul.f32 %v3057_v8, %v3057_v8 }
0x1004   :  { %v3071_v19 = vsel %vm166_vm4, %v3061_v11, 0.0  ;;  %v3060_v25 = vmul.f32 %v3056_v10, %v3056_v10 }
0x1005   :  { %3072 = vadd.xlane.f32.xlu0 %v3071_v19 }
0x1006   :  { %v3068_v20 = vsel %vm166_vm4, %v3060_v25, 0.0 }
0x1007   :  { %3069 = vadd.xlane.f32.xlu1 %v3068_v20 }
0x1086   :  { %v3067_v14 = vpop.xlane.xlu0 %3066 }
0x1087   :  { %v3075_v48 = vmul.f32 0.03125, %v3067_v14 }
0x1088   :  { %v3064_v28 = vpop.xlane.xlu1 %3063 }
0x1089   :  { %v3079_v15 = vadd.f32 1e-12, %v3075_v48  ;;  %v3074_v17 = vmul.f32 0.03125, %v3064_v28 }
0x108b   :  { %4857 = vrsqrt.f32 %v3079_v15  ;;  %v3078_v18 = vadd.f32 1e-12, %v3074_v17 }
0x108d   :  { %4859 = vrsqrt.f32 %v3078_v18 }
0x108e   :  { %v3073_v23 = vpop.xlane.xlu0 %3072 }
0x108f   :  { %v3077_v24 = vmul.f32 0.03125, %v3073_v23 }
0x1090   :  { %v3070_v26 = vpop.xlane.xlu1 %3069 }
0x1091   :  { %v3081_v30 = vadd.f32 1e-12, %v3077_v24  ;;  %v3076_v31 = vmul.f32 0.03125, %v3070_v26 }
0x1093   :  { %4861 = vrsqrt.f32 %v3081_v30  ;;  %v3080_v32 = vadd.f32 1e-12, %v3076_v31 }
0x1095   :  { %4863 = vrsqrt.f32 %v3080_v32 }
0x1098   :  { %v4858_v34 = vpop.eup %4857 }
0x1099   :  { %v3087_v36 = vmul.f32 %v4858_v34, %v3055_v3 }
0x109a   :  { %v4860_v41 = vpop.eup %4859 }
0x109b   :  { %v3086_v49 = vmul.f32 %v4860_v41, %v3054_v4  ;;  %v3095_v42 = vmul.f32 %v4107_v37, %v3087_v36 }
0x109d   :  { %v3094_v44 = vmul.f32 %v4107_v37, %v3086_v49  ;;  %v5646_v54 = vadd.f32 %v4108_v43, %v3095_v42  ;;  %v4122_v42 = vld [vmem:[%s5884_s5 + $0x13] ss:$0 sm:$0xff] }
0x109f   :  { %v5644_v45 = vadd.f32 %v4108_v43, %v3094_v44 }
0x10a0   :  { %v4862_v53 = vpop.eup %4861 }
0x10a1   :  { %4679 = vmatprep.mubr.msk.f32.mxu1 %vm166_vm4, %v5644_v45  ;;  %v3089_v55 = vmul.f32 %v4862_v53, %v3057_v8 }
0x10a2   :  { %v4864_v56 = vpop.eup %4863  ;;  %4680 = vmatmul.mubr.msk.f32.vlgmr.msra.gmra.mxu1 %vm166_vm4, %v5646_v54 }
0x10a3   :  { %v3088_v29 = vmul.f32 %v4864_v56, %v3056_v10  ;;  %v3097_v57 = vmul.f32 %v4107_v37, %v3089_v55 }
0x10a5   :  { %v3096_v27 = vmul.f32 %v4107_v37, %v3088_v29  ;;  %v5654_v40 = vadd.f32 %v4108_v43, %v3097_v57 }
0x10a7   :  { %v5652_v58 = vadd.f32 %v4108_v43, %v3096_v27 }
0x10a9   :  { %4682 = vmatprep.mubr.msk.f32.mxu1 %vm166_vm4, %v5652_v58 }
0x10aa   :  { %4683 = vmatmul.mubr.msk.f32.gmra.mxu1 %vm166_vm4, %v5654_v40 }
0x1162   :  { %v4681_v51 = vpop.f32.mrf.mxu1 }
0x1163   :  { %v3205_v50 = vadd.f32 %v4681_v51, %v4117_v0 }
0x1164   :  { %v3199_v52 = vpop.f32.mrf.mxu1 }
0x1165   :  { %v3219_v38 = vmul.f32 %v3205_v50, %v3205_v50  ;;  %v3200_v46 = vadd.f32 %v4117_v0, %v3199_v52 }
0x1167   :  { %v3223_v2 = vmul.f32 %v3219_v38, %v3205_v50  ;;  %v3218_v3 = vmul.f32 %v3200_v46, %v3200_v46 }
0x1169   :  { %v3227_v33 = vmul.f32 0.044715, %v3223_v2  ;;  %v3222_v4 = vmul.f32 %v3218_v3, %v3200_v46 }
0x116a   :  { %v4684_v5 = vpop.f32.mrf.mxu1 }
0x116b   :  { %v3231_v1 = vadd.f32 %v3227_v33, %v3205_v50  ;;  %v3226_v21 = vmul.f32 0.044715, %v3222_v4  ;;  %v3215_v6 = vadd.f32 %v4684_v5, %v4117_v0 }
0x116c   :  { %v3209_v39 = vpop.f32.mrf.mxu1 }
0x116d   :  { %v3235_v7 = vmul.f32 0.7978846, %v3231_v1  ;;  %v3230_v59 = vadd.f32 %v3226_v21, %v3200_v46  ;;  %v3221_v8 = vmul.f32 %v3215_v6, %v3215_v6  ;;  %v3210_v9 = vadd.f32 %v4117_v0, %v3209_v39 }
0x116f   :  { %4865 = vtanh.f32 %v3235_v7  ;;  %v3234_v10 = vmul.f32 0.7978846, %v3230_v59  ;;  %v3225_v11 = vmul.f32 %v3221_v8, %v3215_v6  ;;  %v3220_v19 = vmul.f32 %v3210_v9, %v3210_v9 }
0x1171   :  { %4867 = vtanh.f32 %v3234_v10  ;;  %v3229_v25 = vmul.f32 0.044715, %v3225_v11  ;;  %v3224_v20 = vmul.f32 %v3220_v19, %v3210_v9  ;;  %v4136_v11 = vld [vmem:[%s5882_s3 + $0x118] sm:$0xff]  ;;  %v4135_v19 = vld [vmem:[%s5882_s3 + $0x110] sm:$0xff] }
0x1172   :  { %4699 = vmatprep.subr.mxu1 %v4136_v11 }
0x1173   :  { %v3233_v35 = vadd.f32 %v3229_v25, %v3215_v6  ;;  %v3228_v16 = vmul.f32 0.044715, %v3224_v20  ;;  %4700 = vmatpush3.msra.mxu1 %v4136_v11  ;;  %v4134_v25 = vld [vmem:[%s5882_s3 + $0x108] sm:$0xff]  ;;  %v4133_v20 = vld [vmem:[%s5882_s3 + $0x100] sm:$0xff] }
0x1174   :  { %4701 = vmatprep.subr.mxu1 %v4135_v19 }
0x1175   :  { %v3237_v12 = vmul.f32 0.7978846, %v3233_v35  ;;  %v3232_v13 = vadd.f32 %v3228_v16, %v3210_v9  ;;  %4702 = vmatpush3.msra.mxu1 %v4135_v19  ;;  %v4921_v35 = vld [vmem:[%s5881_s2 + $0x78] sm:$0xff] }
0x1176   :  { %4703 = vmatprep.subr.mxu1 %v4134_v25 }
0x1177   :  { %4869 = vtanh.f32 %v3237_v12  ;;  %v3236_v14 = vmul.f32 0.7978846, %v3232_v13  ;;  %4704 = vmatpush3.msra.mxu1 %v4134_v25 }
0x1178   :  { %4705 = vmatprep.subr.mxu1 %v4133_v20 }
0x1179   :  { %4871 = vtanh.f32 %v3236_v14  ;;  %4706 = vmatpush3.msra.mxu1 %v4133_v20 }
0x117a   :  { %4713 = vmatprep.subr.msk.mxu1 %vm166_vm4, %v4921_v35 }
0x117c   :  { %v4866_v48 = vpop.eup %4865 }
0x117d   :  { %v3243_v28 = vadd.f32 1.0, %v4866_v48 }
0x117e   :  { %v4868_v15 = vpop.eup %4867 }
0x117f   :  { %v3242_v17 = vadd.f32 1.0, %v4868_v15  ;;  %v3247_v18 = vmul.f32 0.5, %v3243_v28 }
0x1181   :  { %v3246_v23 = vmul.f32 0.5, %v3242_v17  ;;  %v3251_v30 = vmul.f32 %v3247_v18, %v3205_v50 }
0x1183   :  { %v3250_v24 = vmul.f32 %v3246_v23, %v3200_v46 }
0x1184   :  { %v4870_v26 = vpop.eup %4869 }
0x1185   :  { %4693 = vmatprep.mubr.msk.f32.mxu0 %vm1664_vm10, %v3250_v24  ;;  %v3245_v31 = vadd.f32 1.0, %v4870_v26 }
0x1186   :  { %v4872_v32 = vpop.eup %4871  ;;  %4694 = vmatmul.mubr.msk.f32.vlgmr.msra.gmra.mxu0 %vm1664_vm10, %v3251_v30 }
0x1187   :  { %v3244_v34 = vadd.f32 1.0, %v4872_v32  ;;  %v3249_v36 = vmul.f32 0.5, %v3245_v31  ;;  %v4131_v32 = vld [vmem:[%s5884_s5 + $0x14] ss:$0 sm:$0xff] }
0x1189   :  { %v3248_v37 = vmul.f32 0.5, %v3244_v34  ;;  %v3253_v49 = vmul.f32 %v3249_v36, %v3215_v6 }
0x118b   :  { %v3252_v41 = vmul.f32 %v3248_v37, %v3210_v9 }
0x118d   :  { %4696 = vmatprep.mubr.msk.f32.mxu0 %vm1664_vm10, %v3252_v41  ;;  %v4132_v41 = vld [vmem:[%s5884_s5 + $0x15] ss:$0 sm:$0xff] }
0x118e   :  { %4697 = vmatmul.mubr.msk.f32.gmra.mxu0 %vm1664_vm10, %v3253_v49 }
0x1246   :  { %v4695_v43 = vpop.f32.mrf.mxu0 }
0x1247   :  { %v3355_v44 = vadd.f32 %v4695_v43, %v4122_v42 }
0x1248   :  { %v3349_v53 = vpop.f32.mrf.mxu0 }
0x1249   :  { %v3350_v55 = vadd.f32 %v4122_v42, %v3349_v53  ;;  %v3369_v56 = vadd.f32 %v3355_v44, %v5646_v54 }
0x124b   :  { %v3377_v29 = vsel %vm166_vm4, %v3369_v56, 0.0  ;;  %v3368_v57 = vadd.f32 %v3350_v55, %v5644_v45 }
0x124c   :  { %3378 = vadd.xlane.f32.xlu0 %v3377_v29 }
0x124d   :  { %v3374_v27 = vsel %vm166_vm4, %v3368_v57, 0.0 }
0x124e   :  { %v4698_v60 = vpop.f32.mrf.mxu0  ;;  %3375 = vadd.xlane.f32.xlu1 %v3374_v27 }
0x124f   :  { %v3365_v61 = vadd.f32 %v4698_v60, %v4122_v42 }
0x1250   :  { %v3359_v62 = vpop.f32.mrf.mxu0 }
0x1251   :  { %v3360_v63 = vadd.f32 %v4122_v42, %v3359_v62  ;;  %v3371_v0 = vadd.f32 %v3365_v61, %v5654_v40  ;;  %v4923_v62 = vld [vmem:[%s5881_s2 + $0x68] sm:$0xff] }
0x1253   :  { %v3383_v51 = vsel %vm166_vm4, %v3371_v0, 0.0  ;;  %v3370_v50 = vadd.f32 %v3360_v63, %v5652_v58  ;;  %v4924_v63 = vld [vmem:[%s5881_s2 + $0x60] sm:$0xff] }
0x1254   :  { %3384 = vadd.xlane.f32.xlu0 %v3383_v51  ;;  %v4926_v51 = vld [vmem:[%s5881_s2 + $0x50] sm:$0xff] }
0x1255   :  { %v3380_v54 = vsel %vm166_vm4, %v3370_v50, 0.0 }
0x1256   :  { %3381 = vadd.xlane.f32.xlu1 %v3380_v54  ;;  %v4928_v54 = vld [vmem:[%s5881_s2 + $0x40] sm:$0xff] }
0x12d5   :  { %v3379_v52 = vpop.xlane.xlu0 %3378 }
0x12d6   :  { %v3387_v45 = vmul.f32 0.03125, %v3379_v52  ;;  %v4929_v52 = vld [vmem:[%s5881_s2 + $0x38] sm:$0xff] }
0x12d7   :  { %v3376_v38 = vpop.xlane.xlu1 %3375 }
0x12d8   :  { %v3391_v46 = vsub.f32 %v3369_v56, %v3387_v45  ;;  %v3386_v2 = vmul.f32 0.03125, %v3376_v38  ;;  %v4930_v45 = vld [vmem:[%s5881_s2 + $0x30] sm:$0xff]  ;;  %v4931_v38 = vld [vmem:[%s5881_s2 + $0x28] sm:$0xff] }
0x12da   :  { %v3390_v3 = vsub.f32 %v3368_v57, %v3386_v2  ;;  %v3395_v33 = vmul.f32 %v3391_v46, %v3391_v46  ;;  %v4922_v57 = vld [vmem:[%s5881_s2 + $0x70] sm:$0xff]  ;;  %v4933_v2 = vld [vmem:[%s5881_s2 + $0x18] sm:$0xff] }
0x12dc   :  { %v3401_v4 = vsel %vm166_vm4, %v3395_v33, 0.0  ;;  %v3394_v5 = vmul.f32 %v3390_v3, %v3390_v3  ;;  %v4935_v33 = vld [vmem:[%s5881_s2 + $0x8] sm:$0xff] }
0x12dd   :  { %v3385_v1 = vpop.xlane.xlu0 %3384  ;;  %3402 = vadd.xlane.f32.xlu0 %v3401_v4  ;;  %v4936_v4 = vld [vmem:[%s5881_s2] sm:$0xff] }
0x12de   :  { %v3389_v40 = vmul.f32 0.03125, %v3385_v1  ;;  %v3398_v21 = vsel %vm166_vm4, %v3394_v5, 0.0  ;;  %v4137_v5 = vld [vmem:[%s5884_s5 + $0x16] ss:$0 sm:$0xff] }
0x12df   :  { %v3382_v58 = vpop.xlane.xlu1 %3381  ;;  %3399 = vadd.xlane.f32.xlu1 %v3398_v21 }
0x12e0   :  { %v3393_v6 = vsub.f32 %v3371_v0, %v3389_v40  ;;  %v3388_v39 = vmul.f32 0.03125, %v3382_v58  ;;  %v4925_v0 = vld [vmem:[%s5881_s2 + $0x58] sm:$0xff] }
0x12e2   :  { %v3392_v7 = vsub.f32 %v3370_v50, %v3388_v39  ;;  %v3397_v59 = vmul.f32 %v3393_v6, %v3393_v6  ;;  %v4927_v50 = vld [vmem:[%s5881_s2 + $0x48] sm:$0xff] }
0x12e4   :  { %v3407_v8 = vsel %vm166_vm4, %v3397_v59, 0.0  ;;  %v3396_v9 = vmul.f32 %v3392_v7, %v3392_v7 }
0x12e5   :  { %3408 = vadd.xlane.f32.xlu0 %v3407_v8 }
0x12e6   :  { %v3404_v10 = vsel %vm166_vm4, %v3396_v9, 0.0 }
0x12e7   :  { %3405 = vadd.xlane.f32.xlu1 %v3404_v10 }
0x1366   :  { %v3403_v16 = vpop.xlane.xlu0 %3402 }
0x1367   :  { %v3411_v12 = vmul.f32 0.03125, %v3403_v16 }
0x1368   :  { %v3400_v13 = vpop.xlane.xlu1 %3399 }
0x1369   :  { %v3415_v14 = vadd.f32 1e-12, %v3411_v12  ;;  %v3410_v48 = vmul.f32 0.03125, %v3400_v13 }
0x136b   :  { %4873 = vrsqrt.f32 %v3415_v14  ;;  %v3414_v28 = vadd.f32 1e-12, %v3410_v48 }
0x136d   :  { %4875 = vrsqrt.f32 %v3414_v28 }
0x136e   :  { %v3409_v15 = vpop.xlane.xlu0 %3408 }
0x136f   :  { %v3413_v17 = vmul.f32 0.03125, %v3409_v15 }
0x1370   :  { %v3406_v18 = vpop.xlane.xlu1 %3405 }
0x1371   :  { %v3417_v23 = vadd.f32 1e-12, %v3413_v17  ;;  %v3412_v24 = vmul.f32 0.03125, %v3406_v18 }
0x1373   :  { %4877 = vrsqrt.f32 %v3417_v23  ;;  %v3416_v26 = vadd.f32 1e-12, %v3412_v24 }
0x1375   :  { %4879 = vrsqrt.f32 %v3416_v26 }
0x1378   :  { %v4874_v30 = vpop.eup %4873 }
0x1379   :  { %v3423_v31 = vmul.f32 %v4874_v30, %v3391_v46  ;;  %v4932_v46 = vld [vmem:[%s5881_s2 + $0x20] sm:$0xff] }
0x137a   :  { %v4876_v34 = vpop.eup %4875 }
0x137b   :  { %v3422_v36 = vmul.f32 %v4876_v34, %v3390_v3  ;;  %v3431_v37 = vmul.f32 %v4131_v32, %v3423_v31  ;;  %v4934_v3 = vld [vmem:[%s5881_s2 + $0x10] sm:$0xff] }
0x137d   :  { %v3430_v49 = vmul.f32 %v4131_v32, %v3422_v36  ;;  %v3439_v44 = vadd.f32 %v4132_v41, %v3431_v37 }
0x137f   :  { %v3438_v42 = vadd.f32 %v4132_v41, %v3430_v49 }
0x1380   :  { %v4878_v43 = vpop.eup %4877 }
0x1381   :  { %4707 = vmatprep.mubr.msk.f32.mxu1 %vm166_vm4, %v3438_v42  ;;  %v3425_v53 = vmul.f32 %v4878_v43, %v3393_v6 }
0x1382   :  { %v4880_v55 = vpop.eup %4879  ;;  %4708 = vmatmul.mubr.msk.f32.vlgmr.msra.gmra.mxu1 %vm166_vm4, %v3439_v44 }
0x1383   :  { %v3424_v56 = vmul.f32 %v4880_v55, %v3392_v7  ;;  %4714 = vmatpush3.xpose.msk.msra.mxu1 %vm166_vm4, %v4921_v35  ;;  %v3433_v29 = vmul.f32 %v4131_v32, %v3425_v53 }
0x1384   :  { %4715 = vmatprep.subr.msk.mxu1 %vm166_vm4, %v4922_v57 }
0x1385   :  { %v3432_v27 = vmul.f32 %v4131_v32, %v3424_v56  ;;  %v3441_v61 = vadd.f32 %v4132_v41, %v3433_v29 }
0x1387   :  { %v3440_v60 = vadd.f32 %v4132_v41, %v3432_v27  ;;  %4716 = vmatpush3.xpose.msk.msra.mxu1 %vm166_vm4, %v4922_v57 }
0x1388   :  { %4717 = vmatprep.subr.msk.mxu1 %vm166_vm4, %v4923_v62 }
0x1389   :  { %4710 = vmatprep.mubr.msk.f32.mxu1 %vm166_vm4, %v3440_v60 }
0x138a   :  { %4711 = vmatmul.mubr.msk.f32.gmra.mxu1 %vm166_vm4, %v3441_v61 }
0x138b   :  { %4718 = vmatpush3.xpose.msk.msra.mxu1 %vm166_vm4, %v4923_v62 }
0x138c   :  { %4719 = vmatprep.subr.msk.mxu1 %vm166_vm4, %v4924_v63 }
0x138f   :  { %4720 = vmatpush3.xpose.msk.msra.mxu1 %vm166_vm4, %v4924_v63 }
0x1390   :  { %4721 = vmatprep.subr.msk.mxu1 %vm166_vm4, %v4925_v0 }
0x1393   :  { %4722 = vmatpush3.xpose.msk.msra.mxu1 %vm166_vm4, %v4925_v0 }
0x1394   :  { %4723 = vmatprep.subr.msk.mxu1 %vm166_vm4, %v4926_v51 }
0x1397   :  { %4724 = vmatpush3.xpose.msk.msra.mxu1 %vm166_vm4, %v4926_v51 }
0x1398   :  { %4725 = vmatprep.subr.msk.mxu1 %vm166_vm4, %v4927_v50 }
0x139b   :  { %4726 = vmatpush3.xpose.msk.msra.mxu1 %vm166_vm4, %v4927_v50 }
0x139c   :  { %4727 = vmatprep.subr.msk.mxu1 %vm166_vm4, %v4928_v54 }
0x139f   :  { %4728 = vmatpush3.xpose.msk.msra.mxu1 %vm166_vm4, %v4928_v54 }
0x13a0   :  { %4729 = vmatprep.subr.msk.mxu1 %vm166_vm4, %v4929_v52 }
0x13a3   :  { %4730 = vmatpush3.xpose.msk.msra.mxu1 %vm166_vm4, %v4929_v52 }
0x13a4   :  { %4731 = vmatprep.subr.msk.mxu1 %vm166_vm4, %v4930_v45 }
0x13a7   :  { %4732 = vmatpush3.xpose.msk.msra.mxu1 %vm166_vm4, %v4930_v45 }
0x13a8   :  { %4733 = vmatprep.subr.msk.mxu1 %vm166_vm4, %v4931_v38 }
0x13ab   :  { %4734 = vmatpush3.xpose.msk.msra.mxu1 %vm166_vm4, %v4931_v38 }
0x13ac   :  { %4735 = vmatprep.subr.msk.mxu1 %vm166_vm4, %v4932_v46 }
0x13af   :  { %4736 = vmatpush3.xpose.msk.msra.mxu1 %vm166_vm4, %v4932_v46 }
0x13b0   :  { %4737 = vmatprep.subr.msk.mxu1 %vm166_vm4, %v4933_v2 }
0x13b3   :  { %4738 = vmatpush3.xpose.msk.msra.mxu1 %vm166_vm4, %v4933_v2 }
0x13b4   :  { %4739 = vmatprep.subr.msk.mxu1 %vm166_vm4, %v4934_v3 }
0x13b7   :  { %4740 = vmatpush3.xpose.msk.msra.mxu1 %vm166_vm4, %v4934_v3 }
0x13b8   :  { %4741 = vmatprep.subr.msk.mxu1 %vm166_vm4, %v4935_v33 }
0x13bb   :  { %4742 = vmatpush3.xpose.msk.msra.mxu1 %vm166_vm4, %v4935_v33 }
0x13bc   :  { %4743 = vmatprep.subr.msk.mxu1 %vm166_vm4, %v4936_v4 }
0x13bf   :  { %4744 = vmatpush3.xpose.msk.msra.mxu1 %vm166_vm4, %v4936_v4 }
0x1442   :  { %v4709_v1 = vpop.f32.mrf.mxu1 }
0x1443   :  { %v3536_v40 = vadd.f32 %v4709_v1, %v4137_v5 }
0x1444   :  { %v3530_v21 = vpop.f32.mrf.mxu1 }
0x1445   :  { %v3550_v58 = vmul.f32 %v3536_v40, %v3536_v40  ;;  %v3531_v6 = vadd.f32 %v4137_v5, %v3530_v21 }
0x1447   :  { %v3554_v39 = vmul.f32 %v3550_v58, %v3536_v40  ;;  %v3549_v7 = vmul.f32 %v3531_v6, %v3531_v6 }
0x1449   :  { %v3558_v59 = vmul.f32 0.044715, %v3554_v39  ;;  %v3553_v8 = vmul.f32 %v3549_v7, %v3531_v6 }
0x144a   :  { %v4712_v9 = vpop.f32.mrf.mxu1 }
0x144b   :  { %v3562_v10 = vadd.f32 %v3558_v59, %v3536_v40  ;;  %v3557_v11 = vmul.f32 0.044715, %v3553_v8  ;;  %v3546_v19 = vadd.f32 %v4712_v9, %v4137_v5 }
0x144c   :  { %v3540_v25 = vpop.f32.mrf.mxu1 }
0x144d   :  { %v3561_v20 = vadd.f32 %v3557_v11, %v3531_v6  ;;  %v3552_v35 = vmul.f32 %v3546_v19, %v3546_v19  ;;  %v3541_v16 = vadd.f32 %v4137_v5, %v3540_v25  ;;  %v3566_v12 = vmul.f32 0.7978846, %v3562_v10 }
0x144f   :  { %v3556_v13 = vmul.f32 %v3552_v35, %v3546_v19  ;;  %v3551_v14 = vmul.f32 %v3541_v16, %v3541_v16  ;;  %4881 = vtanh.f32 %v3566_v12  ;;  %v3565_v48 = vmul.f32 0.7978846, %v3561_v20 }
0x1451   :  { %v3560_v28 = vmul.f32 0.044715, %v3556_v13  ;;  %v3555_v15 = vmul.f32 %v3551_v14, %v3541_v16  ;;  %4883 = vtanh.f32 %v3565_v48  ;;  %v4142_v48 = vld [vmem:[%s5884_s5 + $0x17] ss:$0 sm:$0xff] }
0x1453   :  { %v3564_v17 = vadd.f32 %v3560_v28, %v3546_v19  ;;  %v3559_v18 = vmul.f32 0.044715, %v3555_v15 }
0x1455   :  { %v3563_v23 = vadd.f32 %v3559_v18, %v3541_v16  ;;  %v3568_v24 = vmul.f32 0.7978846, %v3564_v17  ;;  %v4143_v18 = vld [vmem:[%s5884_s5 + $0x18] ss:$0 sm:$0xff] }
0x1457   :  { %4885 = vtanh.f32 %v3568_v24  ;;  %v3567_v26 = vmul.f32 0.7978846, %v3563_v23 }
0x1459   :  { %4887 = vtanh.f32 %v3567_v26 }
0x145c   :  { %v4882_v30 = vpop.eup %4881 }
0x145d   :  { %v3574_v31 = vadd.f32 1.0, %v4882_v30 }
0x145e   :  { %v4884_v32 = vpop.eup %4883 }
0x145f   :  { %v3578_v34 = vmul.f32 0.5, %v3574_v31  ;;  %v3573_v36 = vadd.f32 1.0, %v4884_v32 }
0x1461   :  { %v3582_v37 = vmul.f32 %v3578_v34, %v3536_v40  ;;  %v3577_v41 = vmul.f32 0.5, %v3573_v36 }
0x1463   :  { %v3590_v49 = vsel %vm166_vm4, %v3582_v37, 0.0  ;;  %v3581_v42 = vmul.f32 %v3577_v41, %v3531_v6 }
0x1464   :  { %v4886_v43 = vpop.eup %4885  ;;  %3591 = vadd.xlane.f32.xlu0 %v3590_v49 }
0x1465   :  { %v3587_v44 = vsel %vm166_vm4, %v3581_v42, 0.0  ;;  %v3576_v53 = vadd.f32 1.0, %v4886_v43 }
0x1466   :  { %v4888_v55 = vpop.eup %4887  ;;  %3588 = vadd.xlane.f32.xlu1 %v3587_v44 }
0x1467   :  { %v3580_v56 = vmul.f32 0.5, %v3576_v53  ;;  %v3575_v29 = vadd.f32 1.0, %v4888_v55 }
0x1469   :  { %v3584_v57 = vmul.f32 %v3580_v56, %v3546_v19  ;;  %v3579_v27 = vmul.f32 0.5, %v3575_v29 }
0x146b   :  { %v3596_v60 = vsel %vm166_vm4, %v3584_v57, 0.0  ;;  %v3583_v61 = vmul.f32 %v3579_v27, %v3541_v16 }
0x146c   :  { %3597 = vadd.xlane.f32.xlu0 %v3596_v60  ;;  %v3953_v60 = vld [vmem:[%s5879_s0 + $0x20] sm:$0xff] }
0x146d   :  { %v3593_v62 = vsel %vm166_vm4, %v3583_v61, 0.0  ;;  %vm3881_vm15 = vcmp.ne.s32.totalorder %v3953_v60, 4294967196 }
0x146e   :  { %3594 = vadd.xlane.f32.xlu1 %v3593_v62  ;;  %v3955_v62 = vld [vmem:[%s5879_s0 + $0x30] sm:$0xff] }
0x146f   :  { %vm3883_vm0 = vcmp.ne.s32.totalorder %v3955_v62, 4294967196 }
0x14ed   :  { %v3592_v63 = vpop.xlane.xlu0 %3591 }
0x14ee   :  { %v3600_v0 = vmul.f32 0.03125, %v3592_v63  ;;  %v3956_v63 = vld [vmem:[%s5879_s0 + $0x38] sm:$0xff] }
0x14ef   :  { %v3589_v51 = vpop.xlane.xlu1 %3588  ;;  %vm3884_vm3 = vcmp.ne.s32.totalorder %v3956_v63, 4294967196 }
0x14f0   :  { %v3604_v50 = vsub.f32 %v3582_v37, %v3600_v0  ;;  %v3599_v54 = vmul.f32 0.03125, %v3589_v51 }
0x14f2   :  { %v3603_v52 = vsub.f32 %v3581_v42, %v3599_v54  ;;  %v3608_v45 = vmul.f32 %v3604_v50, %v3604_v50  ;;  %v4144_v42 = vld [vmem:[%s5884_s5 + $0x19] ss:$0 sm:$0xff] }
0x14f4   :  { %v3614_v38 = vsel %vm166_vm4, %v3608_v45, 0.0  ;;  %v3607_v46 = vmul.f32 %v3603_v52, %v3603_v52 }
0x14f5   :  { %v3598_v2 = vpop.xlane.xlu0 %3597  ;;  %3615 = vadd.xlane.f32.xlu0 %v3614_v38 }
0x14f6   :  { %v3602_v3 = vmul.f32 0.03125, %v3598_v2  ;;  %v3611_v33 = vsel %vm166_vm4, %v3607_v46, 0.0 }
0x14f7   :  { %v3595_v4 = vpop.xlane.xlu1 %3594  ;;  %3612 = vadd.xlane.f32.xlu1 %v3611_v33 }
0x14f8   :  { %v3606_v5 = vsub.f32 %v3584_v57, %v3602_v3  ;;  %v3601_v1 = vmul.f32 0.03125, %v3595_v4 }
0x14fa   :  { %v3605_v40 = vsub.f32 %v3583_v61, %v3601_v1  ;;  %v3610_v21 = vmul.f32 %v3606_v5, %v3606_v5  ;;  %v3954_v61 = vld [vmem:[%s5879_s0 + $0x28] sm:$0xff] }
0x14fb   :  { %vm3882_vm1 = vcmp.ne.s32.totalorder %v3954_v61, 4294967196 }
0x14fc   :  { %v3620_v58 = vsel %vm166_vm4, %v3610_v21, 0.0  ;;  %v3609_v6 = vmul.f32 %v3605_v40, %v3605_v40 }
0x14fd   :  { %3621 = vadd.xlane.f32.xlu0 %v3620_v58 }
0x14fe   :  { %v3617_v39 = vsel %vm166_vm4, %v3609_v6, 0.0 }
0x14ff   :  { %3618 = vadd.xlane.f32.xlu1 %v3617_v39 }
0x157e   :  { %v3616_v7 = vpop.xlane.xlu0 %3615 }
0x157f   :  { %v3624_v59 = vmul.f32 0.03125, %v3616_v7 }
0x1580   :  { %v3613_v8 = vpop.xlane.xlu1 %3612 }
0x1581   :  { %v3628_v9 = vadd.f32 1e-12, %v3624_v59  ;;  %v3623_v10 = vmul.f32 0.03125, %v3613_v8 }
0x1583   :  { %4889 = vrsqrt.f32 %v3628_v9  ;;  %v3627_v11 = vadd.f32 1e-12, %v3623_v10 }
0x1585   :  { %4891 = vrsqrt.f32 %v3627_v11 }
0x1586   :  { %v3622_v19 = vpop.xlane.xlu0 %3621 }
0x1587   :  { %v3626_v25 = vmul.f32 0.03125, %v3622_v19 }
0x1588   :  { %v3619_v20 = vpop.xlane.xlu1 %3618 }
0x1589   :  { %v3630_v35 = vadd.f32 1e-12, %v3626_v25  ;;  %v3625_v16 = vmul.f32 0.03125, %v3619_v20 }
0x158b   :  { %4893 = vrsqrt.f32 %v3630_v35  ;;  %v3629_v12 = vadd.f32 1e-12, %v3625_v16  ;;  %v4171_v35 = vsel %vm3883_vm0, 1.0, %v4953_v47  ;;  %v4169_v16 = vsel %vm3881_vm15, 1.0, %v4953_v47 }
0x158d   :  { %4895 = vrsqrt.f32 %v3629_v12  ;;  %v3920_v12 = vsel %vm3901_vm2, %v4169_v16, 0.0 }
0x1590   :  { %v4890_v13 = vpop.eup %4889 }
0x1591   :  { %v3636_v14 = vmul.f32 %v4890_v13, %v3604_v50  ;;  %v4170_v13 = vsel %vm3882_vm1, 1.0, %v4953_v47 }
0x1592   :  { %v4892_v28 = vpop.eup %4891 }
0x1593   :  { %v3635_v15 = vmul.f32 %v4892_v28, %v3603_v52  ;;  %v3644_v17 = vmul.f32 %v4142_v48, %v3636_v14  ;;  %v3921_v14 = vsel %vm3901_vm2, %v4170_v13, 0.0  ;;  %v4172_v28 = vsel %vm3884_vm3, 1.0, %v4953_v47 }
0x1595   :  { %v3643_v23 = vmul.f32 %v4142_v48, %v3635_v15  ;;  %v3652_v30 = vadd.f32 %v4143_v18, %v3644_v17  ;;  %v3925_v17 = vsel %vm3901_vm2, %v4172_v28, 0.0 }
0x1597   :  { %v3651_v24 = vadd.f32 %v4143_v18, %v3643_v23 }
0x1598   :  { %v4894_v26 = vpop.eup %4893 }
0x1599   :  { %4745 = vmatprep.mubr.msk.f32.mxu1 %vm166_vm4, %v3651_v24  ;;  %v3638_v31 = vmul.f32 %v4894_v26, %v3606_v5 }
0x159a   :  { %v4896_v32 = vpop.eup %4895  ;;  %4746 = vmatmul.mubr.msk.f32.vlgmr.msra.gmra.mxu1 %vm166_vm4, %v3652_v30 }
0x159b   :  { %v3637_v34 = vmul.f32 %v4896_v32, %v3605_v40  ;;  %v3646_v36 = vmul.f32 %v4142_v48, %v3638_v31 }
0x159d   :  { %v3645_v37 = vmul.f32 %v4142_v48, %v3637_v34  ;;  %v3654_v49 = vadd.f32 %v4143_v18, %v3646_v36  ;;  %v3922_v48 = vadd.f32 %v3921_v14, %v3920_v12 }
0x159f   :  { %v3653_v41 = vadd.f32 %v4143_v18, %v3645_v37 }
0x15a1   :  { %4748 = vmatprep.mubr.msk.f32.mxu1 %vm166_vm4, %v3653_v41 }
0x15a2   :  { %4749 = vmatmul.mubr.msk.f32.gmra.mxu1 %vm166_vm4, %v3654_v49 }
0x165a   :  { %v4747_v43 = vpop.f32.mrf.mxu1 }
0x165b   :  { %v3792_v44 = vadd.f32 %v4747_v43, %v4144_v42 }
0x165c   :  { %v3786_v53 = vpop.f32.mrf.mxu1 }
0x165d   :  { %v3787_v55 = vadd.f32 %v4144_v42, %v3786_v53  ;;  %3807 = vmax.xlane.f32.xlu0 %v3792_v44 }
0x165f   :  { %3805 = vmax.xlane.f32.xlu1 %v3787_v55 }
0x1662   :  { %v4750_v56 = vpop.f32.mrf.mxu1 }
0x1663   :  { %v3802_v29 = vadd.f32 %v4750_v56, %v4144_v42 }
0x1664   :  { %v3796_v57 = vpop.f32.mrf.mxu1 }
0x1665   :  { %v3797_v27 = vadd.f32 %v4144_v42, %v3796_v57  ;;  %3811 = vmax.xlane.f32.xlu0 %v3802_v29 }
0x1667   :  { %3809 = vmax.xlane.f32.xlu1 %v3797_v27 }
0x1678   :  { %3846 = vperm.xlu1 %4760, %v3953_v60  }
0x167b   :  { %3849 = vperm.xlu0 %4759, %v3954_v61  }
0x167c   :  { %3852 = vperm.xlu1 %4760, %v3955_v62  }
0x1680   :  { %3855 = vperm.xlu1 %4760, %v3956_v63  }
0x16e6   :  { %v5840_v0 = vpop.xlane.xlu0 %3807 }
0x16e7   :  { %v3814_v51 = vsub.f32 %v3792_v44, %v5840_v0 }
0x16e8   :  { %v5843_v50 = vpop.xlane.xlu1 %3805 }
0x16e9   :  { %v3819_v54 = vmul.f32 1.442695, %v3814_v51  ;;  %v3813_v52 = vsub.f32 %v3787_v55, %v5843_v50 }
0x16eb   :  { %4897 = vpow2.f32 %v3819_v54  ;;  %v3817_v45 = vmul.f32 1.442695, %v3813_v52 }
0x16ed   :  { %4899 = vpow2.f32 %v3817_v45 }
0x16ee   :  { %v5846_v38 = vpop.xlane.xlu0 %3811 }
0x16ef   :  { %v3816_v2 = vsub.f32 %v3802_v29, %v5846_v38 }
0x16f0   :  { %v5848_v46 = vpop.xlane.xlu1 %3809 }
0x16f1   :  { %v3815_v3 = vsub.f32 %v3797_v27, %v5848_v46  ;;  %v3823_v5 = vmul.f32 1.442695, %v3816_v2 }
0x16f3   :  { %v3821_v33 = vmul.f32 1.442695, %v3815_v3 }
0x16f4   :  { %v3847_v4 = vpop.permute.xlu1 %3846 }
0x16f5   :  { %4901 = vpow2.f32 %v3821_v33  ;;  %vm3857_vm11 = vcmp.eq.s32.totalorder %v5050_v22, %v3847_v4 }
0x16f6   :  { %v4165_v40 = vsel %vm3857_vm11, 1.0, %v4953_v47  ;;  %4903 = vpow2.f32 %v3823_v5  ;;  %v3850_v59 = vpop.permute.xlu0 %3849 }
0x16f7   :  { %v3869_v6 = vmul.f32 %v4165_v40, %v3787_v55  ;;  %vm3858_vm13 = vcmp.eq.s32.totalorder %v5050_v22, %v3850_v59 }
0x16f8   :  { %v4898_v1 = vpop.eup %4897  ;;  %v3853_v21 = vpop.permute.xlu1 %3852  ;;  %v4166_v11 = vsel %vm3858_vm13, 1.0, %v4953_v47 }
0x16f9   :  { %vm3859_vm12 = vcmp.eq.s32.totalorder %v5050_v22, %v3853_v21  ;;  %3827 = vadd.xlane.f32.xlu1 %v4898_v1  ;;  %v3870_v19 = vmul.f32 %v4166_v11, %v3792_v44 }
0x16fa   :  { %v4900_v58 = vpop.eup %4899  ;;  %v4167_v39 = vsel %vm3859_vm12, 1.0, %v4953_v47 }
0x16fb   :  { %3825 = vadd.xlane.f32.xlu0 %v4900_v58  ;;  %v3871_v7 = vmul.f32 %v4167_v39, %v3797_v27 }
0x16fc   :  { %v3856_v9 = vpop.permute.xlu1 %3855 }
0x16fd   :  { %3873 = vadd.xlane.f32.xlu1 %v3869_v6  ;;  %vm3860_vm14 = vcmp.eq.s32.totalorder %v5050_v22, %v3856_v9  ;;  %v3923_v22 = vsel %vm3901_vm2, %v4171_v35, 0.0 }
0x16fe   :  { %v4168_v25 = vsel %vm3860_vm14, 1.0, %v4953_v47  ;;  %v3924_v15 = vadd.f32 %v3923_v22, %v3922_v48 }
0x16ff   :  { %v3872_v20 = vmul.f32 %v4168_v25, %v3802_v29 }
0x1700   :  { %v3926_v18 = vadd.f32 %v3925_v17, %v3924_v15 }
0x1701   :  { %3877 = vadd.xlane.f32.xlu1 %v3871_v7 }
0x1702   :  { %v4902_v8 = vpop.eup %4901 }
0x1703   :  { %3829 = vadd.xlane.f32.xlu0 %v4902_v8  ;;  %v4904_v10 = vpop.eup %4903 }
0x1707   :  { %3831 = vadd.xlane.f32.xlu0 %v4904_v10 }
0x170b   :  { %3875 = vadd.xlane.f32.xlu0 %v3870_v19 }
0x170f   :  { %3879 = vadd.xlane.f32.xlu0 %v3872_v20 }
0x1713   :  { %3927 = vadd.xlane.f32.xlu0 %v3926_v18 }
0x1782   :  { %v3828_v23 = vpop.xlane.xlu1 %3827 }
0x1783   :  { %4905 = vlog2.f32 %v3828_v23 }
0x1784   :  { %v3826_v24 = vpop.xlane.xlu0 %3825 }
0x1785   :  { %4907 = vlog2.f32 %v3826_v24 }
0x1786   :  { %v3874_v42 = vpop.xlane.xlu1 %3873 }
0x178a   :  { %v3878_v61 = vpop.xlane.xlu1 %3877 }
0x178c   :  { %v3830_v26 = vpop.xlane.xlu0 %3829 }
0x178d   :  { %4909 = vlog2.f32 %v3830_v26 }
0x1790   :  { %v4906_v30 = vpop.eup %4905  ;;  %v3832_v31 = vpop.xlane.xlu0 %3831 }
0x1791   :  { %4911 = vlog2.f32 %v3832_v31  ;;  %v3836_v34 = vmul.f32 0.6931472, %v4906_v30 }
0x1792   :  { %v4908_v32 = vpop.eup %4907 }
0x1793   :  { %v3834_v36 = vmul.f32 0.6931472, %v4908_v32  ;;  %v3842_v47 = vadd.f32 %v3836_v34, %v5840_v0 }
0x1794   :  { %v3876_v29 = vpop.xlane.xlu0 %3875 }
0x1795   :  { %v3841_v37 = vadd.f32 %v3834_v36, %v5843_v50  ;;  %v3894_v44 = vmul.f32 %v4170_v13, %v3842_v47 }
0x1797   :  { %v3893_v41 = vmul.f32 %v4169_v16, %v3841_v37  ;;  %v3898_v60 = vsub.f32 %v3894_v44, %v3876_v29 }
0x1798   :  { %v3880_v45 = vpop.xlane.xlu0 %3879 }
0x1799   :  { %v3897_v53 = vsub.f32 %v3893_v41, %v3874_v42  ;;  %v3903_v0 = vsel %vm3901_vm2, %v3898_v60, 0.0 }
0x179a   :  { %v4910_v49 = vpop.eup %4909 }
0x179b   :  { %v3838_v43 = vmul.f32 0.6931472, %v4910_v49  ;;  %v3902_v62 = vsel %vm3901_vm2, %v3897_v53, 0.0 }
0x179c   :  { %v3904_v52 = vadd.f32 %v3903_v0, %v3902_v62  ;;  %v3928_v4 = vpop.xlane.xlu0 %3927 }
0x179d   :  { %v3843_v55 = vadd.f32 %v3838_v43, %v5848_v46  ;;  %v3929_v5 = vrot.slane %v3928_v4, 4 }
0x179e   :  { %v4912_v56 = vpop.eup %4911 }
0x179f   :  { %v3895_v57 = vmul.f32 %v4171_v35, %v3843_v55  ;;  %v3840_v27 = vmul.f32 0.6931472, %v4912_v56  ;;  %v3930_v1 = vadd.f32 %v3929_v5, %v3928_v4 }
0x17a1   :  { %v3844_v63 = vadd.f32 %v3840_v27, %v5846_v38  ;;  %v3899_v51 = vsub.f32 %v3895_v57, %v3878_v61  ;;  %v3931_v40 = vrot.slane %v3930_v1, 2 }
0x17a3   :  { %v3896_v50 = vmul.f32 %v4172_v28, %v3844_v63  ;;  %v3905_v54 = vsel %vm3901_vm2, %v3899_v51, 0.0  ;;  %v3932_v6 = vadd.f32 %v3931_v40, %v3930_v1 }
0x17a4   :  { %v3906_v46 = vadd.f32 %v3905_v54, %v3904_v52 }
0x17a5   :  { %v3900_v2 = vsub.f32 %v3896_v50, %v3880_v45  ;;  %v3933_v59 = vrot.slane %v3932_v6, 1 }
0x17a7   :  { %v3907_v3 = vsel %vm3901_vm2, %v3900_v2, 0.0  ;;  %v3934_v10 = vadd.f32 %v3933_v59, %v3932_v6 }
0x17a8   :  { %v3908_v33 = vadd.f32 %v3907_v3, %v3906_v46 }
0x17aa   :  { %3909 = vadd.xlane.f32.xlu1 %v3908_v33 }
0x1833   :  { %v3910_v21 = vpop.xlane.xlu1 %3909 }
0x1834   :  { %v3911_v38 = vrot.slane %v3910_v21, 4 }
0x1836   :  { %v3912_v58 = vadd.f32 %v3911_v38, %v3910_v21 }
0x1838   :  { %v3913_v39 = vrot.slane %v3912_v58, 2 }
0x183a   :  { %v3914_v7 = vadd.f32 %v3913_v39, %v3912_v58 }
0x183c   :  { %v3915_v8 = vrot.slane %v3914_v7, 1 }
0x183e   :  { %v3916_v9 = vadd.f32 %v3915_v8, %v3914_v7 }
0x1840   :  { %4751 = vpush %v3916_v9 }
0x1841   :  { %4753 = vpush %v3934_v10 }
0x1871   :  { %s4752_s24 = spop %4751 }
0x1872   :  { %3919 = sst [smem:[#allocation3]] %s4752_s24  ;;  %s4754_s25 = spop %4753 }
0x1873   :  { %3937 = sst [smem:[#allocation3 + $0x1]] %s4754_s25 }
0x1874   :  { %4948 = shalt.err (!%p4945_p4)
}
0x1875   :  { %s4954_s27 = smov [#allocation3]  }
0x1876   :  { %3947 = dma.smem_to_vmem %s4954_s27, 16, %s3945_s23, [#allocation4]  }
0x1877   :  { %4949 = dma.done.wait [#allocation4], 16  }
0x1878   :  { %4950 = vsyncadd [#allocation4], 4294967280 }
0x1879   :  { %3951 = sfence }
0x187a   :  { %3952 = vsyncpa [#allocation4], 1 }

</bundles_post_ra>
